<compile_context>
chip_gen: v7x
topology: tpu7x:2x2x1
jax: 0.10.0
libtpu: 0.0.40
codegen_flags: <defaults>
</compile_context>

<pallas_src>
import functools

import jax
import jax.numpy as jnp
from jax.experimental import pallas as pl
from jax.experimental.pallas import tpu as pltpu


def _round_up(x, m):
    return ((x + m - 1) // m) * m


def _cpad(c):
    return _round_up(max(int(c), 1), 128)


def _tpu_vmem_bytes():
    try:
        info = pltpu.get_tpu_info()
        for attr in ("vmem_capacity_bytes", "vmem_size_bytes", "vmem_bytes"):
            v = getattr(info, attr, None)
            if v:
                return int(v)
    except Exception:
        pass
    return 128 * 1024 * 1024


_VMEM_BYTES = _tpu_vmem_bytes()
_BIG_VMEM = _VMEM_BYTES >= 100 * 1024 * 1024          # v5e/v6e (128 MiB) vs v7x (64 MiB)
VMEM_LIMIT = min(48 * 1024 * 1024, _VMEM_BYTES // 2)
_TM_CAP = 512 if _BIG_VMEM else 256                    # cap GEMM M tile on v7x
_SINGLE_SHOT_K = 8192 if _BIG_VMEM else 4096           # K kept fully resident per step

_IN_SINGLE_SHOT_MAX_L = 4096                           # above this, tile IN over L
_IN_TILE_CANDIDATES = (1024, 512, 256, 128, 64, 32, 16, 8)


# ----------------------------------------------------------------------------
# Pallas matmul kernels (the conv hot path after im2col) -- bf16 in, f32 acc
# ----------------------------------------------------------------------------
def _mm_single_kernel(a_ref, b_ref, o_ref):
    o_ref[...] = jnp.dot(a_ref[...], b_ref[...],
                         preferred_element_type=jnp.float32).astype(o_ref.dtype)


def _mm_loop_kernel(a_ref, b_ref, o_ref, acc_ref):
    @pl.when(pl.program_id(2) == 0)
    def _():
        acc_ref[...] = jnp.zeros_like(acc_ref)

    acc_ref[...] += jnp.dot(a_ref[...], b_ref[...],
                            preferred_element_type=jnp.float32)

    @pl.when(pl.program_id(2) == pl.num_programs(2) - 1)
    def _():
        o_ref[...] = acc_ref[...].astype(o_ref.dtype)


def _pick_tm(M, cap):
    """M tile: multiple of 16 (bf16 packing), aim for >= 2 (even) tiles."""
    if M <= 16:
        return 16
    if M <= 2 * cap:
        return min(cap, _round_up((M + 1) // 2, 16))   # exactly 2 tiles
    if (-(-M // cap)) % 2 == 0:
        return cap
    if cap >= 256 and (-(-M // (cap // 2))) % 2 == 0:
        return cap // 2
    return cap


def pallas_matmul(a, b, out_dtype=jnp.bfloat16):
    """a: (M, K) bf16, b: (K, N) bf16; K, N multiples of 128 -> (M, N)."""
    M, K = a.shape
    K2, Nc = b.shape
    assert K == K2 and K % 128 == 0 and Nc % 128 == 0

    tm = _pick_tm(M, _TM_CAP)
    Mp = _round_up(M, tm)
    if Mp != M:
        a = jnp.pad(a, ((0, Mp - M), (0, 0)))
    tn = 256 if Nc % 256 == 0 else 128

    if K <= _SINGLE_SHOT_K:
        out = pl.pallas_call(
            _mm_single_kernel,
            out_shape=jax.ShapeDtypeStruct((Mp, Nc), out_dtype),
            grid_spec=pltpu.PrefetchScalarGridSpec(
                num_scalar_prefetch=0,
                grid=(Mp // tm, Nc // tn),
                in_specs=[pl.BlockSpec((tm, K), lambda i, j: (i, 0)),
                          pl.BlockSpec((K, tn), lambda i, j: (0, j))],
                out_specs=pl.BlockSpec((tm, tn), lambda i, j: (i, j))),
            compiler_params=pltpu.CompilerParams(
                dimension_semantics=("parallel", "parallel"),
                vmem_limit_bytes=VMEM_LIMIT),
        )(a, b)
    else:  # fallback for very large K: K-loop, store gated to the last step
        tk = max(t for t in (4096, 2048, 1024, 512, 256, 128) if K % t == 0)
        out = pl.pallas_call(
            _mm_loop_kernel,
            out_shape=jax.ShapeDtypeStruct((Mp, Nc), out_dtype),
            grid_spec=pltpu.PrefetchScalarGridSpec(
                num_scalar_prefetch=0,
                grid=(Mp // tm, Nc // tn, K // tk),
                in_specs=[pl.BlockSpec((tm, tk), lambda i, j, k: (i, k)),
                          pl.BlockSpec((tk, tn), lambda i, j, k: (k, j))],
                out_specs=pl.BlockSpec((tm, tn), lambda i, j, k: (i, j)),
                scratch_shapes=[pltpu.VMEM((tm, tn), jnp.float32)]),
            compiler_params=pltpu.CompilerParams(
                dimension_semantics=("parallel", "parallel", "arbitrary"),
                vmem_limit_bytes=VMEM_LIMIT),
        )(a, b)
    return out if Mp == M else out[:M]


# ----------------------------------------------------------------------------
# Pallas instance-norm (+affine, optional ReLU, optional fused residual add)
# ----------------------------------------------------------------------------
def _in_kernel(x_ref, g_ref, b_ref, o_ref, *, relu, eps):
    x = x_ref[...].astype(jnp.float32)                       # (1, L, 128)
    mean = jnp.mean(x, axis=1, keepdims=True)
    var = jnp.mean(jnp.square(x - mean), axis=1, keepdims=True)   # biased (PyTorch)
    y = (x - mean) * jax.lax.rsqrt(var + eps)
    y = y * g_ref[...] + b_ref[...]
    if relu:
        y = jnp.maximum(y, 0.0)
    o_ref[...] = y.astype(o_ref.dtype)


def _in_res_kernel(x_ref, g_ref, b_ref, r_ref, o_ref, *, eps):
    x = x_ref[...].astype(jnp.float32)
    mean = jnp.mean(x, axis=1, keepdims=True)
    var = jnp.mean(jnp.square(x - mean), axis=1, keepdims=True)
    y = (x - mean) * jax.lax.rsqrt(var + eps)
    y = y * g_ref[...] + b_ref[...]
    y = y + r_ref[...].astype(jnp.float32)                   # fused residual add
    o_ref[...] = y.astype(o_ref.dtype)


def _in_tiled_kernel(x_ref, g_ref, b_ref, o_ref, s_ref, q_ref, *, relu, eps, n_elems):
    p = pl.program_id(2)
    l = pl.program_id(3)
    x = x_ref[...].astype(jnp.float32)                       # (1, tl, 128)

    @pl.when(jnp.logical_and(p == 0, l == 0))
    def _():
        s_ref[...] = jnp.zeros_like(s_ref)
        q_ref[...] = jnp.zeros_like(q_ref)

    @pl.when(p == 0)
    def _():
        s_ref[...] += jnp.sum(x, axis=1, keepdims=True)
        q_ref[...] += jnp.sum(x * x, axis=1, keepdims=True)

    @pl.when(p == 1)
    def _():
        inv_n = 1.0 / n_elems
        mean = s_ref[...] * inv_n
        var = jnp.maximum(q_ref[...] * inv_n - mean * mean, 0.0)
        y = (x - mean) * jax.lax.rsqrt(var + eps)
        y = y * g_ref[...] + b_ref[...]
        if relu:
            y = jnp.maximum(y, 0.0)
        o_ref[...] = y.astype(o_ref.dtype)


def _in_res_tiled_kernel(x_ref, g_ref, b_ref, r_ref, o_ref, s_ref, q_ref, *,
                         eps, n_elems):
    p = pl.program_id(2)
    l = pl.program_id(3)
    x = x_ref[...].astype(jnp.float32)

    @pl.when(jnp.logical_and(p == 0, l == 0))
    def _():
        s_ref[...] = jnp.zeros_like(s_ref)
        q_ref[...] = jnp.zeros_like(q_ref)

    @pl.when(p == 0)
    def _():
        s_ref[...] += jnp.sum(x, axis=1, keepdims=True)
        q_ref[...] += jnp.sum(x * x, axis=1, keepdims=True)

    @pl.when(p == 1)
    def _():
        inv_n = 1.0 / n_elems
        mean = s_ref[...] * inv_n
        var = jnp.maximum(q_ref[...] * inv_n - mean * mean, 0.0)
        y = (x - mean) * jax.lax.rsqrt(var + eps)
        y = y * g_ref[...] + b_ref[...]
        y = y + r_ref[...].astype(jnp.float32)
        o_ref[...] = y.astype(o_ref.dtype)


def pallas_instance_norm(x, gamma, beta, *, relu, residual=None, eps=1e-5,
                         out_dtype=jnp.bfloat16, force_tiled=False):
    """x: (N, L, C), C multiple of 128; normalizes over L per (n, c)."""
    Nb, L, C = x.shape
    assert C % 128 == 0
    tc = 128
    g = gamma.reshape(1, 1, C).astype(jnp.float32)
    b = beta.reshape(1, 1, C).astype(jnp.float32)

    tl = next((t for t in _IN_TILE_CANDIDATES if L % t == 0 and L // t >= 2), None)
    use_tiled = (tl is not None) and (force_tiled or L > _IN_SINGLE_SHOT_MAX_L)

    if not use_tiled:
        x_spec = pl.BlockSpec((1, L, tc), lambda n, c: (n, 0, c))
        v_spec = pl.BlockSpec((1, 1, tc), lambda n, c: (0, 0, c))
        if residual is None:
            kern = functools.partial(_in_kernel, relu=relu, eps=eps)
            in_specs = [x_spec, v_spec, v_spec]
            args = (x, g, b)
        else:
            kern = functools.partial(_in_res_kernel, eps=eps)
            in_specs = [x_spec, v_spec, v_spec, x_spec]
            args = (x, g, b, residual)
        return pl.pallas_call(
            kern,
            out_shape=jax.ShapeDtypeStruct((Nb, L, C), out_dtype),
            grid=(Nb, C // tc),
            in_specs=in_specs,
            out_specs=x_spec,
            compiler_params=pltpu.CompilerParams(
                dimension_semantics=("parallel", "parallel"),
                vmem_limit_bytes=VMEM_LIMIT),
        )(*args)

    # Two-pass tiled reduction over L: pass 0 accumulates sum/sumsq in scratch,
    # pass 1 normalizes and writes.  Output / residual use a "lazy" index map
    # (n, l*p, c) so no block is fetched/written per step during pass 0.
    x_spec = pl.BlockSpec((1, tl, tc), lambda n, c, p, l: (n, l, c))
    lazy_spec = pl.BlockSpec((1, tl, tc), lambda n, c, p, l: (n, l * p, c))
    v_spec = pl.BlockSpec((1, 1, tc), lambda n, c, p, l: (0, 0, c))
    scratch = [pltpu.VMEM((1, 1, tc), jnp.float32),
               pltpu.VMEM((1, 1, tc), jnp.float32)]
    if residual is None:
        kern = functools.partial(_in_tiled_kernel, relu=relu, eps=eps,
                                 n_elems=float(L))
        in_specs = [x_spec, v_spec, v_spec]
        args = (x, g, b)
    else:
        kern = functools.partial(_in_res_tiled_kernel, eps=eps, n_elems=float(L))
        in_specs = [x_spec, v_spec, v_spec, lazy_spec]
        args = (x, g, b, residual)
    return pl.pallas_call(
        kern,
        out_shape=jax.ShapeDtypeStruct((Nb, L, C), out_dtype),
        grid=(Nb, C // tc, 2, L // tl),
        in_specs=in_specs,
        out_specs=lazy_spec,
        scratch_shapes=scratch,
        compiler_params=pltpu.CompilerParams(
            dimension_semantics=("parallel", "parallel", "arbitrary", "arbitrary"),
            vmem_limit_bytes=VMEM_LIMIT),
    )(*args)


# ----------------------------------------------------------------------------
# Conv helpers (NHWC im2col glue + Pallas GEMM)
# ----------------------------------------------------------------------------
def _im2col_nhwc(x, kh, kw, stride, pad, cin_real):
    """x: (N, H, W, C) -> (N*Ho*Wo, kh*kw*cin_real), tap-major / channel-minor."""
    N, H, W, C = x.shape
    if cin_real < C:
        x = x[..., :cin_real]                         # drop zero-padded channels
    (pt, pb), (pql, pqr) = pad
    sh, sw = stride
    xp = jnp.pad(x, ((0, 0), (pt, pb), (pql, pqr), (0, 0)))
    Ho = (H + pt + pb - kh) // sh + 1
    Wo = (W + pql + pqr - kw) // sw + 1
    taps = []
    for i in range(kh):
        for j in range(kw):
            taps.append(xp[:, i:i + (Ho - 1) * sh + 1:sh,
                           j:j + (Wo - 1) * sw + 1:sw, :])
    p = jnp.stack(taps, axis=3)                       # (N, Ho, Wo, kh*kw, cin)
    return p.reshape(N * Ho * Wo, kh * kw * cin_real), (N, Ho, Wo)


def conv2d_nhwc(x, wmat, kh, kw, stride, pad, cin_real, out_dtype=jnp.bfloat16):
    """x: (N,H,W,C>=cin_real) bf16, wmat: (Kp, Cout_pad) bf16 -> NHWC out_dtype."""
    patches, (N, Ho, Wo) = _im2col_nhwc(x, kh, kw, stride, pad, cin_real)
    K = patches.shape[1]
    Kp = wmat.shape[0]
    if K < Kp:                                        # pad only the GEMM K dim
        patches = jnp.pad(patches, ((0, 0), (0, Kp - K)))
    out = pallas_matmul(patches, wmat, out_dtype=out_dtype)
    return out.reshape(N, Ho, Wo, wmat.shape[1])


def conv_in_act(x, wmat, kh, kw, stride, pad, gamma, beta, *, relu, cin_real,
                residual=None):
    """Conv -> InstanceNorm(affine) -> optional ReLU / fused residual; NHWC."""
    y = conv2d_nhwc(x, wmat, kh, kw, stride, pad, cin_real)    # bf16
    N, Ho, Wo, Cp = y.shape
    r = None if residual is None else residual.reshape(N, Ho * Wo, Cp)
    y = pallas_instance_norm(y.reshape(N, Ho * Wo, Cp), gamma, beta,
                             relu=relu, residual=r)
    return y.reshape(N, Ho, Wo, Cp)


def _interleave4(y4):
    """y4: (N, 4, H, W, C), phase order [(0,0),(0,1),(1,0),(1,1)] -> (N,2H,2W,C)."""
    N, _, H, W, C = y4.shape
    y = y4.reshape(N, 2, 2, H, W, C).transpose(0, 3, 1, 4, 2, 5)
    return y.reshape(N, 2 * H, 2 * W, C)


def conv_transpose_in_act(x, phase_wmats, gamma, beta, *, cin_real):
    """ConvTranspose2d(k=4,s=2,p=1) via 4-phase decomposition + IN + ReLU.

    IN statistics are order-invariant, so IN+ReLU runs on the cheap
    phase-concatenated layout and the sub-pixel interleave happens on the
    bf16 normalized result.
    """
    N, H, W, _ = x.shape
    phs = []
    for a in (0, 1):
        for b in (0, 1):
            pad = ((1 - a, a), (1 - b, b))
            phs.append(conv2d_nhwc(x, phase_wmats[(a, b)], 2, 2, (1, 1), pad,
                                   cin_real))
    Cp = phs[0].shape[-1]
    y4 = jnp.stack(phs, axis=1)                                  # (N, 4, H, W, Cp)
    y = pallas_instance_norm(y4.reshape(N, 4 * H * W, Cp), gamma, beta, relu=True)
    return _interleave4(y.reshape(N, 4, H, W, Cp))


# ----------------------------------------------------------------------------
# Weight packing (done once at __init__, in bf16)
# ----------------------------------------------------------------------------
def _pack_conv_weight(w, cout_pad):
    """w: (Cout, Cin, KH, KW) f32 -> (round_up(KH*KW*Cin,128), cout_pad) bf16."""
    Cout, Cin, KH, KW = w.shape
    K = KH * KW * Cin
    Kp = _round_up(K, 128)
    wm = jnp.transpose(w, (2, 3, 1, 0)).reshape(K, Cout)
    wm = jnp.pad(wm, ((0, Kp - K), (0, cout_pad - Cout)))
    return wm.astype(jnp.bfloat16)


def _pack_conv_transpose_phases(w_t, cout_pad):
    """w_t: (Cin, Cout, 4, 4) -> dict (a,b) -> packed 2x2 phase kernel."""
    wf = jnp.flip(w_t, axis=(2, 3)).transpose(1, 0, 2, 3)    # (Cout, Cin, 4, 4)
    return {(a, b): _pack_conv_weight(wf[:, :, a::2, b::2], cout_pad)
            for a in (0, 1) for b in (0, 1)}


def _pad_vec(v, cp):
    v = jnp.asarray(v, jnp.float32)
    return jnp.pad(v, (0, cp - v.shape[0]))


# ----------------------------------------------------------------------------
# Generator forward (pure function, jitted)
# ----------------------------------------------------------------------------
def _generator_forward(params, x, c, *, conv_dim, c_dim, repeat_num):
    p = params
    N, _, H, W = x.shape
    x_nhwc = x.transpose(0, 2, 3, 1)                                   # (N,H,W,1)
    c_map = jnp.broadcast_to(c[:, None, None, :], (N, H, W, c_dim)).astype(x.dtype)
    h = jnp.concatenate([x_nhwc, c_map], axis=-1).astype(jnp.bfloat16)  # real Cin

    # Initial conv + IN + ReLU (K padded only to 128-multiple, not Cin to 128)
    h = conv_in_act(h, p["w0"], 3, 9, (1, 1), ((1, 1), (4, 4)),
                    p["g0"], p["b0"], relu=True, cin_real=1 + c_dim)
    curr = conv_dim
    # Down-sampling
    for i in range(2):
        h = conv_in_act(h, p[f"wd{i}"], 4, 8, (2, 2), ((1, 1), (3, 3)),
                        p[f"gd{i}"], p[f"bd{i}"], relu=True, cin_real=curr)
        curr *= 2
    # Residual blocks (residual add fused into the second IN kernel)
    for i in range(repeat_num):
        y = conv_in_act(h, p[f"wr{i}_1"], 3, 3, (1, 1), ((1, 1), (1, 1)),
                        p[f"gr{i}_1"], p[f"br{i}_1"], relu=True, cin_real=curr)
        h = conv_in_act(y, p[f"wr{i}_2"], 3, 3, (1, 1), ((1, 1), (1, 1)),
                        p[f"gr{i}_2"], p[f"br{i}_2"], relu=False, residual=h,
                        cin_real=curr)
    # Up-sampling (ConvTranspose2d via 4-phase decomposition)
    for i in range(2):
        wm = {(a, b): p[f"wu{i}_{a}{b}"] for a in (0, 1) for b in (0, 1)}
        h = conv_transpose_in_act(h, wm, p[f"gu{i}"], p[f"bu{i}"], cin_real=curr)
        curr //= 2
    # Final 7x7 conv, Cout=1 (no norm / activation)
    out = conv2d_nhwc(h, p["wf"], 7, 7, (1, 1), ((3, 3), (3, 3)),
                      cin_real=curr, out_dtype=jnp.float32)
    return out[..., :1].transpose(0, 3, 1, 2)                          # (N,1,H,W)


class GeneratorPallas:
    def __init__(self, conv_dim=64, num_speakers=10, repeat_num=6,
                 key=jax.random.PRNGKey(0)):
        self.conv_dim = conv_dim
        self.c_dim = num_speakers
        self.repeat_num = repeat_num

        def nrm(k, shape, scale=0.05):
            return (scale * jax.random.normal(k, shape)).astype(jnp.float32)

        keys = iter(jax.random.split(key, 64))
        p = {}
        cin0 = 1 + self.c_dim

        # Initial conv block: Conv2d(1+c_dim, conv_dim, (3,9), pad (1,4), bias=False)
        p["w0"] = _pack_conv_weight(nrm(next(keys), (conv_dim, cin0, 3, 9)),
                                    _cpad(conv_dim))
        p["g0"] = _pad_vec(jnp.ones((conv_dim,)), _cpad(conv_dim))
        p["b0"] = _pad_vec(jnp.zeros((conv_dim,)), _cpad(conv_dim))
        curr = conv_dim
        # Down-sampling: Conv2d(curr, 2*curr, (4,8), s=2, pad (1,3))
        for i in range(2):
            p[f"wd{i}"] = _pack_conv_weight(nrm(next(keys), (curr * 2, curr, 4, 8)),
                                            _cpad(curr * 2))
            p[f"gd{i}"] = _pad_vec(jnp.ones((curr * 2,)), _cpad(curr * 2))
            p[f"bd{i}"] = _pad_vec(jnp.zeros((curr * 2,)), _cpad(curr * 2))
            curr *= 2
        # Residual blocks
        for i in range(self.repeat_num):
            p[f"wr{i}_1"] = _pack_conv_weight(nrm(next(keys), (curr, curr, 3, 3)),
                                              _cpad(curr))
            p[f"gr{i}_1"] = _pad_vec(jnp.ones((curr,)), _cpad(curr))
            p[f"br{i}_1"] = _pad_vec(jnp.zeros((curr,)), _cpad(curr))
            p[f"wr{i}_2"] = _pack_conv_weight(nrm(next(keys), (curr, curr, 3, 3)),
                                              _cpad(curr))
            p[f"gr{i}_2"] = _pad_vec(jnp.ones((curr,)), _cpad(curr))
            p[f"br{i}_2"] = _pad_vec(jnp.zeros((curr,)), _cpad(curr))
        # Up-sampling: ConvTranspose2d(curr, curr//2, 4, s=2, p=1) -> 4 phase kernels
        for i in range(2):
            phases = _pack_conv_transpose_phases(
                nrm(next(keys), (curr, curr // 2, 4, 4)), _cpad(curr // 2))
            for (a, b), wm in phases.items():
                p[f"wu{i}_{a}{b}"] = wm
            p[f"gu{i}"] = _pad_vec(jnp.ones((curr // 2,)), _cpad(curr // 2))
            p[f"bu{i}"] = _pad_vec(jnp.zeros((curr // 2,)), _cpad(curr // 2))
            curr //= 2
        # Final conv: Conv2d(curr, 1, 7, pad=3, bias=False)
        p["wf"] = _pack_conv_weight(nrm(next(keys), (1, curr, 7, 7)), 128)
        self.params = p

        self._fwd = jax.jit(functools.partial(
            _generator_forward, conv_dim=self.conv_dim, c_dim=self.c_dim,
            repeat_num=self.repeat_num))

    def __call__(self, x, c):
        # x: (N, 1, H, W) NCHW, c: (N, c_dim) -> (N, 1, H, W) NCHW
        return self._fwd(self.params, x, c)


# ----------------------------------------------------------------------------
if __name__ == "__main__":
    key = jax.random.PRNGKey(0)
    kx, kc, kp, k1, k2, k3, k4, k5, k6 = jax.random.split(key, 9)

    # Small, architecture-consistent shapes: H, W divisible by 4.
    batch, H, W = 2, 16, 16
    conv_dim, num_speakers, repeat_num = 16, 4, 2

    x = jax.random.normal(kx, (batch, 1, H, W), dtype=jnp.float32)
    c = jax.nn.one_hot(jax.random.randint(kc, (batch,), 0, num_speakers),
                       num_speakers, dtype=jnp.float32)

    gen = GeneratorPallas(conv_dim=conv_dim, num_speakers=num_speakers,
                          repeat_num=repeat_num, key=kp)
    out = jax.block_until_ready(gen(x, c))
    assert out.shape == (batch, 1, H, W), out.shape
    assert jnp.all(jnp.isfinite(out))

    # --- check 1: tiled two-pass instance-norm vs. pure-JAX reference ------
    xt = jax.random.normal(k1, (2, 512, 128), dtype=jnp.float32)
    g = 1.0 + 0.1 * jax.random.normal(k2, (128,), dtype=jnp.float32)
    b = 0.1 * jax.random.normal(k3, (128,), dtype=jnp.float32)
    rt = jax.random.normal(k4, (2, 512, 128), dtype=jnp.float32)
    xb = xt.astype(jnp.bfloat16)
    rb = rt.astype(jnp.bfloat16)
    xr = xb.astype(jnp.float32)
    mu = xr.mean(axis=1, keepdims=True)
    var = ((xr - mu) ** 2).mean(axis=1, keepdims=True)
    norm = (xr - mu) * jax.lax.rsqrt(var + 1e-5) * g + b

    got_a = pallas_instance_norm(xb, g, b, relu=True,
                                 force_tiled=True).astype(jnp.float32)
    ref_a = jnp.maximum(norm, 0.0)
    assert float(jnp.max(jnp.abs(got_a - ref_a))) < 5e-2

    got_b = pallas_instance_norm(xb, g, b, relu=False, residual=rb,
                                 force_tiled=True).astype(jnp.float32)
    ref_b = norm + rb.astype(jnp.float32)
    assert float(jnp.max(jnp.abs(got_b - ref_b))) < 8e-2

    # --- check 2: 4-phase ConvTranspose2d(k=4,s=2,p=1) vs. lax reference ---
    cin_t, cout_t, Ht, Wt = 16, 8, 6, 6
    xt2 = 0.5 * jax.random.normal(k5, (1, Ht, Wt, cin_t), dtype=jnp.float32)
    wt = 0.05 * jax.random.normal(k6, (cin_t, cout_t, 4, 4), dtype=jnp.float32)
    phase_w = _pack_conv_transpose_phases(wt, _cpad(cout_t))
    phs = [conv2d_nhwc(xt2.astype(jnp.bfloat16), phase_w[(a, b)], 2, 2, (1, 1),
                       ((1 - a, a), (1 - b, b)), cin_t, out_dtype=jnp.float32)
           for a in (0, 1) for b in (0, 1)]
    got_t = _interleave4(jnp.stack(phs, axis=1))[..., :cout_t]
    w_flip = jnp.flip(wt, (2, 3)).transpose(1, 0, 2, 3)          # (Cout, Cin, 4, 4)
    ref_t = jax.lax.conv_general_dilated(
        xt2.transpose(0, 3, 1, 2), w_flip, (1, 1), [(2, 2), (2, 2)],
        lhs_dilation=(2, 2), dimension_numbers=("NCHW", "OIHW", "NCHW"),
        precision=jax.lax.Precision.HIGHEST).transpose(0, 2, 3, 1)
    assert got_t.shape == ref_t.shape == (1, 2 * Ht, 2 * Wt, cout_t)
    assert float(jnp.max(jnp.abs(got_t - ref_t))) < 3e-2

    print("KERNEL_OK")
</pallas_src>

<mosaic_0001>
module attributes {stable_mosaic.version = 11 : i64} {
  func.func @_in_kernel(%arg0: i32, %arg1: i32, %arg2: memref<1x256x128xbf16, #tpu.memory_space<vmem>>, %arg3: memref<1x1x128xf32, #tpu.memory_space<vmem>>, %arg4: memref<1x1x128xf32, #tpu.memory_space<vmem>>, %arg5: memref<1x256x128xbf16, #tpu.memory_space<vmem>>) attributes {dimension_semantics = [#tpu.dimension_semantics<parallel>, #tpu.dimension_semantics<parallel>], iteration_bounds = array<i64: 2, 1>, scalar_prefetch = 0 : i64, scratch_operands = 0 : i64, tpu.core_type = #tpu.core_type<tc>, window_params = [{transform_indices = @transform_0, window_bounds = array<i64: 1, 256, 128>}, {transform_indices = @transform_1, window_bounds = array<i64: 1, 1, 128>}, {transform_indices = @transform_2, window_bounds = array<i64: 1, 1, 128>}, {transform_indices = @transform_3, window_bounds = array<i64: 1, 256, 128>}]} {
    %c0 = arith.constant 0 : index
    %c0_0 = arith.constant 0 : index
    %c0_1 = arith.constant 0 : index
    %0 = vector.load %arg2[%c0, %c0_0, %c0_1] : memref<1x256x128xbf16, #tpu.memory_space<vmem>>, vector<1x256x128xbf16>
    %1 = arith.extf %0 : vector<1x256x128xbf16> to vector<1x256x128xf32>
    %cst = arith.constant dense<0.000000e+00> : vector<1x128xf32>
    %2 = vector.multi_reduction <add>, %1, %cst [1] : vector<1x256x128xf32> to vector<1x128xf32>
    %3 = vector.shape_cast %2 : vector<1x128xf32> to vector<1x1x128xf32>
    %cst_2 = arith.constant 2.560000e+02 : f32
    %4 = vector.broadcast %cst_2 : f32 to vector<1x1x128xf32>
    %5 = arith.divf %3, %4 : vector<1x1x128xf32>
    %6 = vector.broadcast %5 : vector<1x1x128xf32> to vector<1x256x128xf32>
    %7 = arith.subf %1, %6 : vector<1x256x128xf32>
    %8 = arith.mulf %7, %7 : vector<1x256x128xf32>
    %cst_3 = arith.constant dense<0.000000e+00> : vector<1x128xf32>
    %9 = vector.multi_reduction <add>, %8, %cst_3 [1] : vector<1x256x128xf32> to vector<1x128xf32>
    %10 = vector.shape_cast %9 : vector<1x128xf32> to vector<1x1x128xf32>
    %cst_4 = arith.constant 2.560000e+02 : f32
    %11 = vector.broadcast %cst_4 : f32 to vector<1x1x128xf32>
    %12 = arith.divf %10, %11 : vector<1x1x128xf32>
    %13 = vector.broadcast %5 : vector<1x1x128xf32> to vector<1x256x128xf32>
    %14 = arith.subf %1, %13 : vector<1x256x128xf32>
    %cst_5 = arith.constant 9.99999974E-6 : f32
    %15 = vector.broadcast %cst_5 : f32 to vector<1x1x128xf32>
    %16 = arith.addf %12, %15 : vector<1x1x128xf32>
    %17 = math.rsqrt %16 : vector<1x1x128xf32>
    %18 = vector.broadcast %17 : vector<1x1x128xf32> to vector<1x256x128xf32>
    %19 = arith.mulf %14, %18 : vector<1x256x128xf32>
    %c0_6 = arith.constant 0 : index
    %c0_7 = arith.constant 0 : index
    %c0_8 = arith.constant 0 : index
    %20 = vector.load %arg3[%c0_6, %c0_7, %c0_8] : memref<1x1x128xf32, #tpu.memory_space<vmem>>, vector<1x1x128xf32>
    %21 = vector.broadcast %20 : vector<1x1x128xf32> to vector<1x256x128xf32>
    %22 = arith.mulf %19, %21 : vector<1x256x128xf32>
    %c0_9 = arith.constant 0 : index
    %c0_10 = arith.constant 0 : index
    %c0_11 = arith.constant 0 : index
    %23 = vector.load %arg4[%c0_9, %c0_10, %c0_11] : memref<1x1x128xf32, #tpu.memory_space<vmem>>, vector<1x1x128xf32>
    %24 = vector.broadcast %23 : vector<1x1x128xf32> to vector<1x256x128xf32>
    %25 = arith.addf %22, %24 : vector<1x256x128xf32>
    %cst_12 = arith.constant 0.000000e+00 : f32
    %26 = vector.broadcast %cst_12 : f32 to vector<1x256x128xf32>
    %27 = arith.maximumf %25, %26 : vector<1x256x128xf32>
    %28 = arith.truncf %27 : vector<1x256x128xf32> to vector<1x256x128xbf16>
    %c0_13 = arith.constant 0 : index
    %c0_14 = arith.constant 0 : index
    %c0_15 = arith.constant 0 : index
    %29 = vector.load %arg5[%c0_13, %c0_14, %c0_15] : memref<1x256x128xbf16, #tpu.memory_space<vmem>>, vector<1x256x128xbf16>
    tpu.vector_store %arg5[%c0_13, %c0_14, %c0_15], %28 {strides = array<i32>} : memref<1x256x128xbf16, #tpu.memory_space<vmem>>, vector<1x256x128xbf16>,
    return
  }
  func.func @transform_0(%arg0: i32, %arg1: i32) -> (i32, i32, i32) {
    %c0_i32 = arith.constant 0 : i32
    %c0_i32_0 = arith.constant 0 : i32
    return %arg0, %c0_i32, %arg1 : i32, i32, i32
  }
  func.func @transform_1(%arg0: i32, %arg1: i32) -> (i32, i32, i32) {
    %c0_i32 = arith.constant 0 : i32
    %c0_i32_0 = arith.constant 0 : i32
    %c0_i32_1 = arith.constant 0 : i32
    return %c0_i32, %c0_i32_0, %arg1 : i32, i32, i32
  }
  func.func @transform_2(%arg0: i32, %arg1: i32) -> (i32, i32, i32) {
    %c0_i32 = arith.constant 0 : i32
    %c0_i32_0 = arith.constant 0 : i32
    %c0_i32_1 = arith.constant 0 : i32
    return %c0_i32, %c0_i32_0, %arg1 : i32, i32, i32
  }
  func.func @transform_3(%arg0: i32, %arg1: i32) -> (i32, i32, i32) {
    %c0_i32 = arith.constant 0 : i32
    %c0_i32_0 = arith.constant 0 : i32
    return %arg0, %c0_i32, %arg1 : i32, i32, i32
  }
}

module attributes {stable_mosaic.version = 11 : i64} {
  func.func @_mm_single_kernel(%arg0: i32, %arg1: i32, %arg2: memref<256x256xbf16, #tpu.memory_space<vmem>>, %arg3: memref<256x128xbf16, #tpu.memory_space<vmem>>, %arg4: memref<256x128xbf16, #tpu.memory_space<vmem>>) attributes {dimension_semantics = [#tpu.dimension_semantics<parallel>, #tpu.dimension_semantics<parallel>], iteration_bounds = array<i64: 2, 1>, scalar_prefetch = 0 : i64, scratch_operands = 0 : i64, tpu.core_type = #tpu.core_type<tc>, window_params = [{transform_indices = @transform_0, window_bounds = array<i64: 256, 256>}, {transform_indices = @transform_1, window_bounds = array<i64: 256, 128>}, {transform_indices = @transform_2, window_bounds = array<i64: 256, 128>}]} {
    %c0 = arith.constant 0 : index
    %c0_0 = arith.constant 0 : index
    %0 = vector.load %arg2[%c0, %c0_0] : memref<256x256xbf16, #tpu.memory_space<vmem>>, vector<256x256xbf16>
    %c0_1 = arith.constant 0 : index
    %c0_2 = arith.constant 0 : index
    %1 = vector.load %arg3[%c0_1, %c0_2] : memref<256x128xbf16, #tpu.memory_space<vmem>>, vector<256x128xbf16>
    %cst = arith.constant dense<0.000000e+00> : vector<256x128xf32>
    %2 = tpu.matmul %0, %1, %cst {dimension_numbers = #tpu.dot_dimension_numbers<[1], [0], [0], [1], [0, 0, 1, 1], [], []>} : vector<256x256xbf16>, vector<256x128xbf16>, vector<256x128xf32> -> vector<256x128xf32>
    %3 = arith.truncf %2 : vector<256x128xf32> to vector<256x128xbf16>
    %c0_3 = arith.constant 0 : index
    %c0_4 = arith.constant 0 : index
    %4 = vector.load %arg4[%c0_3, %c0_4] : memref<256x128xbf16, #tpu.memory_space<vmem>>, vector<256x128xbf16>
    tpu.vector_store %arg4[%c0_3, %c0_4], %3 {strides = array<i32>} : memref<256x128xbf16, #tpu.memory_space<vmem>>, vector<256x128xbf16>,
    return
  }
  func.func @transform_0(%arg0: i32, %arg1: i32) -> (i32, i32) {
    %c0_i32 = arith.constant 0 : i32
    %c0_i32_0 = arith.constant 0 : i32
    return %arg0, %c0_i32 : i32, i32
  }
  func.func @transform_1(%arg0: i32, %arg1: i32) -> (i32, i32) {
    %c0_i32 = arith.constant 0 : i32
    %c0_i32_0 = arith.constant 0 : i32
    return %c0_i32, %arg1 : i32, i32
  }
  func.func @transform_2(%arg0: i32, %arg1: i32) -> (i32, i32) {
    %c0_i32 = arith.constant 0 : i32
    return %arg0, %arg1 : i32, i32
  }
}

module attributes {stable_mosaic.version = 11 : i64} {
  func.func @_mm_single_kernel(%arg0: i32, %arg1: i32, %arg2: memref<64x512xbf16, #tpu.memory_space<vmem>>, %arg3: memref<512x128xbf16, #tpu.memory_space<vmem>>, %arg4: memref<64x128xbf16, #tpu.memory_space<vmem>>) attributes {dimension_semantics = [#tpu.dimension_semantics<parallel>, #tpu.dimension_semantics<parallel>], iteration_bounds = array<i64: 2, 1>, scalar_prefetch = 0 : i64, scratch_operands = 0 : i64, tpu.core_type = #tpu.core_type<tc>, window_params = [{transform_indices = @transform_0, window_bounds = array<i64: 64, 512>}, {transform_indices = @transform_1, window_bounds = array<i64: 512, 128>}, {transform_indices = @transform_2, window_bounds = array<i64: 64, 128>}]} {
    %c0 = arith.constant 0 : index
    %c0_0 = arith.constant 0 : index
    %0 = vector.load %arg2[%c0, %c0_0] : memref<64x512xbf16, #tpu.memory_space<vmem>>, vector<64x512xbf16>
    %c0_1 = arith.constant 0 : index
    %c0_2 = arith.constant 0 : index
    %1 = vector.load %arg3[%c0_1, %c0_2] : memref<512x128xbf16, #tpu.memory_space<vmem>>, vector<512x128xbf16>
    %cst = arith.constant dense<0.000000e+00> : vector<64x128xf32>
    %2 = tpu.matmul %0, %1, %cst {dimension_numbers = #tpu.dot_dimension_numbers<[1], [0], [0], [1], [0, 0, 1, 1], [], []>} : vector<64x512xbf16>, vector<512x128xbf16>, vector<64x128xf32> -> vector<64x128xf32>
    %3 = arith.truncf %2 : vector<64x128xf32> to vector<64x128xbf16>
    %c0_3 = arith.constant 0 : index
    %c0_4 = arith.constant 0 : index
    %4 = vector.load %arg4[%c0_3, %c0_4] : memref<64x128xbf16, #tpu.memory_space<vmem>>, vector<64x128xbf16>
    tpu.vector_store %arg4[%c0_3, %c0_4], %3 {strides = array<i32>} : memref<64x128xbf16, #tpu.memory_space<vmem>>, vector<64x128xbf16>,
    return
  }
  func.func @transform_0(%arg0: i32, %arg1: i32) -> (i32, i32) {
    %c0_i32 = arith.constant 0 : i32
    %c0_i32_0 = arith.constant 0 : i32
    return %arg0, %c0_i32 : i32, i32
  }
  func.func @transform_1(%arg0: i32, %arg1: i32) -> (i32, i32) {
    %c0_i32 = arith.constant 0 : i32
    %c0_i32_0 = arith.constant 0 : i32
    return %c0_i32, %arg1 : i32, i32
  }
  func.func @transform_2(%arg0: i32, %arg1: i32) -> (i32, i32) {
    %c0_i32 = arith.constant 0 : i32
    return %arg0, %arg1 : i32, i32
  }
}

module attributes {stable_mosaic.version = 11 : i64} {
  func.func @_in_kernel(%arg0: i32, %arg1: i32, %arg2: memref<1x64x128xbf16, #tpu.memory_space<vmem>>, %arg3: memref<1x1x128xf32, #tpu.memory_space<vmem>>, %arg4: memref<1x1x128xf32, #tpu.memory_space<vmem>>, %arg5: memref<1x64x128xbf16, #tpu.memory_space<vmem>>) attributes {dimension_semantics = [#tpu.dimension_semantics<parallel>, #tpu.dimension_semantics<parallel>], iteration_bounds = array<i64: 2, 1>, scalar_prefetch = 0 : i64, scratch_operands = 0 : i64, tpu.core_type = #tpu.core_type<tc>, window_params = [{transform_indices = @transform_0, window_bounds = array<i64: 1, 64, 128>}, {transform_indices = @transform_1, window_bounds = array<i64: 1, 1, 128>}, {transform_indices = @transform_2, window_bounds = array<i64: 1, 1, 128>}, {transform_indices = @transform_3, window_bounds = array<i64: 1, 64, 128>}]} {
    %c0 = arith.constant 0 : index
    %c0_0 = arith.constant 0 : index
    %c0_1 = arith.constant 0 : index
    %0 = vector.load %arg2[%c0, %c0_0, %c0_1] : memref<1x64x128xbf16, #tpu.memory_space<vmem>>, vector<1x64x128xbf16>
    %1 = arith.extf %0 : vector<1x64x128xbf16> to vector<1x64x128xf32>
    %cst = arith.constant dense<0.000000e+00> : vector<1x128xf32>
    %2 = vector.multi_reduction <add>, %1, %cst [1] : vector<1x64x128xf32> to vector<1x128xf32>
    %3 = vector.shape_cast %2 : vector<1x128xf32> to vector<1x1x128xf32>
    %cst_2 = arith.constant 6.400000e+01 : f32
    %4 = vector.broadcast %cst_2 : f32 to vector<1x1x128xf32>
    %5 = arith.divf %3, %4 : vector<1x1x128xf32>
    %6 = vector.broadcast %5 : vector<1x1x128xf32> to vector<1x64x128xf32>
    %7 = arith.subf %1, %6 : vector<1x64x128xf32>
    %8 = arith.mulf %7, %7 : vector<1x64x128xf32>
    %cst_3 = arith.constant dense<0.000000e+00> : vector<1x128xf32>
    %9 = vector.multi_reduction <add>, %8, %cst_3 [1] : vector<1x64x128xf32> to vector<1x128xf32>
    %10 = vector.shape_cast %9 : vector<1x128xf32> to vector<1x1x128xf32>
    %cst_4 = arith.constant 6.400000e+01 : f32
    %11 = vector.broadcast %cst_4 : f32 to vector<1x1x128xf32>
    %12 = arith.divf %10, %11 : vector<1x1x128xf32>
    %13 = vector.broadcast %5 : vector<1x1x128xf32> to vector<1x64x128xf32>
    %14 = arith.subf %1, %13 : vector<1x64x128xf32>
    %cst_5 = arith.constant 9.99999974E-6 : f32
    %15 = vector.broadcast %cst_5 : f32 to vector<1x1x128xf32>
    %16 = arith.addf %12, %15 : vector<1x1x128xf32>
    %17 = math.rsqrt %16 : vector<1x1x128xf32>
    %18 = vector.broadcast %17 : vector<1x1x128xf32> to vector<1x64x128xf32>
    %19 = arith.mulf %14, %18 : vector<1x64x128xf32>
    %c0_6 = arith.constant 0 : index
    %c0_7 = arith.constant 0 : index
    %c0_8 = arith.constant 0 : index
    %20 = vector.load %arg3[%c0_6, %c0_7, %c0_8] : memref<1x1x128xf32, #tpu.memory_space<vmem>>, vector<1x1x128xf32>
    %21 = vector.broadcast %20 : vector<1x1x128xf32> to vector<1x64x128xf32>
    %22 = arith.mulf %19, %21 : vector<1x64x128xf32>
    %c0_9 = arith.constant 0 : index
    %c0_10 = arith.constant 0 : index
    %c0_11 = arith.constant 0 : index
    %23 = vector.load %arg4[%c0_9, %c0_10, %c0_11] : memref<1x1x128xf32, #tpu.memory_space<vmem>>, vector<1x1x128xf32>
    %24 = vector.broadcast %23 : vector<1x1x128xf32> to vector<1x64x128xf32>
    %25 = arith.addf %22, %24 : vector<1x64x128xf32>
    %cst_12 = arith.constant 0.000000e+00 : f32
    %26 = vector.broadcast %cst_12 : f32 to vector<1x64x128xf32>
    %27 = arith.maximumf %25, %26 : vector<1x64x128xf32>
    %28 = arith.truncf %27 : vector<1x64x128xf32> to vector<1x64x128xbf16>
    %c0_13 = arith.constant 0 : index
    %c0_14 = arith.constant 0 : index
    %c0_15 = arith.constant 0 : index
    %29 = vector.load %arg5[%c0_13, %c0_14, %c0_15] : memref<1x64x128xbf16, #tpu.memory_space<vmem>>, vector<1x64x128xbf16>
    tpu.vector_store %arg5[%c0_13, %c0_14, %c0_15], %28 {strides = array<i32>} : memref<1x64x128xbf16, #tpu.memory_space<vmem>>, vector<1x64x128xbf16>,
    return
  }
  func.func @transform_0(%arg0: i32, %arg1: i32) -> (i32, i32, i32) {
    %c0_i32 = arith.constant 0 : i32
    %c0_i32_0 = arith.constant 0 : i32
    return %arg0, %c0_i32, %arg1 : i32, i32, i32
  }
  func.func @transform_1(%arg0: i32, %arg1: i32) -> (i32, i32, i32) {
    %c0_i32 = arith.constant 0 : i32
    %c0_i32_0 = arith.constant 0 : i32
    %c0_i32_1 = arith.constant 0 : i32
    return %c0_i32, %c0_i32_0, %arg1 : i32, i32, i32
  }
  func.func @transform_2(%arg0: i32, %arg1: i32) -> (i32, i32, i32) {
    %c0_i32 = arith.constant 0 : i32
    %c0_i32_0 = arith.constant 0 : i32
    %c0_i32_1 = arith.constant 0 : i32
    return %c0_i32, %c0_i32_0, %arg1 : i32, i32, i32
  }
  func.func @transform_3(%arg0: i32, %arg1: i32) -> (i32, i32, i32) {
    %c0_i32 = arith.constant 0 : i32
    %c0_i32_0 = arith.constant 0 : i32
    return %arg0, %c0_i32, %arg1 : i32, i32, i32
  }
}

module attributes {stable_mosaic.version = 11 : i64} {
  func.func @_mm_single_kernel(%arg0: i32, %arg1: i32, %arg2: memref<16x1024xbf16, #tpu.memory_space<vmem>>, %arg3: memref<1024x128xbf16, #tpu.memory_space<vmem>>, %arg4: memref<16x128xbf16, #tpu.memory_space<vmem>>) attributes {dimension_semantics = [#tpu.dimension_semantics<parallel>, #tpu.dimension_semantics<parallel>], iteration_bounds = array<i64: 2, 1>, scalar_prefetch = 0 : i64, scratch_operands = 0 : i64, tpu.core_type = #tpu.core_type<tc>, window_params = [{transform_indices = @transform_0, window_bounds = array<i64: 16, 1024>}, {transform_indices = @transform_1, window_bounds = array<i64: 1024, 128>}, {transform_indices = @transform_2, window_bounds = array<i64: 16, 128>}]} {
    %c0 = arith.constant 0 : index
    %c0_0 = arith.constant 0 : index
    %0 = vector.load %arg2[%c0, %c0_0] : memref<16x1024xbf16, #tpu.memory_space<vmem>>, vector<16x1024xbf16>
    %c0_1 = arith.constant 0 : index
    %c0_2 = arith.constant 0 : index
    %1 = vector.load %arg3[%c0_1, %c0_2] : memref<1024x128xbf16, #tpu.memory_space<vmem>>, vector<1024x128xbf16>
    %cst = arith.constant dense<0.000000e+00> : vector<16x128xf32>
    %2 = tpu.matmul %0, %1, %cst {dimension_numbers = #tpu.dot_dimension_numbers<[1], [0], [0], [1], [0, 0, 1, 1], [], []>} : vector<16x1024xbf16>, vector<1024x128xbf16>, vector<16x128xf32> -> vector<16x128xf32>
    %3 = arith.truncf %2 : vector<16x128xf32> to vector<16x128xbf16>
    %c0_3 = arith.constant 0 : index
    %c0_4 = arith.constant 0 : index
    %4 = vector.load %arg4[%c0_3, %c0_4] : memref<16x128xbf16, #tpu.memory_space<vmem>>, vector<16x128xbf16>
    tpu.vector_store %arg4[%c0_3, %c0_4], %3 {strides = array<i32>} : memref<16x128xbf16, #tpu.memory_space<vmem>>, vector<16x128xbf16>,
    return
  }
  func.func @transform_0(%arg0: i32, %arg1: i32) -> (i32, i32) {
    %c0_i32 = arith.constant 0 : i32
    %c0_i32_0 = arith.constant 0 : i32
    return %arg0, %c0_i32 : i32, i32
  }
  func.func @transform_1(%arg0: i32, %arg1: i32) -> (i32, i32) {
    %c0_i32 = arith.constant 0 : i32
    %c0_i32_0 = arith.constant 0 : i32
    return %c0_i32, %arg1 : i32, i32
  }
  func.func @transform_2(%arg0: i32, %arg1: i32) -> (i32, i32) {
    %c0_i32 = arith.constant 0 : i32
    return %arg0, %arg1 : i32, i32
  }
}

module attributes {stable_mosaic.version = 11 : i64} {
  func.func @_in_kernel(%arg0: i32, %arg1: i32, %arg2: memref<1x16x128xbf16, #tpu.memory_space<vmem>>, %arg3: memref<1x1x128xf32, #tpu.memory_space<vmem>>, %arg4: memref<1x1x128xf32, #tpu.memory_space<vmem>>, %arg5: memref<1x16x128xbf16, #tpu.memory_space<vmem>>) attributes {dimension_semantics = [#tpu.dimension_semantics<parallel>, #tpu.dimension_semantics<parallel>], iteration_bounds = array<i64: 2, 1>, scalar_prefetch = 0 : i64, scratch_operands = 0 : i64, tpu.core_type = #tpu.core_type<tc>, window_params = [{transform_indices = @transform_0, window_bounds = array<i64: 1, 16, 128>}, {transform_indices = @transform_1, window_bounds = array<i64: 1, 1, 128>}, {transform_indices = @transform_2, window_bounds = array<i64: 1, 1, 128>}, {transform_indices = @transform_3, window_bounds = array<i64: 1, 16, 128>}]} {
    %c0 = arith.constant 0 : index
    %c0_0 = arith.constant 0 : index
    %c0_1 = arith.constant 0 : index
    %0 = vector.load %arg2[%c0, %c0_0, %c0_1] : memref<1x16x128xbf16, #tpu.memory_space<vmem>>, vector<1x16x128xbf16>
    %1 = arith.extf %0 : vector<1x16x128xbf16> to vector<1x16x128xf32>
    %cst = arith.constant dense<0.000000e+00> : vector<1x128xf32>
    %2 = vector.multi_reduction <add>, %1, %cst [1] : vector<1x16x128xf32> to vector<1x128xf32>
    %3 = vector.shape_cast %2 : vector<1x128xf32> to vector<1x1x128xf32>
    %cst_2 = arith.constant 1.600000e+01 : f32
    %4 = vector.broadcast %cst_2 : f32 to vector<1x1x128xf32>
    %5 = arith.divf %3, %4 : vector<1x1x128xf32>
    %6 = vector.broadcast %5 : vector<1x1x128xf32> to vector<1x16x128xf32>
    %7 = arith.subf %1, %6 : vector<1x16x128xf32>
    %8 = arith.mulf %7, %7 : vector<1x16x128xf32>
    %cst_3 = arith.constant dense<0.000000e+00> : vector<1x128xf32>
    %9 = vector.multi_reduction <add>, %8, %cst_3 [1] : vector<1x16x128xf32> to vector<1x128xf32>
    %10 = vector.shape_cast %9 : vector<1x128xf32> to vector<1x1x128xf32>
    %cst_4 = arith.constant 1.600000e+01 : f32
    %11 = vector.broadcast %cst_4 : f32 to vector<1x1x128xf32>
    %12 = arith.divf %10, %11 : vector<1x1x128xf32>
    %13 = vector.broadcast %5 : vector<1x1x128xf32> to vector<1x16x128xf32>
    %14 = arith.subf %1, %13 : vector<1x16x128xf32>
    %cst_5 = arith.constant 9.99999974E-6 : f32
    %15 = vector.broadcast %cst_5 : f32 to vector<1x1x128xf32>
    %16 = arith.addf %12, %15 : vector<1x1x128xf32>
    %17 = math.rsqrt %16 : vector<1x1x128xf32>
    %18 = vector.broadcast %17 : vector<1x1x128xf32> to vector<1x16x128xf32>
    %19 = arith.mulf %14, %18 : vector<1x16x128xf32>
    %c0_6 = arith.constant 0 : index
    %c0_7 = arith.constant 0 : index
    %c0_8 = arith.constant 0 : index
    %20 = vector.load %arg3[%c0_6, %c0_7, %c0_8] : memref<1x1x128xf32, #tpu.memory_space<vmem>>, vector<1x1x128xf32>
    %21 = vector.broadcast %20 : vector<1x1x128xf32> to vector<1x16x128xf32>
    %22 = arith.mulf %19, %21 : vector<1x16x128xf32>
    %c0_9 = arith.constant 0 : index
    %c0_10 = arith.constant 0 : index
    %c0_11 = arith.constant 0 : index
    %23 = vector.load %arg4[%c0_9, %c0_10, %c0_11] : memref<1x1x128xf32, #tpu.memory_space<vmem>>, vector<1x1x128xf32>
    %24 = vector.broadcast %23 : vector<1x1x128xf32> to vector<1x16x128xf32>
    %25 = arith.addf %22, %24 : vector<1x16x128xf32>
    %cst_12 = arith.constant 0.000000e+00 : f32
    %26 = vector.broadcast %cst_12 : f32 to vector<1x16x128xf32>
    %27 = arith.maximumf %25, %26 : vector<1x16x128xf32>
    %28 = arith.truncf %27 : vector<1x16x128xf32> to vector<1x16x128xbf16>
    %c0_13 = arith.constant 0 : index
    %c0_14 = arith.constant 0 : index
    %c0_15 = arith.constant 0 : index
    %29 = vector.load %arg5[%c0_13, %c0_14, %c0_15] : memref<1x16x128xbf16, #tpu.memory_space<vmem>>, vector<1x16x128xbf16>
    tpu.vector_store %arg5[%c0_13, %c0_14, %c0_15], %28 {strides = array<i32>} : memref<1x16x128xbf16, #tpu.memory_space<vmem>>, vector<1x16x128xbf16>,
    return
  }
  func.func @transform_0(%arg0: i32, %arg1: i32) -> (i32, i32, i32) {
    %c0_i32 = arith.constant 0 : i32
    %c0_i32_0 = arith.constant 0 : i32
    return %arg0, %c0_i32, %arg1 : i32, i32, i32
  }
  func.func @transform_1(%arg0: i32, %arg1: i32) -> (i32, i32, i32) {
    %c0_i32 = arith.constant 0 : i32
    %c0_i32_0 = arith.constant 0 : i32
    %c0_i32_1 = arith.constant 0 : i32
    return %c0_i32, %c0_i32_0, %arg1 : i32, i32, i32
  }
  func.func @transform_2(%arg0: i32, %arg1: i32) -> (i32, i32, i32) {
    %c0_i32 = arith.constant 0 : i32
    %c0_i32_0 = arith.constant 0 : i32
    %c0_i32_1 = arith.constant 0 : i32
    return %c0_i32, %c0_i32_0, %arg1 : i32, i32, i32
  }
  func.func @transform_3(%arg0: i32, %arg1: i32) -> (i32, i32, i32) {
    %c0_i32 = arith.constant 0 : i32
    %c0_i32_0 = arith.constant 0 : i32
    return %arg0, %c0_i32, %arg1 : i32, i32, i32
  }
}

module attributes {stable_mosaic.version = 11 : i64} {
  func.func @_mm_single_kernel(%arg0: i32, %arg1: i32, %arg2: memref<16x640xbf16, #tpu.memory_space<vmem>>, %arg3: memref<640x128xbf16, #tpu.memory_space<vmem>>, %arg4: memref<16x128xbf16, #tpu.memory_space<vmem>>) attributes {dimension_semantics = [#tpu.dimension_semantics<parallel>, #tpu.dimension_semantics<parallel>], iteration_bounds = array<i64: 2, 1>, scalar_prefetch = 0 : i64, scratch_operands = 0 : i64, tpu.core_type = #tpu.core_type<tc>, window_params = [{transform_indices = @transform_0, window_bounds = array<i64: 16, 640>}, {transform_indices = @transform_1, window_bounds = array<i64: 640, 128>}, {transform_indices = @transform_2, window_bounds = array<i64: 16, 128>}]} {
    %c0 = arith.constant 0 : index
    %c0_0 = arith.constant 0 : index
    %0 = vector.load %arg2[%c0, %c0_0] : memref<16x640xbf16, #tpu.memory_space<vmem>>, vector<16x640xbf16>
    %c0_1 = arith.constant 0 : index
    %c0_2 = arith.constant 0 : index
    %1 = vector.load %arg3[%c0_1, %c0_2] : memref<640x128xbf16, #tpu.memory_space<vmem>>, vector<640x128xbf16>
    %cst = arith.constant dense<0.000000e+00> : vector<16x128xf32>
    %2 = tpu.matmul %0, %1, %cst {dimension_numbers = #tpu.dot_dimension_numbers<[1], [0], [0], [1], [0, 0, 1, 1], [], []>} : vector<16x640xbf16>, vector<640x128xbf16>, vector<16x128xf32> -> vector<16x128xf32>
    %3 = arith.truncf %2 : vector<16x128xf32> to vector<16x128xbf16>
    %c0_3 = arith.constant 0 : index
    %c0_4 = arith.constant 0 : index
    %4 = vector.load %arg4[%c0_3, %c0_4] : memref<16x128xbf16, #tpu.memory_space<vmem>>, vector<16x128xbf16>
    tpu.vector_store %arg4[%c0_3, %c0_4], %3 {strides = array<i32>} : memref<16x128xbf16, #tpu.memory_space<vmem>>, vector<16x128xbf16>,
    return
  }
  func.func @transform_0(%arg0: i32, %arg1: i32) -> (i32, i32) {
    %c0_i32 = arith.constant 0 : i32
    %c0_i32_0 = arith.constant 0 : i32
    return %arg0, %c0_i32 : i32, i32
  }
  func.func @transform_1(%arg0: i32, %arg1: i32) -> (i32, i32) {
    %c0_i32 = arith.constant 0 : i32
    %c0_i32_0 = arith.constant 0 : i32
    return %c0_i32, %arg1 : i32, i32
  }
  func.func @transform_2(%arg0: i32, %arg1: i32) -> (i32, i32) {
    %c0_i32 = arith.constant 0 : i32
    return %arg0, %arg1 : i32, i32
  }
}

module attributes {stable_mosaic.version = 11 : i64} {
  func.func @_in_res_kernel(%arg0: i32, %arg1: i32, %arg2: memref<1x16x128xbf16, #tpu.memory_space<vmem>>, %arg3: memref<1x1x128xf32, #tpu.memory_space<vmem>>, %arg4: memref<1x1x128xf32, #tpu.memory_space<vmem>>, %arg5: memref<1x16x128xbf16, #tpu.memory_space<vmem>>, %arg6: memref<1x16x128xbf16, #tpu.memory_space<vmem>>) attributes {dimension_semantics = [#tpu.dimension_semantics<parallel>, #tpu.dimension_semantics<parallel>], iteration_bounds = array<i64: 2, 1>, scalar_prefetch = 0 : i64, scratch_operands = 0 : i64, tpu.core_type = #tpu.core_type<tc>, window_params = [{transform_indices = @transform_0, window_bounds = array<i64: 1, 16, 128>}, {transform_indices = @transform_1, window_bounds = array<i64: 1, 1, 128>}, {transform_indices = @transform_2, window_bounds = array<i64: 1, 1, 128>}, {transform_indices = @transform_3, window_bounds = array<i64: 1, 16, 128>}, {transform_indices = @transform_4, window_bounds = array<i64: 1, 16, 128>}]} {
    %c0 = arith.constant 0 : index
    %c0_0 = arith.constant 0 : index
    %c0_1 = arith.constant 0 : index
    %0 = vector.load %arg2[%c0, %c0_0, %c0_1] : memref<1x16x128xbf16, #tpu.memory_space<vmem>>, vector<1x16x128xbf16>
    %1 = arith.extf %0 : vector<1x16x128xbf16> to vector<1x16x128xf32>
    %cst = arith.constant dense<0.000000e+00> : vector<1x128xf32>
    %2 = vector.multi_reduction <add>, %1, %cst [1] : vector<1x16x128xf32> to vector<1x128xf32>
    %3 = vector.shape_cast %2 : vector<1x128xf32> to vector<1x1x128xf32>
    %cst_2 = arith.constant 1.600000e+01 : f32
    %4 = vector.broadcast %cst_2 : f32 to vector<1x1x128xf32>
    %5 = arith.divf %3, %4 : vector<1x1x128xf32>
    %6 = vector.broadcast %5 : vector<1x1x128xf32> to vector<1x16x128xf32>
    %7 = arith.subf %1, %6 : vector<1x16x128xf32>
    %8 = arith.mulf %7, %7 : vector<1x16x128xf32>
    %cst_3 = arith.constant dense<0.000000e+00> : vector<1x128xf32>
    %9 = vector.multi_reduction <add>, %8, %cst_3 [1] : vector<1x16x128xf32> to vector<1x128xf32>
    %10 = vector.shape_cast %9 : vector<1x128xf32> to vector<1x1x128xf32>
    %cst_4 = arith.constant 1.600000e+01 : f32
    %11 = vector.broadcast %cst_4 : f32 to vector<1x1x128xf32>
    %12 = arith.divf %10, %11 : vector<1x1x128xf32>
    %13 = vector.broadcast %5 : vector<1x1x128xf32> to vector<1x16x128xf32>
    %14 = arith.subf %1, %13 : vector<1x16x128xf32>
    %cst_5 = arith.constant 9.99999974E-6 : f32
    %15 = vector.broadcast %cst_5 : f32 to vector<1x1x128xf32>
    %16 = arith.addf %12, %15 : vector<1x1x128xf32>
    %17 = math.rsqrt %16 : vector<1x1x128xf32>
    %18 = vector.broadcast %17 : vector<1x1x128xf32> to vector<1x16x128xf32>
    %19 = arith.mulf %14, %18 : vector<1x16x128xf32>
    %c0_6 = arith.constant 0 : index
    %c0_7 = arith.constant 0 : index
    %c0_8 = arith.constant 0 : index
    %20 = vector.load %arg3[%c0_6, %c0_7, %c0_8] : memref<1x1x128xf32, #tpu.memory_space<vmem>>, vector<1x1x128xf32>
    %21 = vector.broadcast %20 : vector<1x1x128xf32> to vector<1x16x128xf32>
    %22 = arith.mulf %19, %21 : vector<1x16x128xf32>
    %c0_9 = arith.constant 0 : index
    %c0_10 = arith.constant 0 : index
    %c0_11 = arith.constant 0 : index
    %23 = vector.load %arg4[%c0_9, %c0_10, %c0_11] : memref<1x1x128xf32, #tpu.memory_space<vmem>>, vector<1x1x128xf32>
    %24 = vector.broadcast %23 : vector<1x1x128xf32> to vector<1x16x128xf32>
    %25 = arith.addf %22, %24 : vector<1x16x128xf32>
    %c0_12 = arith.constant 0 : index
    %c0_13 = arith.constant 0 : index
    %c0_14 = arith.constant 0 : index
    %26 = vector.load %arg5[%c0_12, %c0_13, %c0_14] : memref<1x16x128xbf16, #tpu.memory_space<vmem>>, vector<1x16x128xbf16>
    %27 = arith.extf %26 : vector<1x16x128xbf16> to vector<1x16x128xf32>
    %28 = arith.addf %25, %27 : vector<1x16x128xf32>
    %29 = arith.truncf %28 : vector<1x16x128xf32> to vector<1x16x128xbf16>
    %c0_15 = arith.constant 0 : index
    %c0_16 = arith.constant 0 : index
    %c0_17 = arith.constant 0 : index
    %30 = vector.load %arg6[%c0_15, %c0_16, %c0_17] : memref<1x16x128xbf16, #tpu.memory_space<vmem>>, vector<1x16x128xbf16>
    tpu.vector_store %arg6[%c0_15, %c0_16, %c0_17], %29 {strides = array<i32>} : memref<1x16x128xbf16, #tpu.memory_space<vmem>>, vector<1x16x128xbf16>,
    return
  }
  func.func @transform_0(%arg0: i32, %arg1: i32) -> (i32, i32, i32) {
    %c0_i32 = arith.constant 0 : i32
    %c0_i32_0 = arith.constant 0 : i32
    return %arg0, %c0_i32, %arg1 : i32, i32, i32
  }
  func.func @transform_1(%arg0: i32, %arg1: i32) -> (i32, i32, i32) {
    %c0_i32 = arith.constant 0 : i32
    %c0_i32_0 = arith.constant 0 : i32
    %c0_i32_1 = arith.constant 0 : i32
    return %c0_i32, %c0_i32_0, %arg1 : i32, i32, i32
  }
  func.func @transform_2(%arg0: i32, %arg1: i32) -> (i32, i32, i32) {
    %c0_i32 = arith.constant 0 : i32
    %c0_i32_0 = arith.constant 0 : i32
    %c0_i32_1 = arith.constant 0 : i32
    return %c0_i32, %c0_i32_0, %arg1 : i32, i32, i32
  }
  func.func @transform_3(%arg0: i32, %arg1: i32) -> (i32, i32, i32) {
    %c0_i32 = arith.constant 0 : i32
    %c0_i32_0 = arith.constant 0 : i32
    return %arg0, %c0_i32, %arg1 : i32, i32, i32
  }
  func.func @transform_4(%arg0: i32, %arg1: i32) -> (i32, i32, i32) {
    %c0_i32 = arith.constant 0 : i32
    %c0_i32_0 = arith.constant 0 : i32
    return %arg0, %c0_i32, %arg1 : i32, i32, i32
  }
}

module attributes {stable_mosaic.version = 11 : i64} {
  func.func @_mm_single_kernel(%arg0: i32, %arg1: i32, %arg2: memref<16x256xbf16, #tpu.memory_space<vmem>>, %arg3: memref<256x128xbf16, #tpu.memory_space<vmem>>, %arg4: memref<16x128xbf16, #tpu.memory_space<vmem>>) attributes {dimension_semantics = [#tpu.dimension_semantics<parallel>, #tpu.dimension_semantics<parallel>], iteration_bounds = array<i64: 2, 1>, scalar_prefetch = 0 : i64, scratch_operands = 0 : i64, tpu.core_type = #tpu.core_type<tc>, window_params = [{transform_indices = @transform_0, window_bounds = array<i64: 16, 256>}, {transform_indices = @transform_1, window_bounds = array<i64: 256, 128>}, {transform_indices = @transform_2, window_bounds = array<i64: 16, 128>}]} {
    %c0 = arith.constant 0 : index
    %c0_0 = arith.constant 0 : index
    %0 = vector.load %arg2[%c0, %c0_0] : memref<16x256xbf16, #tpu.memory_space<vmem>>, vector<16x256xbf16>
    %c0_1 = arith.constant 0 : index
    %c0_2 = arith.constant 0 : index
    %1 = vector.load %arg3[%c0_1, %c0_2] : memref<256x128xbf16, #tpu.memory_space<vmem>>, vector<256x128xbf16>
    %cst = arith.constant dense<0.000000e+00> : vector<16x128xf32>
    %2 = tpu.matmul %0, %1, %cst {dimension_numbers = #tpu.dot_dimension_numbers<[1], [0], [0], [1], [0, 0, 1, 1], [], []>} : vector<16x256xbf16>, vector<256x128xbf16>, vector<16x128xf32> -> vector<16x128xf32>
    %3 = arith.truncf %2 : vector<16x128xf32> to vector<16x128xbf16>
    %c0_3 = arith.constant 0 : index
    %c0_4 = arith.constant 0 : index
    %4 = vector.load %arg4[%c0_3, %c0_4] : memref<16x128xbf16, #tpu.memory_space<vmem>>, vector<16x128xbf16>
    tpu.vector_store %arg4[%c0_3, %c0_4], %3 {strides = array<i32>} : memref<16x128xbf16, #tpu.memory_space<vmem>>, vector<16x128xbf16>,
    return
  }
  func.func @transform_0(%arg0: i32, %arg1: i32) -> (i32, i32) {
    %c0_i32 = arith.constant 0 : i32
    %c0_i32_0 = arith.constant 0 : i32
    return %arg0, %c0_i32 : i32, i32
  }
  func.func @transform_1(%arg0: i32, %arg1: i32) -> (i32, i32) {
    %c0_i32 = arith.constant 0 : i32
    %c0_i32_0 = arith.constant 0 : i32
    return %c0_i32, %arg1 : i32, i32
  }
  func.func @transform_2(%arg0: i32, %arg1: i32) -> (i32, i32) {
    %c0_i32 = arith.constant 0 : i32
    return %arg0, %arg1 : i32, i32
  }
}

module attributes {stable_mosaic.version = 11 : i64} {
  func.func @_mm_single_kernel(%arg0: i32, %arg1: i32, %arg2: memref<64x128xbf16, #tpu.memory_space<vmem>>, %arg3: memref<128x128xbf16, #tpu.memory_space<vmem>>, %arg4: memref<64x128xbf16, #tpu.memory_space<vmem>>) attributes {dimension_semantics = [#tpu.dimension_semantics<parallel>, #tpu.dimension_semantics<parallel>], iteration_bounds = array<i64: 2, 1>, scalar_prefetch = 0 : i64, scratch_operands = 0 : i64, tpu.core_type = #tpu.core_type<tc>, window_params = [{transform_indices = @transform_0, window_bounds = array<i64: 64, 128>}, {transform_indices = @transform_1, window_bounds = array<i64: 128, 128>}, {transform_indices = @transform_2, window_bounds = array<i64: 64, 128>}]} {
    %c0 = arith.constant 0 : index
    %c0_0 = arith.constant 0 : index
    %0 = vector.load %arg2[%c0, %c0_0] : memref<64x128xbf16, #tpu.memory_space<vmem>>, vector<64x128xbf16>
    %c0_1 = arith.constant 0 : index
    %c0_2 = arith.constant 0 : index
    %1 = vector.load %arg3[%c0_1, %c0_2] : memref<128x128xbf16, #tpu.memory_space<vmem>>, vector<128x128xbf16>
    %cst = arith.constant dense<0.000000e+00> : vector<64x128xf32>
    %2 = tpu.matmul %0, %1, %cst {dimension_numbers = #tpu.dot_dimension_numbers<[1], [0], [0], [1], [0, 0, 1, 1], [], []>} : vector<64x128xbf16>, vector<128x128xbf16>, vector<64x128xf32> -> vector<64x128xf32>
    %3 = arith.truncf %2 : vector<64x128xf32> to vector<64x128xbf16>
    %c0_3 = arith.constant 0 : index
    %c0_4 = arith.constant 0 : index
    %4 = vector.load %arg4[%c0_3, %c0_4] : memref<64x128xbf16, #tpu.memory_space<vmem>>, vector<64x128xbf16>
    tpu.vector_store %arg4[%c0_3, %c0_4], %3 {strides = array<i32>} : memref<64x128xbf16, #tpu.memory_space<vmem>>, vector<64x128xbf16>,
    return
  }
  func.func @transform_0(%arg0: i32, %arg1: i32) -> (i32, i32) {
    %c0_i32 = arith.constant 0 : i32
    %c0_i32_0 = arith.constant 0 : i32
    return %arg0, %c0_i32 : i32, i32
  }
  func.func @transform_1(%arg0: i32, %arg1: i32) -> (i32, i32) {
    %c0_i32 = arith.constant 0 : i32
    %c0_i32_0 = arith.constant 0 : i32
    return %c0_i32, %arg1 : i32, i32
  }
  func.func @transform_2(%arg0: i32, %arg1: i32) -> (i32, i32) {
    %c0_i32 = arith.constant 0 : i32
    return %arg0, %arg1 : i32, i32
  }
}

module attributes {stable_mosaic.version = 11 : i64} {
  func.func @_mm_single_kernel(%arg0: i32, %arg1: i32, %arg2: memref<256x896xbf16, #tpu.memory_space<vmem>>, %arg3: memref<896x128xbf16, #tpu.memory_space<vmem>>, %arg4: memref<256x128xf32, #tpu.memory_space<vmem>>) attributes {dimension_semantics = [#tpu.dimension_semantics<parallel>, #tpu.dimension_semantics<parallel>], iteration_bounds = array<i64: 2, 1>, scalar_prefetch = 0 : i64, scratch_operands = 0 : i64, tpu.core_type = #tpu.core_type<tc>, window_params = [{transform_indices = @transform_0, window_bounds = array<i64: 256, 896>}, {transform_indices = @transform_1, window_bounds = array<i64: 896, 128>}, {transform_indices = @transform_2, window_bounds = array<i64: 256, 128>}]} {
    %c0 = arith.constant 0 : index
    %c0_0 = arith.constant 0 : index
    %0 = vector.load %arg2[%c0, %c0_0] : memref<256x896xbf16, #tpu.memory_space<vmem>>, vector<256x896xbf16>
    %c0_1 = arith.constant 0 : index
    %c0_2 = arith.constant 0 : index
    %1 = vector.load %arg3[%c0_1, %c0_2] : memref<896x128xbf16, #tpu.memory_space<vmem>>, vector<896x128xbf16>
    %cst = arith.constant dense<0.000000e+00> : vector<256x128xf32>
    %2 = tpu.matmul %0, %1, %cst {dimension_numbers = #tpu.dot_dimension_numbers<[1], [0], [0], [1], [0, 0, 1, 1], [], []>} : vector<256x896xbf16>, vector<896x128xbf16>, vector<256x128xf32> -> vector<256x128xf32>
    %c0_3 = arith.constant 0 : index
    %c0_4 = arith.constant 0 : index
    %3 = vector.load %arg4[%c0_3, %c0_4] : memref<256x128xf32, #tpu.memory_space<vmem>>, vector<256x128xf32>
    tpu.vector_store %arg4[%c0_3, %c0_4], %2 {strides = array<i32>} : memref<256x128xf32, #tpu.memory_space<vmem>>, vector<256x128xf32>,
    return
  }
  func.func @transform_0(%arg0: i32, %arg1: i32) -> (i32, i32) {
    %c0_i32 = arith.constant 0 : i32
    %c0_i32_0 = arith.constant 0 : i32
    return %arg0, %c0_i32 : i32, i32
  }
  func.func @transform_1(%arg0: i32, %arg1: i32) -> (i32, i32) {
    %c0_i32 = arith.constant 0 : i32
    %c0_i32_0 = arith.constant 0 : i32
    return %c0_i32, %arg1 : i32, i32
  }
  func.func @transform_2(%arg0: i32, %arg1: i32) -> (i32, i32) {
    %c0_i32 = arith.constant 0 : i32
    return %arg0, %arg1 : i32, i32
  }
}

</mosaic_0001>

<bundles_post_ra>
// kernel: _generator_forward.26
= control target key start
LH: loop header
LB: loop body
LE: loop exit
PB: predicated region body
PF: predicated region fallthrough
CT: control target
= control target key end

     0   :  { %s1172_s12 = smov 0   ;;  %s1174_s13 = smov 0   ;;  %s1742_s0 = inlined_call_operand.vmem [shape: bf16[2,256,128], index: 0, kind: input, shape index: {}]   ;;  %s1743_s1 = inlined_call_operand.vmem [shape: f32[1,1,128], index: 1, kind: input, shape index: {}]   ;;  %s1744_s2 = inlined_call_operand.vmem [shape: f32[1,1,128], index: 2, kind: input, shape index: {}]   ;;  %s1745_s3 = inlined_call_operand.vmem [shape: bf16[2,256,128], index: 3, kind: output, shape index: {}]  }
   0x1   :  { %s1176_s14 = smov 0  }
   0x2 LB: > { %s25_s15 = sadd.s32 1, %s1146_s13  ;;  %p853_p0 = scmp.ge.s32.totalorder %s1150_s14, 1  ;;  %s1150_s14 = sphi %s1176_s14, %s13_s14   ;;  %s1146_s13 = sphi %s1174_s13, %s1747_s13   ;;  %s1142_s12 = sphi %s1172_s12, %s1746_s12  }
   0x3   : > { %p27_p1 = scmp.ge.s32.totalorder %s25_s15, 2  ;;  %p172_p2 = scmp.lt.s32.totalorder %s1150_s14, 3 }
   0x5   : > { %s1749_s15 = smov (%p27_p1, %s25_s15), 0  ;;  %p173_p3 = pnand %p853_p0, %p172_p2 }
   0x6   : > { %p208_p4 = scmp.lt.s32.totalorder (!%p173_p3), %s1142_s12, 1 }
   0x7   : > { %176 = sbr.rel (%p173_p3) target bundleno = 232 (0xe8), region = 32 }
   0xe   : > { %s1751_s12 = smov (!%p208_p4, %s1142_s12), 1 }
   0xf   : > { %s894_s16 = sshll.u32 %s1751_s12, 7 }
  0x10   : > { %s1198_s19 = scalar_lea.vmem %s1742_s0, %s894_s16  ;;  %s1619_s26 = scalar_lea.vmem %s1745_s3, %s894_s16 }
  0x11   : > { %v1201_v0 = vld [vmem:[%s1198_s19] sm:$0xff]   ;;  %v1204_v1 = vld [vmem:[%s1198_s19 + $0x8] sm:$0xff]   ;;  %v1210_v5 = vld [vmem:[%s1198_s19 + $0x10] sm:$0xff]  }
  0x12   : > { %v930_v2 = vunpack.c.l.bf16 %v1201_v0  ;;  %v931_v3 = vunpack.c.h.bf16 %v1201_v0  ;;  %v934_v4 = vunpack.c.l.bf16 %v1204_v1  ;;  %v935_v6 = vunpack.c.h.bf16 %v1204_v1  ;;  %v1221_v10 = vld [vmem:[%s1198_s19 + $0x18] sm:$0xff]   ;;  %v1230_v15 = vld [vmem:[%s1198_s19 + $0x20] sm:$0xff]   ;;  %v1239_v20 = vld [vmem:[%s1198_s19 + $0x28] sm:$0xff]  }
  0x13   : > { %v938_v8 = vunpack.c.l.bf16 %v1210_v5  ;;  %v939_v11 = vunpack.c.h.bf16 %v1210_v5  ;;  %v942_v13 = vunpack.c.l.bf16 %v1221_v10  ;;  %v943_v16 = vunpack.c.h.bf16 %v1221_v10  ;;  %v1248_v25 = vld [vmem:[%s1198_s19 + $0x30] sm:$0xff]   ;;  %v1257_v30 = vld [vmem:[%s1198_s19 + $0x38] sm:$0xff]   ;;  %v1266_v35 = vld [vmem:[%s1198_s19 + $0x40] sm:$0xff]  }
  0x14   : > { %v294_v7 = vadd.f32 %v931_v3, %v930_v2  ;;  %v946_v18 = vunpack.c.l.bf16 %v1230_v15  ;;  %v947_v21 = vunpack.c.h.bf16 %v1230_v15  ;;  %v950_v23 = vunpack.c.l.bf16 %v1239_v20  ;;  %v1275_v40 = vld [vmem:[%s1198_s19 + $0x48] sm:$0xff]   ;;  %v1284_v45 = vld [vmem:[%s1198_s19 + $0x50] sm:$0xff]   ;;  %v1293_v50 = vld [vmem:[%s1198_s19 + $0x58] sm:$0xff]  }
  0x15   : > { %v951_v26 = vunpack.c.h.bf16 %v1239_v20  ;;  %v954_v28 = vunpack.c.l.bf16 %v1248_v25  ;;  %v955_v31 = vunpack.c.h.bf16 %v1248_v25  ;;  %v958_v33 = vunpack.c.l.bf16 %v1257_v30  ;;  %v1302_v55 = vld [vmem:[%s1198_s19 + $0x60] sm:$0xff]   ;;  %v1311_v60 = vld [vmem:[%s1198_s19 + $0x68] sm:$0xff]  }
  0x16   : > { %v295_v9 = vadd.f32 %v934_v4, %v294_v7  ;;  %v959_v36 = vunpack.c.h.bf16 %v1257_v30  ;;  %v962_v38 = vunpack.c.l.bf16 %v1266_v35  ;;  %v963_v41 = vunpack.c.h.bf16 %v1266_v35 }
  0x17   : > { %v966_v43 = vunpack.c.l.bf16 %v1275_v40  ;;  %v967_v46 = vunpack.c.h.bf16 %v1275_v40  ;;  %v970_v48 = vunpack.c.l.bf16 %v1284_v45  ;;  %v971_v51 = vunpack.c.h.bf16 %v1284_v45 }
  0x18   : > { %v296_v12 = vadd.f32 %v935_v6, %v295_v9  ;;  %v974_v53 = vunpack.c.l.bf16 %v1293_v50  ;;  %v975_v56 = vunpack.c.h.bf16 %v1293_v50  ;;  %v978_v58 = vunpack.c.l.bf16 %v1302_v55  ;;  %v1320_v9 = vld [vmem:[%s1198_s19 + $0x70] sm:$0xff]  }
  0x19   : > { %v979_v61 = vunpack.c.h.bf16 %v1302_v55  ;;  %v982_v63 = vunpack.c.l.bf16 %v1311_v60 }
  0x1a   : > { %v297_v14 = vadd.f32 %v938_v8, %v296_v12  ;;  %v983_v12 = vunpack.c.h.bf16 %v1311_v60 }
  0x1c   : > { %v298_v17 = vadd.f32 %v939_v11, %v297_v14 }
  0x1e   : > { %v299_v19 = vadd.f32 %v942_v13, %v298_v17  ;;  %v986_v17 = vunpack.c.l.bf16 %v1320_v9 }
  0x20   : > { %v300_v22 = vadd.f32 %v943_v16, %v299_v19 }
  0x22   : > { %v301_v24 = vadd.f32 %v946_v18, %v300_v22  ;;  %v1329_v22 = vld [vmem:[%s1198_s19 + $0x78] sm:$0xff]  }
  0x24   : > { %v302_v27 = vadd.f32 %v947_v21, %v301_v24  ;;  %v987_v24 = vunpack.c.h.bf16 %v1320_v9 }
  0x26   : > { %v303_v29 = vadd.f32 %v950_v23, %v302_v27 }
  0x28   : > { %v304_v32 = vadd.f32 %v951_v26, %v303_v29  ;;  %v990_v29 = vunpack.c.l.bf16 %v1329_v22 }
  0x2a   : > { %v305_v34 = vadd.f32 %v954_v28, %v304_v32 }
  0x2c   : > { %v306_v37 = vadd.f32 %v955_v31, %v305_v34  ;;  %v991_v34 = vunpack.c.h.bf16 %v1329_v22 }
  0x2e   : > { %v307_v39 = vadd.f32 %v958_v33, %v306_v37 }
  0x30   : > { %v308_v42 = vadd.f32 %v959_v36, %v307_v39 }
  0x32   : > { %v309_v44 = vadd.f32 %v962_v38, %v308_v42 }
  0x34   : > { %v310_v47 = vadd.f32 %v963_v41, %v309_v44 }
  0x36   : > { %v311_v49 = vadd.f32 %v966_v43, %v310_v47 }
  0x38   : > { %v312_v52 = vadd.f32 %v967_v46, %v311_v49 }
  0x3a   : > { %v313_v54 = vadd.f32 %v970_v48, %v312_v52 }
  0x3c   : > { %v314_v57 = vadd.f32 %v971_v51, %v313_v54 }
  0x3e   : > { %v315_v59 = vadd.f32 %v974_v53, %v314_v57 }
  0x40   : > { %v316_v62 = vadd.f32 %v975_v56, %v315_v59 }
  0x42   : > { %v317_v7 = vadd.f32 %v978_v58, %v316_v62 }
  0x44   : > { %v318_v14 = vadd.f32 %v979_v61, %v317_v7 }
  0x46   : > { %v319_v19 = vadd.f32 %v982_v63, %v318_v14 }
  0x48   : > { %v320_v27 = vadd.f32 %v983_v12, %v319_v19 }
  0x4a   : > { %v321_v32 = vadd.f32 %v986_v17, %v320_v27 }
  0x4c   : > { %v322_v37 = vadd.f32 %v987_v24, %v321_v32 }
  0x4e   : > { %v323_v39 = vadd.f32 %v990_v29, %v322_v37 }
  0x50   : > { %v324_v42 = vadd.f32 %v991_v34, %v323_v39 }
  0x52   : > { %v325_v44 = vrot.slane %v324_v42, 4 }
  0x54   : > { %v326_v47 = vadd.f32 %v325_v44, %v324_v42 }
  0x56   : > { %v327_v49 = vrot.slane %v326_v47, 2 }
  0x58   : > { %v328_v52 = vadd.f32 %v327_v49, %v326_v47 }
  0x5a   : > { %v329_v54 = vrot.slane %v328_v52, 1 }
  0x5c   : > { %v330_v57 = vadd.f32 %v329_v54, %v328_v52 }
  0x5e   : > { %v1344_v59 = vmul.f32 0.00390625, %v330_v57 }
  0x60   : > { %v1349_v62 = vsub.f32 %v930_v2, %v1344_v59  ;;  %v1354_v7 = vsub.f32 %v931_v3, %v1344_v59  ;;  %v1359_v14 = vsub.f32 %v934_v4, %v1344_v59  ;;  %v1364_v19 = vsub.f32 %v935_v6, %v1344_v59 }
  0x61   : > { %v1373_v0 = vsub.f32 %v938_v8, %v1344_v59  ;;  %v1380_v1 = vsub.f32 %v939_v11, %v1344_v59  ;;  %v1387_v32 = vsub.f32 %v942_v13, %v1344_v59  ;;  %v1394_v39 = vsub.f32 %v943_v16, %v1344_v59 }
  0x62   : > { %v365_v27 = vmul.f32 %v1349_v62, %v1349_v62  ;;  %v366_v2 = vmul.f32 %v1354_v7, %v1354_v7  ;;  %v367_v3 = vmul.f32 %v1359_v14, %v1359_v14  ;;  %v368_v4 = vmul.f32 %v1364_v19, %v1364_v19 }
  0x63   : > { %v369_v8 = vmul.f32 %v1373_v0, %v1373_v0  ;;  %v370_v5 = vmul.f32 %v1380_v1, %v1380_v1  ;;  %v1401_v42 = vsub.f32 %v946_v18, %v1344_v59  ;;  %v371_v13 = vmul.f32 %v1387_v32, %v1387_v32 }
  0x64   : > { %v397_v6 = vadd.f32 %v366_v2, %v365_v27  ;;  %v1408_v47 = vsub.f32 %v947_v21, %v1344_v59  ;;  %v372_v10 = vmul.f32 %v1394_v39, %v1394_v39  ;;  %v1415_v49 = vsub.f32 %v950_v23, %v1344_v59 }
  0x65   : > { %v373_v18 = vmul.f32 %v1401_v42, %v1401_v42  ;;  %v1422_v54 = vsub.f32 %v951_v26, %v1344_v59  ;;  %v1429_v57 = vsub.f32 %v954_v28, %v1344_v59  ;;  %v1436_v2 = vsub.f32 %v955_v31, %v1344_v59 }
  0x66   : > { %v398_v37 = vadd.f32 %v397_v6, %v367_v3  ;;  %v374_v15 = vmul.f32 %v1408_v47, %v1408_v47  ;;  %v375_v23 = vmul.f32 %v1415_v49, %v1415_v49  ;;  %v1443_v3 = vsub.f32 %v958_v33, %v1344_v59 }
  0x67   : > { %v376_v20 = vmul.f32 %v1422_v54, %v1422_v54  ;;  %v377_v28 = vmul.f32 %v1429_v57, %v1429_v57  ;;  %v1450_v6 = vsub.f32 %v959_v36, %v1344_v59  ;;  %v378_v25 = vmul.f32 %v1436_v2, %v1436_v2 }
  0x68   : > { %v399_v11 = vadd.f32 %v398_v37, %v368_v4  ;;  %v379_v33 = vmul.f32 %v1443_v3, %v1443_v3 }
  0x69   : > { %v380_v30 = vmul.f32 %v1450_v6, %v1450_v6 }
  0x6a   : > { %v400_v44 = vadd.f32 %v399_v11, %v369_v8  ;;  %v1457_v8 = vsub.f32 %v962_v38, %v1344_v59  ;;  %v1471_v11 = vsub.f32 %v966_v43, %v1344_v59 }
  0x6c   : > { %v401_v16 = vadd.f32 %v400_v44, %v370_v5  ;;  %v1464_v5 = vsub.f32 %v963_v41, %v1344_v59  ;;  %v381_v38 = vmul.f32 %v1457_v8, %v1457_v8  ;;  %v1478_v44 = vsub.f32 %v967_v46, %v1344_v59 }
  0x6d   : > { %v383_v43 = vmul.f32 %v1471_v11, %v1471_v11 }
  0x6e   : > { %v402_v52 = vadd.f32 %v401_v16, %v371_v13  ;;  %v382_v35 = vmul.f32 %v1464_v5, %v1464_v5  ;;  %v384_v40 = vmul.f32 %v1478_v44, %v1478_v44 }
  0x70   : > { %v403_v21 = vadd.f32 %v402_v52, %v372_v10  ;;  %v1485_v10 = vsub.f32 %v970_v48, %v1344_v59  ;;  %v1499_v52 = vsub.f32 %v974_v53, %v1344_v59 }
  0x72   : > { %v404_v27 = vadd.f32 %v403_v21, %v373_v18  ;;  %v1492_v18 = vsub.f32 %v971_v51, %v1344_v59  ;;  %v385_v48 = vmul.f32 %v1485_v10, %v1485_v10  ;;  %v1506_v21 = vsub.f32 %v975_v56, %v1344_v59 }
  0x73   : > { %v387_v53 = vmul.f32 %v1499_v52, %v1499_v52 }
  0x74   : > { %v405_v26 = vadd.f32 %v404_v27, %v374_v15  ;;  %v386_v45 = vmul.f32 %v1492_v18, %v1492_v18  ;;  %v388_v50 = vmul.f32 %v1506_v21, %v1506_v21 }
  0x76   : > { %v406_v4 = vadd.f32 %v405_v26, %v375_v23  ;;  %v1513_v23 = vsub.f32 %v978_v58, %v1344_v59  ;;  %v1527_v26 = vsub.f32 %v982_v63, %v1344_v59 }
  0x78   : > { %v407_v31 = vadd.f32 %v406_v4, %v376_v20  ;;  %v1520_v20 = vsub.f32 %v979_v61, %v1344_v59  ;;  %v389_v58 = vmul.f32 %v1513_v23, %v1513_v23  ;;  %v1534_v4 = vsub.f32 %v983_v12, %v1344_v59 }
  0x79   : > { %v391_v63 = vmul.f32 %v1527_v26, %v1527_v26 }
  0x7a   : > { %v408_v37 = vadd.f32 %v407_v31, %v377_v28  ;;  %v390_v55 = vmul.f32 %v1520_v20, %v1520_v20  ;;  %v392_v60 = vmul.f32 %v1534_v4, %v1534_v4 }
  0x7c   : > { %v409_v36 = vadd.f32 %v408_v37, %v378_v25  ;;  %v1541_v25 = vsub.f32 %v986_v17, %v1344_v59  ;;  %v1555_v37 = vsub.f32 %v990_v29, %v1344_v59 }
  0x7e   : > { %v410_v13 = vadd.f32 %v409_v36, %v379_v33  ;;  %v1548_v33 = vsub.f32 %v987_v24, %v1344_v59  ;;  %v393_v17 = vmul.f32 %v1541_v25, %v1541_v25  ;;  %v1562_v36 = vsub.f32 %v991_v34, %v1344_v59 }
  0x80   : > { %v411_v41 = vadd.f32 %v410_v13, %v380_v30  ;;  %v394_v9 = vmul.f32 %v1548_v33, %v1548_v33  ;;  %v396_v29 = vmul.f32 %v1562_v36, %v1562_v36 }
  0x82   : > { %v412_v16 = vadd.f32 %v411_v41, %v381_v38  ;;  %v395_v38 = vmul.f32 %v1555_v37, %v1555_v37 }
  0x84   : > { %v413_v46 = vadd.f32 %v412_v16, %v382_v35 }
  0x86   : > { %v414_v15 = vadd.f32 %v413_v46, %v383_v43 }
  0x88   : > { %v415_v51 = vadd.f32 %v414_v15, %v384_v40 }
  0x8a   : > { %v416_v27 = vadd.f32 %v415_v51, %v385_v48  ;;  %v1575_v51 = vld [vmem:[%s1743_s1] ss:$0 sm:$0xff] }
  0x8c   : > { %v417_v56 = vadd.f32 %v416_v27, %v386_v45 }
  0x8e   : > { %v418_v28 = vadd.f32 %v417_v56, %v387_v53 }
  0x90   : > { %v419_v61 = vadd.f32 %v418_v28, %v388_v50 }
  0x92   : > { %v420_v31 = vadd.f32 %v419_v61, %v389_v58  ;;  %v1588_v58 = vld [vmem:[%s1744_s2] ss:$0 sm:$0xff] }
  0x94   : > { %v421_v12 = vadd.f32 %v420_v31, %v390_v55 }
  0x96   : > { %v422_v30 = vadd.f32 %v421_v12, %v391_v63 }
  0x98   : > { %v423_v24 = vadd.f32 %v422_v30, %v392_v60 }
  0x9a   : > { %v424_v13 = vadd.f32 %v423_v24, %v393_v17 }
  0x9c   : > { %v425_v35 = vadd.f32 %v424_v13, %v394_v9 }
  0x9e   : > { %v426_v41 = vadd.f32 %v425_v35, %v395_v38 }
  0xa0   : > { %v427_v43 = vadd.f32 %v426_v41, %v396_v29 }
  0xa2   : > { %v428_v16 = vrot.slane %v427_v43, 4 }
  0xa4   : > { %v429_v40 = vadd.f32 %v428_v16, %v427_v43 }
  0xa6   : > { %v430_v46 = vrot.slane %v429_v40, 2 }
  0xa8   : > { %v431_v22 = vadd.f32 %v430_v46, %v429_v40 }
  0xaa   : > { %v432_v34 = vrot.slane %v431_v22, 1 }
  0xac   : > { %v433_v59 = vadd.f32 %v432_v34, %v431_v22 }
  0xae   : > { %v434_v48 = vmul.f32 0.00390625, %v433_v59 }
  0xb0   : > { %v435_v15 = vadd.f32 1e-05, %v434_v48 }
  0xb2   : > { %1126 = vrsqrt.f32 %v435_v15 }
  0xbc   : > { %v1570_v45 = vpop.eup %1126 }
  0xbd   : > { %v437_v53 = vmul.f32 %v1570_v45, %v1349_v62  ;;  %v438_v27 = vmul.f32 %v1570_v45, %v1354_v7  ;;  %v439_v50 = vmul.f32 %v1570_v45, %v1359_v14  ;;  %v440_v56 = vmul.f32 %v1570_v45, %v1364_v19 }
  0xbe   : > { %v441_v28 = vmul.f32 %v1570_v45, %v1373_v0  ;;  %v442_v62 = vmul.f32 %v1570_v45, %v1380_v1  ;;  %v443_v7 = vmul.f32 %v1570_v45, %v1387_v32  ;;  %v444_v14 = vmul.f32 %v1570_v45, %v1394_v39 }
  0xbf   : > { %v476_v55 = vmul.f32 %v1575_v51, %v437_v53  ;;  %v477_v19 = vmul.f32 %v1575_v51, %v438_v27  ;;  %v478_v61 = vmul.f32 %v1575_v51, %v439_v50  ;;  %v479_v63 = vmul.f32 %v1575_v51, %v440_v56 }
  0xc0   : > { %v480_v31 = vmul.f32 %v1575_v51, %v441_v28  ;;  %v481_v0 = vmul.f32 %v1575_v51, %v442_v62  ;;  %v482_v1 = vmul.f32 %v1575_v51, %v443_v7  ;;  %v483_v32 = vmul.f32 %v1575_v51, %v444_v14 }
  0xc1   : > { %v515_v60 = vadd.f32 %v1588_v58, %v476_v55  ;;  %v516_v39 = vadd.f32 %v1588_v58, %v477_v19  ;;  %v517_v12 = vadd.f32 %v1588_v58, %v478_v61  ;;  %v518_v17 = vadd.f32 %v1588_v58, %v479_v63 }
  0xc2   : > { %v519_v30 = vadd.f32 %v1588_v58, %v480_v31  ;;  %v520_v9 = vadd.f32 %v1588_v58, %v481_v0  ;;  %v521_v24 = vadd.f32 %v1588_v58, %v482_v1  ;;  %v522_v38 = vadd.f32 %v1588_v58, %v483_v32 }
  0xc3   : > { %v547_v13 = vmax.f32 %v515_v60, 0.0  ;;  %v548_v29 = vmax.f32 %v516_v39, 0.0  ;;  %v549_v35 = vmax.f32 %v517_v12, 0.0  ;;  %v550_v41 = vmax.f32 %v518_v17, 0.0 }
  0xc4   : > { %v551_v43 = vmax.f32 %v519_v30, 0.0  ;;  %v552_v16 = vmax.f32 %v520_v9, 0.0  ;;  %v553_v40 = vmax.f32 %v521_v24, 0.0  ;;  %v554_v46 = vmax.f32 %v522_v38, 0.0 }
  0xc5   : > { %v995_v22 = vpack.c.bf16 %v548_v29, %v547_v13  ;;  %v1000_v34 = vpack.c.bf16 %v550_v41, %v549_v35  ;;  %v445_v59 = vmul.f32 %v1570_v45, %v1401_v42  ;;  %v446_v48 = vmul.f32 %v1570_v45, %v1408_v47 }
  0xc6   : > { %v1005_v15 = vpack.c.bf16 %v552_v16, %v551_v43  ;;  %v1010_v53 = vpack.c.bf16 %v554_v46, %v553_v40  ;;  %v447_v27 = vmul.f32 %v1570_v45, %v1415_v49  ;;  %v448_v50 = vmul.f32 %v1570_v45, %v1422_v54 }
  0xc7   : > { %996 = vst [vmem:[%s1619_s26] sm:$0xff] %v995_v22   ;;  %1087 = vst [vmem:[%s1619_s26 + $0x8] sm:$0xff] %v1000_v34   ;;  %v484_v56 = vmul.f32 %v1575_v51, %v445_v59  ;;  %v485_v28 = vmul.f32 %v1575_v51, %v446_v48  ;;  %v449_v42 = vmul.f32 %v1570_v45, %v1429_v57 }
  0xc8   : > { %v450_v47 = vmul.f32 %v1570_v45, %v1436_v2  ;;  %1088 = vst [vmem:[%s1619_s26 + $0x10] sm:$0xff] %v1005_v15   ;;  %1089 = vst [vmem:[%s1619_s26 + $0x18] sm:$0xff] %v1010_v53   ;;  %v486_v62 = vmul.f32 %v1575_v51, %v447_v27  ;;  %v487_v49 = vmul.f32 %v1575_v51, %v448_v50 }
  0xc9   : > { %v451_v54 = vmul.f32 %v1570_v45, %v1443_v3  ;;  %v452_v7 = vmul.f32 %v1570_v45, %v1450_v6  ;;  %v523_v14 = vadd.f32 %v1588_v58, %v484_v56  ;;  %v524_v55 = vadd.f32 %v1588_v58, %v485_v28 }
  0xca   : > { %v488_v57 = vmul.f32 %v1575_v51, %v449_v42  ;;  %v489_v2 = vmul.f32 %v1575_v51, %v450_v47  ;;  %v525_v19 = vadd.f32 %v1588_v58, %v486_v62  ;;  %v526_v61 = vadd.f32 %v1588_v58, %v487_v49 }
  0xcb   : > { %v490_v63 = vmul.f32 %v1575_v51, %v451_v54  ;;  %v491_v31 = vmul.f32 %v1575_v51, %v452_v7  ;;  %v555_v3 = vmax.f32 %v523_v14, 0.0  ;;  %v556_v0 = vmax.f32 %v524_v55, 0.0 }
  0xcc   : > { %v527_v6 = vadd.f32 %v1588_v58, %v488_v57  ;;  %v528_v1 = vadd.f32 %v1588_v58, %v489_v2  ;;  %v557_v32 = vmax.f32 %v525_v19, 0.0  ;;  %v558_v60 = vmax.f32 %v526_v61, 0.0 }
  0xcd   : > { %v529_v39 = vadd.f32 %v1588_v58, %v490_v63  ;;  %v530_v12 = vadd.f32 %v1588_v58, %v491_v31  ;;  %v1015_v17 = vpack.c.bf16 %v556_v0, %v555_v3  ;;  %v453_v24 = vmul.f32 %v1570_v45, %v1457_v8 }
  0xce   : > { %v559_v30 = vmax.f32 %v527_v6, 0.0  ;;  %v560_v9 = vmax.f32 %v528_v1, 0.0  ;;  %v1020_v38 = vpack.c.bf16 %v558_v60, %v557_v32  ;;  %v454_v35 = vmul.f32 %v1570_v45, %v1464_v5 }
  0xcf   : > { %v561_v13 = vmax.f32 %v529_v39, 0.0  ;;  %v562_v29 = vmax.f32 %v530_v12, 0.0  ;;  %1090 = vst [vmem:[%s1619_s26 + $0x20] sm:$0xff] %v1015_v17   ;;  %v492_v43 = vmul.f32 %v1575_v51, %v453_v24  ;;  %v455_v16 = vmul.f32 %v1570_v45, %v1471_v11 }
  0xd0   : > { %v1025_v41 = vpack.c.bf16 %v560_v9, %v559_v30  ;;  %v456_v40 = vmul.f32 %v1570_v45, %v1478_v44  ;;  %1091 = vst [vmem:[%s1619_s26 + $0x28] sm:$0xff] %v1020_v38   ;;  %v493_v8 = vmul.f32 %v1575_v51, %v454_v35  ;;  %v457_v22 = vmul.f32 %v1570_v45, %v1485_v10 }
  0xd1   : > { %v1030_v46 = vpack.c.bf16 %v562_v29, %v561_v13  ;;  %v458_v5 = vmul.f32 %v1570_v45, %v1492_v18  ;;  %v531_v34 = vadd.f32 %v1588_v58, %v492_v43  ;;  %v494_v59 = vmul.f32 %v1575_v51, %v455_v16 }
  0xd2   : > { %1092 = vst [vmem:[%s1619_s26 + $0x30] sm:$0xff] %v1025_v41   ;;  %v495_v11 = vmul.f32 %v1575_v51, %v456_v40  ;;  %v459_v44 = vmul.f32 %v1570_v45, %v1499_v52  ;;  %v532_v48 = vadd.f32 %v1588_v58, %v493_v8  ;;  %v496_v15 = vmul.f32 %v1575_v51, %v457_v22 }
  0xd3   : > { %1093 = vst [vmem:[%s1619_s26 + $0x38] sm:$0xff] %v1030_v46   ;;  %v497_v10 = vmul.f32 %v1575_v51, %v458_v5  ;;  %v460_v18 = vmul.f32 %v1570_v45, %v1506_v21  ;;  %v563_v53 = vmax.f32 %v531_v34, 0.0  ;;  %v533_v27 = vadd.f32 %v1588_v58, %v494_v59 }
  0xd4   : > { %v534_v50 = vadd.f32 %v1588_v58, %v495_v11  ;;  %v498_v56 = vmul.f32 %v1575_v51, %v459_v44  ;;  %v564_v28 = vmax.f32 %v532_v48, 0.0  ;;  %v535_v52 = vadd.f32 %v1588_v58, %v496_v15 }
  0xd5   : > { %v536_v42 = vadd.f32 %v1588_v58, %v497_v10  ;;  %v499_v47 = vmul.f32 %v1575_v51, %v460_v18  ;;  %v565_v62 = vmax.f32 %v533_v27, 0.0  ;;  %v461_v54 = vmul.f32 %v1570_v45, %v1513_v23 }
  0xd6   : > { %v566_v49 = vmax.f32 %v534_v50, 0.0  ;;  %v537_v21 = vadd.f32 %v1588_v58, %v498_v56  ;;  %v1035_v7 = vpack.c.bf16 %v564_v28, %v563_v53  ;;  %v567_v14 = vmax.f32 %v535_v52, 0.0 }
  0xd7   : > { %v568_v55 = vmax.f32 %v536_v42, 0.0  ;;  %v538_v57 = vadd.f32 %v1588_v58, %v499_v47  ;;  %v462_v61 = vmul.f32 %v1570_v45, %v1520_v20  ;;  %v500_v63 = vmul.f32 %v1575_v51, %v461_v54 }
  0xd8   : > { %v1040_v2 = vpack.c.bf16 %v566_v49, %v565_v62  ;;  %v569_v19 = vmax.f32 %v537_v21, 0.0  ;;  %1094 = vst [vmem:[%s1619_s26 + $0x40] sm:$0xff] %v1035_v7   ;;  %v463_v0 = vmul.f32 %v1570_v45, %v1527_v26  ;;  %v464_v23 = vmul.f32 %v1570_v45, %v1534_v4 }
  0xd9   : > { %v1045_v31 = vpack.c.bf16 %v568_v55, %v567_v14  ;;  %v570_v3 = vmax.f32 %v538_v57, 0.0  ;;  %v501_v6 = vmul.f32 %v1575_v51, %v462_v61  ;;  %v539_v1 = vadd.f32 %v1588_v58, %v500_v63 }
  0xda   : > { %1095 = vst [vmem:[%s1619_s26 + $0x48] sm:$0xff] %v1040_v2   ;;  %v465_v20 = vmul.f32 %v1570_v45, %v1541_v25  ;;  %v466_v32 = vmul.f32 %v1570_v45, %v1548_v33  ;;  %v502_v39 = vmul.f32 %v1575_v51, %v463_v0  ;;  %v503_v26 = vmul.f32 %v1575_v51, %v464_v23 }
  0xdb   : > { %1096 = vst [vmem:[%s1619_s26 + $0x50] sm:$0xff] %v1045_v31   ;;  %v1050_v60 = vpack.c.bf16 %v570_v3, %v569_v19  ;;  %v467_v4 = vmul.f32 %v1570_v45, %v1555_v37  ;;  %v540_v12 = vadd.f32 %v1588_v58, %v501_v6  ;;  %v571_v17 = vmax.f32 %v539_v1, 0.0 }
  0xdc   : > { %v504_v30 = vmul.f32 %v1575_v51, %v465_v20  ;;  %v505_v9 = vmul.f32 %v1575_v51, %v466_v32  ;;  %v541_v25 = vadd.f32 %v1588_v58, %v502_v39  ;;  %v542_v33 = vadd.f32 %v1588_v58, %v503_v26 }
  0xdd   : > { %1097 = vst [vmem:[%s1619_s26 + $0x58] sm:$0xff] %v1050_v60   ;;  %v468_v24 = vmul.f32 %v1570_v45, %v1562_v36  ;;  %v506_v38 = vmul.f32 %v1575_v51, %v467_v4  ;;  %v572_v37 = vmax.f32 %v540_v12, 0.0 }
  0xde   : > { %v543_v13 = vadd.f32 %v1588_v58, %v504_v30  ;;  %v544_v29 = vadd.f32 %v1588_v58, %v505_v9  ;;  %v573_v35 = vmax.f32 %v541_v25, 0.0  ;;  %v574_v41 = vmax.f32 %v542_v33, 0.0 }
  0xdf   : > { %v507_v43 = vmul.f32 %v1575_v51, %v468_v24  ;;  %v545_v16 = vadd.f32 %v1588_v58, %v506_v38  ;;  %v1055_v40 = vpack.c.bf16 %v572_v37, %v571_v17 }
  0xe0   : > { %v575_v46 = vmax.f32 %v543_v13, 0.0  ;;  %v576_v8 = vmax.f32 %v544_v29, 0.0  ;;  %v1060_v36 = vpack.c.bf16 %v574_v41, %v573_v35 }
  0xe1   : > { %v546_v45 = vadd.f32 %v1588_v58, %v507_v43  ;;  %v577_v22 = vmax.f32 %v545_v16, 0.0  ;;  %1098 = vst [vmem:[%s1619_s26 + $0x60] sm:$0xff] %v1055_v40  }
  0xe2   : > { %v1065_v5 = vpack.c.bf16 %v576_v8, %v575_v46  ;;  %1099 = vst [vmem:[%s1619_s26 + $0x68] sm:$0xff] %v1060_v36  }
  0xe3   : > { %v578_v34 = vmax.f32 %v546_v45, 0.0 }
  0xe4   : > { %1100 = vst [vmem:[%s1619_s26 + $0x70] sm:$0xff] %v1065_v5  }
  0xe5   : > { %v1070_v59 = vpack.c.bf16 %v578_v34, %v577_v22 }
  0xe7   : > { %1101 = vst [vmem:[%s1619_s26 + $0x78] sm:$0xff] %v1070_v59  }
  0xe8 PF: > { %s13_s14 = sadd.s32 1, %s1150_s14   ;;  %s1746_s12 = smov %s1146_s13 }
  0xe9   : > { %p10_p5 = scmp.ge.s32.totalorder %s13_s14, 4   ;;  %s1747_s13 = smov %s1749_s15 }
  0xeb   :  { %12 = sbr.rel (!%p10_p5) target bundleno = 2 (0x2), region = 68 }

// kernel: _generator_forward.25
= control target key start
LH: loop header
LB: loop body
LE: loop exit
PB: predicated region body
PF: predicated region fallthrough
CT: control target
= control target key end

     0   :  { %s1395_s9 = smov 0   ;;  %s1397_s10 = smov 0   ;;  %s1532_s0 = inlined_call_operand.vmem [shape: bf16[512,256], index: 0, kind: input, shape index: {}]   ;;  %s1533_s1 = inlined_call_operand.vmem [shape: bf16[256,128], index: 1, kind: input, shape index: {}]   ;;  %s1534_s2 = inlined_call_operand.vmem [shape: bf16[512,128], index: 2, kind: output, shape index: {}]  }
   0x1   :  { %s1399_s11 = smov 0  }
   0x2 LB: > { %s24_s12 = sadd.s32 1, %s1374_s10  ;;  %p924_p0 = scmp.ge.s32.totalorder %s1378_s11, 1  ;;  %s1378_s11 = sphi %s1399_s11, %s12_s11   ;;  %s1374_s10 = sphi %s1397_s10, %s1536_s10   ;;  %s1370_s9 = sphi %s1395_s9, %s1535_s9  }
   0x3   : > { %p26_p1 = scmp.ge.s32.totalorder %s24_s12, 2  ;;  %p137_p2 = scmp.lt.s32.totalorder %s1378_s11, 3 }
   0x5   : > { %s1538_s12 = smov (%p26_p1, %s24_s12), 0  ;;  %p138_p3 = pnand %p924_p0, %p137_p2 }
   0x6   : > { %v1292_v0 = vld [vmem:[%s1533_s1 + $0x40] sm:$0xff] (!%p138_p3)   ;;  %s925_s15 = sshll.u32 (!%p138_p3), %s1370_s9, 5  ;;  %v1294_v2 = vld [vmem:[%s1533_s1 + $0x48] sm:$0xff] (!%p138_p3)   ;;  %v1296_v4 = vld [vmem:[%s1533_s1 + $0x50] sm:$0xff] (!%p138_p3)  }
   0x7   : > { %141 = sbr.rel (%p138_p3) target bundleno = 315 (0x13b), region = 28  ;;  %v1293_v1 = vld [vmem:[%s1533_s1] sm:$0xff] (!%p138_p3)   ;;  %1140 = vmatprep.subr.bf16.mxu0 (!%p138_p3), %v1292_v0  ;;  %1252 = vmatprep.subr.bf16.mxu1 (!%p138_p3), %v1292_v0  ;;  %v1295_v3 = vld [vmem:[%s1533_s1 + $0x8] sm:$0xff] (!%p138_p3)   ;;  %p168_p4 = scmp.lt.s32.totalorder (!%p138_p3), %s925_s15, 63  ;;  %v1297_v5 = vld [vmem:[%s1533_s1 + $0x10] sm:$0xff] (!%p138_p3)  }
   0x8   : > { %1141 = vmatpush3.bf16.msra.mxu0 (!%p138_p3), %v1293_v1  ;;  %1260 = vmatpush3.bf16.msra.mxu1 (!%p138_p3), %v1293_v1  ;;  %v1298_v6 = vld [vmem:[%s1533_s1 + $0x58] sm:$0xff] (!%p138_p3)   ;;  %v1300_v8 = vld [vmem:[%s1533_s1 + $0x60] sm:$0xff] (!%p138_p3)   ;;  %v1302_v10 = vld [vmem:[%s1533_s1 + $0x68] sm:$0xff] (!%p138_p3)  }
   0x9   : > { %1142 = vmatprep.subr.bf16.mxu0 (!%p138_p3), %v1294_v2  ;;  %1253 = vmatprep.subr.bf16.mxu1 (!%p138_p3), %v1294_v2  ;;  %v1299_v7 = vld [vmem:[%s1533_s1 + $0x18] sm:$0xff] (!%p138_p3)   ;;  %v1301_v9 = vld [vmem:[%s1533_s1 + $0x20] sm:$0xff] (!%p138_p3)   ;;  %v1303_v13 = vld [vmem:[%s1533_s1 + $0x28] sm:$0xff] (!%p138_p3)  }
   0xa   : > { %v1304_v14 = vld [vmem:[%s1533_s1 + $0x70] sm:$0xff] (!%p138_p3)   ;;  %v1306_v16 = vld [vmem:[%s1533_s1 + $0x78] sm:$0xff] (!%p138_p3)  }
   0xb   : > { %v1305_v15 = vld [vmem:[%s1533_s1 + $0x30] sm:$0xff] (!%p138_p3)   ;;  %v1307_v17 = vld [vmem:[%s1533_s1 + $0x38] sm:$0xff] (!%p138_p3)  }
   0xc   : > { %1143 = vmatpush3.bf16.msra.mxu0 (!%p138_p3), %v1295_v3  ;;  %1261 = vmatpush3.bf16.msra.mxu1 (!%p138_p3), %v1295_v3 }
   0xd   : > { %1144 = vmatprep.subr.bf16.mxu0 (!%p138_p3), %v1296_v4  ;;  %1254 = vmatprep.subr.bf16.mxu1 (!%p138_p3), %v1296_v4 }
   0xe   : > { %s1540_s15 = smov (!%p168_p4, %s925_s15), 63 }
   0xf   : > { %s1012_s30 = sshll.u32 %s1540_s15, 3  ;;  %s929_s26 = sshll.u32 %s1540_s15, 2 }
  0x10   : > { %1145 = vmatpush3.bf16.msra.mxu0 %v1297_v5  ;;  %1262 = vmatpush3.bf16.msra.mxu1 %v1297_v5  ;;  %s1446_s7 = scalar_lea.vmem %s1532_s0, %s1012_s30  ;;  %s1505_s29 = scalar_lea.vmem %s1534_s2, %s929_s26 }
  0x11   : > { %1146 = vmatprep.subr.bf16.mxu0 %v1298_v6  ;;  %1255 = vmatprep.subr.bf16.mxu1 %v1298_v6  ;;  %v1310_v11 = vld [vmem:[%s1446_s7 + $0x4] ss:$8 sps:$4 sm:$0xff]   ;;  %v1308_v18 = vld [vmem:[%s1446_s7] ss:$8 sps:$4 sm:$0xff]   ;;  %v1314_v20 = vld [vmem:[%s1446_s7 + $0x14] ss:$8 sps:$4 sm:$0xff]  }
  0x12   : > { %v1313_v12 = vld [vmem:[%s1446_s7 + $0x84] ss:$8 sps:$4 sm:$0xff]   ;;  %540 = vmatprep.mubr.bf16.mxu0 %v1310_v11  ;;  %v1311_v19 = vld [vmem:[%s1446_s7 + $0x80] ss:$8 sps:$4 sm:$0xff]   ;;  %v1316_v21 = vld [vmem:[%s1446_s7 + $0x94] ss:$8 sps:$4 sm:$0xff]  }
  0x13   : > { %604 = vmatprep.mubr.bf16.mxu1 %v1313_v12  ;;  %v1318_v22 = vld [vmem:[%s1446_s7 + $0x10] ss:$8 sps:$4 sm:$0xff]   ;;  %v1320_v24 = vld [vmem:[%s1446_s7 + $0x24] ss:$8 sps:$4 sm:$0xff]   ;;  %v1324_v26 = vld [vmem:[%s1446_s7 + $0x20] ss:$8 sps:$4 sm:$0xff]  }
  0x14   : > { %1147 = vmatpush3.bf16.msra.mxu0 %v1299_v7  ;;  %1263 = vmatpush3.bf16.msra.mxu1 %v1299_v7  ;;  %v1319_v23 = vld [vmem:[%s1446_s7 + $0x90] ss:$8 sps:$4 sm:$0xff]   ;;  %v1322_v25 = vld [vmem:[%s1446_s7 + $0xa4] ss:$8 sps:$4 sm:$0xff]   ;;  %v1325_v27 = vld [vmem:[%s1446_s7 + $0xa0] ss:$8 sps:$4 sm:$0xff]  }
  0x15   : > { %1148 = vmatprep.subr.bf16.mxu0 %v1300_v8  ;;  %1256 = vmatprep.subr.bf16.mxu1 %v1300_v8  ;;  %v1326_v28 = vld [vmem:[%s1446_s7 + $0x34] ss:$8 sps:$4 sm:$0xff]   ;;  %v1330_v30 = vld [vmem:[%s1446_s7 + $0x30] ss:$8 sps:$4 sm:$0xff]   ;;  %v1332_v32 = vld [vmem:[%s1446_s7 + $0x44] ss:$8 sps:$4 sm:$0xff]  }
  0x16   : > { %v1328_v29 = vld [vmem:[%s1446_s7 + $0xb4] ss:$8 sps:$4 sm:$0xff]   ;;  %v1331_v31 = vld [vmem:[%s1446_s7 + $0xb0] ss:$8 sps:$4 sm:$0xff]   ;;  %v1334_v33 = vld [vmem:[%s1446_s7 + $0xc4] ss:$8 sps:$4 sm:$0xff]  }
  0x17   : > { %v1336_v34 = vld [vmem:[%s1446_s7 + $0x40] ss:$8 sps:$4 sm:$0xff]   ;;  %v1338_v36 = vld [vmem:[%s1446_s7 + $0x54] ss:$8 sps:$4 sm:$0xff]   ;;  %v1342_v38 = vld [vmem:[%s1446_s7 + $0x50] ss:$8 sps:$4 sm:$0xff]  }
  0x18   : > { %1149 = vmatpush3.bf16.msra.mxu0 %v1301_v9  ;;  %1264 = vmatpush3.bf16.msra.mxu1 %v1301_v9  ;;  %v1337_v35 = vld [vmem:[%s1446_s7 + $0xc0] ss:$8 sps:$4 sm:$0xff]   ;;  %v1340_v37 = vld [vmem:[%s1446_s7 + $0xd4] ss:$8 sps:$4 sm:$0xff]   ;;  %v1343_v39 = vld [vmem:[%s1446_s7 + $0xd0] ss:$8 sps:$4 sm:$0xff]  }
  0x19   : > { %1150 = vmatprep.subr.bf16.mxu0 %v1302_v10  ;;  %1257 = vmatprep.subr.bf16.mxu1 %v1302_v10  ;;  %v1344_v40 = vld [vmem:[%s1446_s7 + $0x64] ss:$8 sps:$4 sm:$0xff]   ;;  %v1348_v42 = vld [vmem:[%s1446_s7 + $0x60] ss:$8 sps:$4 sm:$0xff]   ;;  %v1350_v44 = vld [vmem:[%s1446_s7 + $0x74] ss:$8 sps:$4 sm:$0xff]  }
  0x1a   : > { %v1346_v41 = vld [vmem:[%s1446_s7 + $0xe4] ss:$8 sps:$4 sm:$0xff]   ;;  %v1349_v43 = vld [vmem:[%s1446_s7 + $0xe0] ss:$8 sps:$4 sm:$0xff]   ;;  %v1352_v45 = vld [vmem:[%s1446_s7 + $0xf4] ss:$8 sps:$4 sm:$0xff]  }
  0x1b   : > { %v1354_v46 = vld [vmem:[%s1446_s7 + $0x70] ss:$8 sps:$4 sm:$0xff]  }
  0x1c   : > { %1151 = vmatpush3.bf16.msra.mxu0 %v1303_v13  ;;  %1265 = vmatpush3.bf16.msra.mxu1 %v1303_v13  ;;  %v1355_v47 = vld [vmem:[%s1446_s7 + $0xf0] ss:$8 sps:$4 sm:$0xff]  }
  0x1d   : > { %1152 = vmatprep.subr.bf16.mxu0 %v1304_v14  ;;  %1258 = vmatprep.subr.bf16.mxu1 %v1304_v14 }
  0x20   : > { %1153 = vmatpush3.bf16.msra.mxu0 %v1305_v15  ;;  %1266 = vmatpush3.bf16.msra.mxu1 %v1305_v15 }
  0x21   : > { %1154 = vmatprep.subr.bf16.mxu0 %v1306_v16  ;;  %1259 = vmatprep.subr.bf16.mxu1 %v1306_v16 }
  0x24   : > { %1155 = vmatpush3.bf16.msra.mxu0 %v1307_v17  ;;  %1267 = vmatpush3.bf16.msra.mxu1 %v1307_v17 }
  0x27   : > { %541 = vmatmul.mubr.bf16.vlgmr.msra.gmra.mrb[0].mxu0 %v1308_v18  ;;  %605 = vmatmul.mubr.bf16.vlgmr.msra.gmra.mrb[0].mxu1 %v1311_v19 }
  0x28   : > { %548 = vmatprep.mubr.bf16.mxu0 %v1314_v20  ;;  %612 = vmatprep.mubr.bf16.mxu1 %v1316_v21 }
  0x2f   : > { %549 = vmatmul.mubr.bf16.gmra.mrb[4].mxu0 %v1318_v22  ;;  %613 = vmatmul.mubr.bf16.gmra.mrb[4].mxu1 %v1319_v23 }
  0x30   : > { %556 = vmatprep.mubr.bf16.mxu0 %v1320_v24  ;;  %620 = vmatprep.mubr.bf16.mxu1 %v1322_v25 }
  0x37   : > { %557 = vmatmul.mubr.bf16.gmra.mrb[8].mxu0 %v1324_v26  ;;  %621 = vmatmul.mubr.bf16.gmra.mrb[8].mxu1 %v1325_v27 }
  0x38   : > { %564 = vmatprep.mubr.bf16.mxu0 %v1326_v28  ;;  %628 = vmatprep.mubr.bf16.mxu1 %v1328_v29 }
  0x3f   : > { %565 = vmatmul.mubr.bf16.gmra.mrb[12].mxu0 %v1330_v30  ;;  %629 = vmatmul.mubr.bf16.gmra.mrb[12].mxu1 %v1331_v31 }
  0x40   : > { %572 = vmatprep.mubr.bf16.mxu0 %v1332_v32  ;;  %636 = vmatprep.mubr.bf16.mxu1 %v1334_v33 }
  0x47   : > { %573 = vmatmul.mubr.bf16.gmra.mrb[16].mxu0 %v1336_v34  ;;  %637 = vmatmul.mubr.bf16.gmra.mrb[16].mxu1 %v1337_v35 }
  0x48   : > { %580 = vmatprep.mubr.bf16.mxu0 %v1338_v36  ;;  %644 = vmatprep.mubr.bf16.mxu1 %v1340_v37 }
  0x4f   : > { %581 = vmatmul.mubr.bf16.gmra.mrb[20].mxu0 %v1342_v38  ;;  %645 = vmatmul.mubr.bf16.gmra.mrb[20].mxu1 %v1343_v39 }
  0x50   : > { %588 = vmatprep.mubr.bf16.mxu0 %v1344_v40  ;;  %652 = vmatprep.mubr.bf16.mxu1 %v1346_v41 }
  0x57   : > { %589 = vmatmul.mubr.bf16.gmra.mrb[24].mxu0 %v1348_v42  ;;  %653 = vmatmul.mubr.bf16.gmra.mrb[24].mxu1 %v1349_v43 }
  0x58   : > { %596 = vmatprep.mubr.bf16.mxu0 %v1350_v44  ;;  %660 = vmatprep.mubr.bf16.mxu1 %v1352_v45 }
  0x5f   : > { %597 = vmatmul.mubr.bf16.gmra.mrb[28].mxu0 %v1354_v46  ;;  %661 = vmatmul.mubr.bf16.gmra.mrb[28].mxu1 %v1355_v47 }
  0xfa   : > { %v1156_v48 = vpop.f32.mrb[0].mxu0  ;;  %v1204_v49 = vpop.f32.mrb[0].mxu1 }
  0xfb   : > { %v1157_v50 = vpop.f32.mrb[1].mxu0  ;;  %v1205_v51 = vpop.f32.mrb[1].mxu1 }
  0xfc   : > { %v1158_v52 = vadd.f32 %v1157_v50, %v1156_v48  ;;  %v1206_v53 = vadd.f32 %v1205_v51, %v1204_v49  ;;  %v1159_v54 = vpop.f32.mrb[2].mxu0  ;;  %v1207_v55 = vpop.f32.mrb[2].mxu1 }
  0xfd   : > { %v1160_v56 = vpop.f32.mrb[3].mxu0  ;;  %v1208_v57 = vpop.f32.mrb[3].mxu1 }
  0xfe   : > { %v1161_v58 = vadd.f32 %v1160_v56, %v1159_v54  ;;  %v1209_v59 = vadd.f32 %v1208_v57, %v1207_v55 }
 0x100   : > { %v1048_v60 = vpack.c.bf16 %v1161_v58, %v1158_v52  ;;  %v1088_v61 = vpack.c.bf16 %v1209_v59, %v1206_v53 }
 0x102   : > { %1049 = vst [vmem:[%s1505_s29] sm:$0xff] %v1048_v60   ;;  %1132 = vst [vmem:[%s1505_s29 + $0x40] sm:$0xff] %v1088_v61   ;;  %v1162_v62 = vpop.f32.mrb[4].mxu0  ;;  %v1210_v63 = vpop.f32.mrb[4].mxu1 }
 0x103   : > { %v1163_v0 = vpop.f32.mrb[5].mxu0  ;;  %v1211_v1 = vpop.f32.mrb[5].mxu1 }
 0x104   : > { %v1164_v2 = vadd.f32 %v1163_v0, %v1162_v62  ;;  %v1212_v3 = vadd.f32 %v1211_v1, %v1210_v63  ;;  %v1165_v4 = vpop.f32.mrb[6].mxu0  ;;  %v1213_v5 = vpop.f32.mrb[6].mxu1 }
 0x105   : > { %v1166_v6 = vpop.f32.mrb[7].mxu0  ;;  %v1214_v7 = vpop.f32.mrb[7].mxu1 }
 0x106   : > { %v1167_v8 = vadd.f32 %v1166_v6, %v1165_v4  ;;  %v1215_v9 = vadd.f32 %v1214_v7, %v1213_v5 }
 0x108   : > { %v1053_v10 = vpack.c.bf16 %v1167_v8, %v1164_v2  ;;  %v1093_v11 = vpack.c.bf16 %v1215_v9, %v1212_v3 }
 0x10a   : > { %1125 = vst [vmem:[%s1505_s29 + $0x8] sm:$0xff] %v1053_v10   ;;  %1133 = vst [vmem:[%s1505_s29 + $0x48] sm:$0xff] %v1093_v11   ;;  %v1168_v12 = vpop.f32.mrb[8].mxu0  ;;  %v1216_v13 = vpop.f32.mrb[8].mxu1 }
 0x10b   : > { %v1169_v14 = vpop.f32.mrb[9].mxu0  ;;  %v1217_v15 = vpop.f32.mrb[9].mxu1 }
 0x10c   : > { %v1170_v16 = vadd.f32 %v1169_v14, %v1168_v12  ;;  %v1218_v17 = vadd.f32 %v1217_v15, %v1216_v13  ;;  %v1171_v18 = vpop.f32.mrb[10].mxu0  ;;  %v1219_v19 = vpop.f32.mrb[10].mxu1 }
 0x10d   : > { %v1172_v20 = vpop.f32.mrb[11].mxu0  ;;  %v1220_v21 = vpop.f32.mrb[11].mxu1 }
 0x10e   : > { %v1173_v22 = vadd.f32 %v1172_v20, %v1171_v18  ;;  %v1221_v23 = vadd.f32 %v1220_v21, %v1219_v19 }
 0x110   : > { %v1058_v24 = vpack.c.bf16 %v1173_v22, %v1170_v16  ;;  %v1098_v25 = vpack.c.bf16 %v1221_v23, %v1218_v17 }
 0x112   : > { %1126 = vst [vmem:[%s1505_s29 + $0x10] sm:$0xff] %v1058_v24   ;;  %1134 = vst [vmem:[%s1505_s29 + $0x50] sm:$0xff] %v1098_v25   ;;  %v1174_v26 = vpop.f32.mrb[12].mxu0  ;;  %v1222_v27 = vpop.f32.mrb[12].mxu1 }
 0x113   : > { %v1175_v28 = vpop.f32.mrb[13].mxu0  ;;  %v1223_v29 = vpop.f32.mrb[13].mxu1 }
 0x114   : > { %v1176_v30 = vadd.f32 %v1175_v28, %v1174_v26  ;;  %v1224_v31 = vadd.f32 %v1223_v29, %v1222_v27  ;;  %v1177_v32 = vpop.f32.mrb[14].mxu0  ;;  %v1225_v33 = vpop.f32.mrb[14].mxu1 }
 0x115   : > { %v1178_v34 = vpop.f32.mrb[15].mxu0  ;;  %v1226_v35 = vpop.f32.mrb[15].mxu1 }
 0x116   : > { %v1179_v36 = vadd.f32 %v1178_v34, %v1177_v32  ;;  %v1227_v37 = vadd.f32 %v1226_v35, %v1225_v33 }
 0x118   : > { %v1063_v38 = vpack.c.bf16 %v1179_v36, %v1176_v30  ;;  %v1103_v39 = vpack.c.bf16 %v1227_v37, %v1224_v31 }
 0x11a   : > { %1127 = vst [vmem:[%s1505_s29 + $0x18] sm:$0xff] %v1063_v38   ;;  %1135 = vst [vmem:[%s1505_s29 + $0x58] sm:$0xff] %v1103_v39   ;;  %v1180_v40 = vpop.f32.mrb[16].mxu0  ;;  %v1228_v41 = vpop.f32.mrb[16].mxu1 }
 0x11b   : > { %v1181_v42 = vpop.f32.mrb[17].mxu0  ;;  %v1229_v43 = vpop.f32.mrb[17].mxu1 }
 0x11c   : > { %v1182_v44 = vadd.f32 %v1181_v42, %v1180_v40  ;;  %v1230_v45 = vadd.f32 %v1229_v43, %v1228_v41  ;;  %v1183_v46 = vpop.f32.mrb[18].mxu0  ;;  %v1231_v47 = vpop.f32.mrb[18].mxu1 }
 0x11d   : > { %v1184_v48 = vpop.f32.mrb[19].mxu0  ;;  %v1232_v49 = vpop.f32.mrb[19].mxu1 }
 0x11e   : > { %v1185_v50 = vadd.f32 %v1184_v48, %v1183_v46  ;;  %v1233_v51 = vadd.f32 %v1232_v49, %v1231_v47 }
 0x120   : > { %v1068_v52 = vpack.c.bf16 %v1185_v50, %v1182_v44  ;;  %v1108_v53 = vpack.c.bf16 %v1233_v51, %v1230_v45 }
 0x122   : > { %1128 = vst [vmem:[%s1505_s29 + $0x20] sm:$0xff] %v1068_v52   ;;  %1136 = vst [vmem:[%s1505_s29 + $0x60] sm:$0xff] %v1108_v53   ;;  %v1186_v54 = vpop.f32.mrb[20].mxu0  ;;  %v1234_v55 = vpop.f32.mrb[20].mxu1 }
 0x123   : > { %v1187_v56 = vpop.f32.mrb[21].mxu0  ;;  %v1235_v57 = vpop.f32.mrb[21].mxu1 }
 0x124   : > { %v1188_v58 = vadd.f32 %v1187_v56, %v1186_v54  ;;  %v1236_v59 = vadd.f32 %v1235_v57, %v1234_v55  ;;  %v1189_v60 = vpop.f32.mrb[22].mxu0  ;;  %v1237_v61 = vpop.f32.mrb[22].mxu1 }
 0x125   : > { %v1190_v62 = vpop.f32.mrb[23].mxu0  ;;  %v1238_v63 = vpop.f32.mrb[23].mxu1 }
 0x126   : > { %v1191_v0 = vadd.f32 %v1190_v62, %v1189_v60  ;;  %v1239_v1 = vadd.f32 %v1238_v63, %v1237_v61 }
 0x128   : > { %v1073_v2 = vpack.c.bf16 %v1191_v0, %v1188_v58  ;;  %v1113_v3 = vpack.c.bf16 %v1239_v1, %v1236_v59 }
 0x12a   : > { %1129 = vst [vmem:[%s1505_s29 + $0x28] sm:$0xff] %v1073_v2   ;;  %1137 = vst [vmem:[%s1505_s29 + $0x68] sm:$0xff] %v1113_v3   ;;  %v1192_v4 = vpop.f32.mrb[24].mxu0  ;;  %v1240_v5 = vpop.f32.mrb[24].mxu1 }
 0x12b   : > { %v1193_v6 = vpop.f32.mrb[25].mxu0  ;;  %v1241_v7 = vpop.f32.mrb[25].mxu1 }
 0x12c   : > { %v1194_v8 = vadd.f32 %v1193_v6, %v1192_v4  ;;  %v1242_v9 = vadd.f32 %v1241_v7, %v1240_v5  ;;  %v1195_v10 = vpop.f32.mrb[26].mxu0  ;;  %v1243_v11 = vpop.f32.mrb[26].mxu1 }
 0x12d   : > { %v1196_v12 = vpop.f32.mrb[27].mxu0  ;;  %v1244_v13 = vpop.f32.mrb[27].mxu1 }
 0x12e   : > { %v1197_v14 = vadd.f32 %v1196_v12, %v1195_v10  ;;  %v1245_v15 = vadd.f32 %v1244_v13, %v1243_v11 }
 0x130   : > { %v1078_v16 = vpack.c.bf16 %v1197_v14, %v1194_v8  ;;  %v1118_v17 = vpack.c.bf16 %v1245_v15, %v1242_v9 }
 0x132   : > { %1130 = vst [vmem:[%s1505_s29 + $0x30] sm:$0xff] %v1078_v16   ;;  %1138 = vst [vmem:[%s1505_s29 + $0x70] sm:$0xff] %v1118_v17   ;;  %v1198_v18 = vpop.f32.mrb[28].mxu0  ;;  %v1246_v19 = vpop.f32.mrb[28].mxu1 }
 0x133   : > { %v1199_v20 = vpop.f32.mrb[29].mxu0  ;;  %v1247_v21 = vpop.f32.mrb[29].mxu1 }
 0x134   : > { %v1200_v22 = vadd.f32 %v1199_v20, %v1198_v18  ;;  %v1248_v23 = vadd.f32 %v1247_v21, %v1246_v19  ;;  %v1201_v24 = vpop.f32.mrb[30].mxu0  ;;  %v1249_v25 = vpop.f32.mrb[30].mxu1 }
 0x135   : > { %v1202_v26 = vpop.f32.mrb[31].mxu0  ;;  %v1250_v27 = vpop.f32.mrb[31].mxu1 }
 0x136   : > { %v1203_v28 = vadd.f32 %v1202_v26, %v1201_v24  ;;  %v1251_v29 = vadd.f32 %v1250_v27, %v1249_v25 }
 0x138   : > { %v1083_v30 = vpack.c.bf16 %v1203_v28, %v1200_v22  ;;  %v1123_v31 = vpack.c.bf16 %v1251_v29, %v1248_v23 }
 0x13a   : > { %1131 = vst [vmem:[%s1505_s29 + $0x38] sm:$0xff] %v1083_v30   ;;  %1139 = vst [vmem:[%s1505_s29 + $0x78] sm:$0xff] %v1123_v31  }
 0x13b PF: > { %s12_s11 = sadd.s32 1, %s1378_s11   ;;  %s1535_s9 = smov %s1374_s10 }
 0x13c   : > { %p9_p5 = scmp.ge.s32.totalorder %s12_s11, 4   ;;  %s1536_s10 = smov %s1538_s12 }
 0x13e   :  { %11 = sbr.rel (!%p9_p5) target bundleno = 2 (0x2), region = 61 }

// kernel: _generator_forward.27
= control target key start
LH: loop header
LB: loop body
LE: loop exit
PB: predicated region body
PF: predicated region fallthrough
CT: control target
= control target key end

     0   :  { %s1100_s9 = smov 0   ;;  %s1102_s10 = smov 0   ;;  %s1260_s0 = inlined_call_operand.vmem [shape: bf16[128,512], index: 0, kind: input, shape index: {}]   ;;  %s1261_s1 = inlined_call_operand.vmem [shape: bf16[512,128], index: 1, kind: input, shape index: {}]   ;;  %s1262_s2 = inlined_call_operand.vmem [shape: bf16[128,128], index: 2, kind: output, shape index: {}]  }
   0x1   :  { %s1104_s11 = smov 0  }
   0x2 LB: > { %s24_s12 = sadd.s32 1, %s1079_s10  ;;  %p805_p0 = scmp.ge.s32.totalorder %s1083_s11, 1  ;;  %s1083_s11 = sphi %s1104_s11, %s12_s11   ;;  %s1079_s10 = sphi %s1102_s10, %s1264_s10   ;;  %s1075_s9 = sphi %s1100_s9, %s1263_s9  }
   0x3   : > { %p26_p1 = scmp.ge.s32.totalorder %s24_s12, 2  ;;  %p137_p2 = scmp.lt.s32.totalorder %s1083_s11, 3 }
   0x5   : > { %s1266_s12 = smov (%p26_p1, %s24_s12), 0  ;;  %p138_p3 = pnand %p805_p0, %p137_p2 }
   0x6   : > { %v1005_v0 = vld [vmem:[%s1261_s1 + $0x40] sm:$0xff] (!%p138_p3)   ;;  %v1009_v4 = vld [vmem:[%s1261_s1 + $0x48] sm:$0xff] (!%p138_p3)   ;;  %v1013_v8 = vld [vmem:[%s1261_s1 + $0x50] sm:$0xff] (!%p138_p3)   ;;  %s806_s21 = sshll.u32 (!%p138_p3), %s1075_s9, 3 }
   0x7   : > { %141 = sbr.rel (%p138_p3) target bundleno = 287 (0x11f), region = 28  ;;  %v1006_v1 = vld [vmem:[%s1261_s1 + $0xc0] sm:$0xff] (!%p138_p3)   ;;  %901 = vmatprep.subr.bf16.mxu0 (!%p138_p3), %v1005_v0  ;;  %v1010_v5 = vld [vmem:[%s1261_s1 + $0xc8] sm:$0xff] (!%p138_p3)   ;;  %v1014_v9 = vld [vmem:[%s1261_s1 + $0xd0] sm:$0xff] (!%p138_p3)   ;;  %p168_p4 = scmp.lt.s32.totalorder (!%p138_p3), %s806_s21, 15 }
   0x8   : > { %v1007_v2 = vld [vmem:[%s1261_s1] sm:$0xff] (!%p138_p3)   ;;  %941 = vmatprep.subr.bf16.mxu1 (!%p138_p3), %v1006_v1  ;;  %v1011_v6 = vld [vmem:[%s1261_s1 + $0x8] sm:$0xff] (!%p138_p3)   ;;  %v1015_v10 = vld [vmem:[%s1261_s1 + $0x10] sm:$0xff] (!%p138_p3)  }
   0x9   : > { %v1008_v3 = vld [vmem:[%s1261_s1 + $0x80] sm:$0xff] (!%p138_p3)   ;;  %902 = vmatpush3.bf16.msra.mxu0 (!%p138_p3), %v1007_v2  ;;  %v1012_v7 = vld [vmem:[%s1261_s1 + $0x88] sm:$0xff] (!%p138_p3)   ;;  %v1016_v11 = vld [vmem:[%s1261_s1 + $0x90] sm:$0xff] (!%p138_p3)  }
   0xa   : > { %942 = vmatpush3.bf16.msra.mxu1 (!%p138_p3), %v1008_v3  ;;  %903 = vmatprep.subr.bf16.mxu0 (!%p138_p3), %v1009_v4  ;;  %v1017_v12 = vld [vmem:[%s1261_s1 + $0x58] sm:$0xff] (!%p138_p3)   ;;  %v1021_v16 = vld [vmem:[%s1261_s1 + $0x60] sm:$0xff] (!%p138_p3)   ;;  %v1025_v20 = vld [vmem:[%s1261_s1 + $0x68] sm:$0xff] (!%p138_p3)  }
   0xb   : > { %943 = vmatprep.subr.bf16.mxu1 (!%p138_p3), %v1010_v5  ;;  %v1018_v13 = vld [vmem:[%s1261_s1 + $0xd8] sm:$0xff] (!%p138_p3)   ;;  %v1022_v17 = vld [vmem:[%s1261_s1 + $0xe0] sm:$0xff] (!%p138_p3)   ;;  %v1026_v21 = vld [vmem:[%s1261_s1 + $0xe8] sm:$0xff] (!%p138_p3)  }
   0xc   : > { %v1019_v14 = vld [vmem:[%s1261_s1 + $0x18] sm:$0xff] (!%p138_p3)   ;;  %v1023_v18 = vld [vmem:[%s1261_s1 + $0x20] sm:$0xff] (!%p138_p3)   ;;  %v1027_v22 = vld [vmem:[%s1261_s1 + $0x28] sm:$0xff] (!%p138_p3)  }
   0xd   : > { %904 = vmatpush3.bf16.msra.mxu0 (!%p138_p3), %v1011_v6  ;;  %v1020_v15 = vld [vmem:[%s1261_s1 + $0x98] sm:$0xff] (!%p138_p3)   ;;  %v1024_v19 = vld [vmem:[%s1261_s1 + $0xa0] sm:$0xff] (!%p138_p3)   ;;  %v1028_v23 = vld [vmem:[%s1261_s1 + $0xa8] sm:$0xff] (!%p138_p3)  }
   0xe   : > { %944 = vmatpush3.bf16.msra.mxu1 %v1012_v7  ;;  %905 = vmatprep.subr.bf16.mxu0 %v1013_v8  ;;  %s1268_s21 = smov (!%p168_p4, %s806_s21), 15  ;;  %v1029_v24 = vld [vmem:[%s1261_s1 + $0x70] sm:$0xff]   ;;  %v1033_v28 = vld [vmem:[%s1261_s1 + $0x78] sm:$0xff]  }
   0xf   : > { %945 = vmatprep.subr.bf16.mxu1 %v1014_v9  ;;  %v1030_v25 = vld [vmem:[%s1261_s1 + $0xf0] sm:$0xff]   ;;  %s869_s19 = sshll.u32 %s1268_s21, 4  ;;  %v1034_v29 = vld [vmem:[%s1261_s1 + $0xf8] sm:$0xff]   ;;  %s810_s5 = sshll.u32 %s1268_s21, 2 }
  0x10   : > { %v1031_v26 = vld [vmem:[%s1261_s1 + $0x30] sm:$0xff]   ;;  %s1217_s29 = scalar_lea.vmem %s1260_s0, %s869_s19  ;;  %v1035_v30 = vld [vmem:[%s1261_s1 + $0x38] sm:$0xff]   ;;  %s1245_s8 = scalar_lea.vmem %s1262_s2, %s810_s5 }
  0x11   : > { %906 = vmatpush3.bf16.msra.mxu0 %v1015_v10  ;;  %v1032_v27 = vld [vmem:[%s1261_s1 + $0xb0] sm:$0xff]   ;;  %v1036_v31 = vld [vmem:[%s1261_s1 + $0xb8] sm:$0xff]  }
  0x12   : > { %946 = vmatpush3.bf16.msra.mxu1 %v1016_v11  ;;  %907 = vmatprep.subr.bf16.mxu0 %v1017_v12  ;;  %v1037_v32 = vld [vmem:[%s1217_s29] ss:$16 sps:$4 sm:$0xff]   ;;  %v1039_v33 = vld [vmem:[%s1217_s29 + $0x4] ss:$16 sps:$4 sm:$0xff]   ;;  %v1040_v34 = vld [vmem:[%s1217_s29 + $0x8] ss:$16 sps:$4 sm:$0xff]  }
  0x13   : > { %947 = vmatprep.subr.bf16.mxu1 %v1018_v13  ;;  %v1042_v35 = vld [vmem:[%s1217_s29 + $0xc] ss:$16 sps:$4 sm:$0xff]   ;;  %572 = vmatprep.mubr.bf16.mxu0 %v1039_v33  ;;  %v1043_v36 = vld [vmem:[%s1217_s29 + $0x24] ss:$16 sps:$4 sm:$0xff]   ;;  %v1047_v38 = vld [vmem:[%s1217_s29 + $0x20] ss:$16 sps:$4 sm:$0xff]  }
  0x14   : > { %637 = vmatprep.mubr.bf16.mxu1 %v1042_v35  ;;  %v1045_v37 = vld [vmem:[%s1217_s29 + $0x2c] ss:$16 sps:$4 sm:$0xff]   ;;  %v1048_v39 = vld [vmem:[%s1217_s29 + $0x28] ss:$16 sps:$4 sm:$0xff]   ;;  %v1049_v40 = vld [vmem:[%s1217_s29 + $0x44] ss:$16 sps:$4 sm:$0xff]  }
  0x15   : > { %908 = vmatpush3.bf16.msra.mxu0 %v1019_v14  ;;  %v1051_v41 = vld [vmem:[%s1217_s29 + $0x4c] ss:$16 sps:$4 sm:$0xff]   ;;  %v1053_v42 = vld [vmem:[%s1217_s29 + $0x40] ss:$16 sps:$4 sm:$0xff]   ;;  %v1054_v43 = vld [vmem:[%s1217_s29 + $0x48] ss:$16 sps:$4 sm:$0xff]  }
  0x16   : > { %948 = vmatpush3.bf16.msra.mxu1 %v1020_v15  ;;  %909 = vmatprep.subr.bf16.mxu0 %v1021_v16  ;;  %v1055_v44 = vld [vmem:[%s1217_s29 + $0x64] ss:$16 sps:$4 sm:$0xff]   ;;  %v1057_v45 = vld [vmem:[%s1217_s29 + $0x6c] ss:$16 sps:$4 sm:$0xff]   ;;  %v1059_v46 = vld [vmem:[%s1217_s29 + $0x60] ss:$16 sps:$4 sm:$0xff]  }
  0x17   : > { %949 = vmatprep.subr.bf16.mxu1 %v1022_v17  ;;  %v1060_v47 = vld [vmem:[%s1217_s29 + $0x68] ss:$16 sps:$4 sm:$0xff]  }
  0x19   : > { %910 = vmatpush3.bf16.msra.mxu0 %v1023_v18 }
  0x1a   : > { %950 = vmatpush3.bf16.msra.mxu1 %v1024_v19  ;;  %911 = vmatprep.subr.bf16.mxu0 %v1025_v20 }
  0x1b   : > { %951 = vmatprep.subr.bf16.mxu1 %v1026_v21 }
  0x1d   : > { %912 = vmatpush3.bf16.msra.mxu0 %v1027_v22 }
  0x1e   : > { %952 = vmatpush3.bf16.msra.mxu1 %v1028_v23  ;;  %913 = vmatprep.subr.bf16.mxu0 %v1029_v24 }
  0x1f   : > { %953 = vmatprep.subr.bf16.mxu1 %v1030_v25 }
  0x21   : > { %914 = vmatpush3.bf16.msra.mxu0 %v1031_v26 }
  0x22   : > { %954 = vmatpush3.bf16.msra.mxu1 %v1032_v27  ;;  %915 = vmatprep.subr.bf16.mxu0 %v1033_v28 }
  0x23   : > { %955 = vmatprep.subr.bf16.mxu1 %v1034_v29 }
  0x25   : > { %916 = vmatpush3.bf16.msra.mxu0 %v1035_v30 }
  0x26   : > { %956 = vmatpush3.bf16.msra.mxu1 %v1036_v31 }
  0x28   : > { %573 = vmatmul.mubr.bf16.vlgmr.msra.gmra.mrb[0].mxu0 %v1037_v32 }
  0x29   : > { %638 = vmatmul.mubr.bf16.vlgmr.msra.gmra.mrb[0].mxu1 %v1040_v34  ;;  %580 = vmatprep.mubr.bf16.mxu0 %v1043_v36 }
  0x2a   : > { %645 = vmatprep.mubr.bf16.mxu1 %v1045_v37 }
  0x30   : > { %581 = vmatmul.mubr.bf16.gmra.mrb[4].mxu0 %v1047_v38 }
  0x31   : > { %646 = vmatmul.mubr.bf16.gmra.mrb[4].mxu1 %v1048_v39  ;;  %588 = vmatprep.mubr.bf16.mxu0 %v1049_v40 }
  0x32   : > { %653 = vmatprep.mubr.bf16.mxu1 %v1051_v41 }
  0x38   : > { %589 = vmatmul.mubr.bf16.gmra.mrb[8].mxu0 %v1053_v42 }
  0x39   : > { %654 = vmatmul.mubr.bf16.gmra.mrb[8].mxu1 %v1054_v43  ;;  %596 = vmatprep.mubr.bf16.mxu0 %v1055_v44 }
  0x3a   : > { %661 = vmatprep.mubr.bf16.mxu1 %v1057_v45 }
  0x40   : > { %597 = vmatmul.mubr.bf16.gmra.mrb[12].mxu0 %v1059_v46 }
  0x41   : > { %662 = vmatmul.mubr.bf16.gmra.mrb[12].mxu1 %v1060_v47 }
  0xfb   : > { %v917_v48 = vpop.f32.mrb[0].mxu0 }
  0xfc   : > { %v957_v49 = vpop.f32.mrb[0].mxu1  ;;  %v918_v50 = vpop.f32.mrb[1].mxu0 }
  0xfd   : > { %v919_v51 = vadd.f32 %v918_v50, %v917_v48  ;;  %v958_v52 = vpop.f32.mrb[1].mxu1  ;;  %v920_v53 = vpop.f32.mrb[2].mxu0 }
  0xfe   : > { %v959_v54 = vadd.f32 %v958_v52, %v957_v49  ;;  %v960_v55 = vpop.f32.mrb[2].mxu1  ;;  %v921_v56 = vpop.f32.mrb[3].mxu0 }
  0xff   : > { %v922_v57 = vadd.f32 %v921_v56, %v920_v53  ;;  %v961_v58 = vpop.f32.mrb[3].mxu1 }
 0x100   : > { %v640_v59 = vadd.f32 %v959_v54, %v919_v51  ;;  %v962_v60 = vadd.f32 %v961_v58, %v960_v55 }
 0x102   : > { %v643_v61 = vadd.f32 %v962_v60, %v922_v57 }
 0x103   : > { %v923_v62 = vpop.f32.mrb[4].mxu0 }
 0x104   : > { %v881_v63 = vpack.c.bf16 %v643_v61, %v640_v59  ;;  %v963_v0 = vpop.f32.mrb[4].mxu1  ;;  %v924_v1 = vpop.f32.mrb[5].mxu0 }
 0x105   : > { %v925_v2 = vadd.f32 %v924_v1, %v923_v62  ;;  %v964_v3 = vpop.f32.mrb[5].mxu1  ;;  %v926_v4 = vpop.f32.mrb[6].mxu0 }
 0x106   : > { %882 = vst [vmem:[%s1245_s8] sm:$0xff] %v881_v63   ;;  %v965_v5 = vadd.f32 %v964_v3, %v963_v0  ;;  %v966_v6 = vpop.f32.mrb[6].mxu1  ;;  %v927_v7 = vpop.f32.mrb[7].mxu0 }
 0x107   : > { %v928_v8 = vadd.f32 %v927_v7, %v926_v4  ;;  %v967_v9 = vpop.f32.mrb[7].mxu1 }
 0x108   : > { %v648_v10 = vadd.f32 %v965_v5, %v925_v2  ;;  %v968_v11 = vadd.f32 %v967_v9, %v966_v6 }
 0x10a   : > { %v651_v12 = vadd.f32 %v968_v11, %v928_v8 }
 0x10b   : > { %v929_v13 = vpop.f32.mrb[8].mxu0 }
 0x10c   : > { %v886_v14 = vpack.c.bf16 %v651_v12, %v648_v10  ;;  %v969_v15 = vpop.f32.mrb[8].mxu1  ;;  %v930_v16 = vpop.f32.mrb[9].mxu0 }
 0x10d   : > { %v931_v17 = vadd.f32 %v930_v16, %v929_v13  ;;  %v970_v18 = vpop.f32.mrb[9].mxu1  ;;  %v932_v19 = vpop.f32.mrb[10].mxu0 }
 0x10e   : > { %898 = vst [vmem:[%s1245_s8 + $0x8] sm:$0xff] %v886_v14   ;;  %v971_v20 = vadd.f32 %v970_v18, %v969_v15  ;;  %v972_v21 = vpop.f32.mrb[10].mxu1  ;;  %v933_v22 = vpop.f32.mrb[11].mxu0 }
 0x10f   : > { %v934_v23 = vadd.f32 %v933_v22, %v932_v19  ;;  %v973_v24 = vpop.f32.mrb[11].mxu1 }
 0x110   : > { %v656_v25 = vadd.f32 %v971_v20, %v931_v17  ;;  %v974_v26 = vadd.f32 %v973_v24, %v972_v21 }
 0x112   : > { %v659_v27 = vadd.f32 %v974_v26, %v934_v23 }
 0x113   : > { %v935_v28 = vpop.f32.mrb[12].mxu0 }
 0x114   : > { %v891_v29 = vpack.c.bf16 %v659_v27, %v656_v25  ;;  %v975_v30 = vpop.f32.mrb[12].mxu1  ;;  %v936_v31 = vpop.f32.mrb[13].mxu0 }
 0x115   : > { %v937_v32 = vadd.f32 %v936_v31, %v935_v28  ;;  %v976_v33 = vpop.f32.mrb[13].mxu1  ;;  %v938_v34 = vpop.f32.mrb[14].mxu0 }
 0x116   : > { %899 = vst [vmem:[%s1245_s8 + $0x10] sm:$0xff] %v891_v29   ;;  %v977_v35 = vadd.f32 %v976_v33, %v975_v30  ;;  %v978_v36 = vpop.f32.mrb[14].mxu1  ;;  %v939_v37 = vpop.f32.mrb[15].mxu0 }
 0x117   : > { %v940_v38 = vadd.f32 %v939_v37, %v938_v34  ;;  %v979_v39 = vpop.f32.mrb[15].mxu1 }
 0x118   : > { %v664_v40 = vadd.f32 %v977_v35, %v937_v32  ;;  %v980_v41 = vadd.f32 %v979_v39, %v978_v36 }
 0x11a   : > { %v667_v42 = vadd.f32 %v980_v41, %v940_v38 }
 0x11c   : > { %v896_v43 = vpack.c.bf16 %v667_v42, %v664_v40 }
 0x11e   : > { %900 = vst [vmem:[%s1245_s8 + $0x18] sm:$0xff] %v896_v43  }
 0x11f PF: > { %s12_s11 = sadd.s32 1, %s1083_s11   ;;  %s1263_s9 = smov %s1079_s10 }
 0x120   : > { %p9_p5 = scmp.ge.s32.totalorder %s12_s11, 4   ;;  %s1264_s10 = smov %s1266_s12 }
 0x122   :  { %11 = sbr.rel (!%p9_p5) target bundleno = 2 (0x2), region = 61 }

// kernel: _generator_forward.28
= control target key start
LH: loop header
LB: loop body
LE: loop exit
PB: predicated region body
PF: predicated region fallthrough
CT: control target
= control target key end

     0   :  { %s632_s12 = smov 0   ;;  %s634_s13 = smov 0   ;;  %s678_s0 = inlined_call_operand.vmem [shape: bf16[2,64,128], index: 0, kind: input, shape index: {}]   ;;  %s679_s1 = inlined_call_operand.vmem [shape: f32[1,1,128], index: 1, kind: input, shape index: {}]   ;;  %s680_s2 = inlined_call_operand.vmem [shape: f32[1,1,128], index: 2, kind: input, shape index: {}]   ;;  %s681_s3 = inlined_call_operand.vmem [shape: bf16[2,64,128], index: 3, kind: output, shape index: {}]  }
   0x1   :  { %s636_s14 = smov 0  }
   0x2 LB: > { %s25_s15 = sadd.s32 1, %s606_s13  ;;  %p493_p0 = scmp.ge.s32.totalorder %s610_s14, 1  ;;  %s610_s14 = sphi %s636_s14, %s13_s14   ;;  %s606_s13 = sphi %s634_s13, %s683_s13   ;;  %s602_s12 = sphi %s632_s12, %s682_s12  }
   0x3   : > { %p27_p1 = scmp.ge.s32.totalorder %s25_s15, 2  ;;  %p172_p2 = scmp.lt.s32.totalorder %s610_s14, 3 }
   0x5   : > { %s685_s15 = smov (%p27_p1, %s25_s15), 0  ;;  %p173_p3 = pnand %p493_p0, %p172_p2 }
   0x6   : > { %p208_p4 = scmp.lt.s32.totalorder (!%p173_p3), %s602_s12, 1  ;;  %v498_v58 = vld [vmem:[%s679_s1] ss:$0 sm:$0xff] (!%p173_p3) }
   0x7   : > { %176 = sbr.rel (%p173_p3) target bundleno = 105 (0x69), region = 32  ;;  %v499_v63 = vld [vmem:[%s680_s2] ss:$0 sm:$0xff] (!%p173_p3) }
   0xe   : > { %s687_s12 = smov (!%p208_p4, %s602_s12), 1 }
   0xf   : > { %s510_s16 = sshll.u32 %s687_s12, 5 }
  0x10   : > { %s215_s19 = scalar_lea.vmem %s678_s0, %s510_s16  ;;  %s229_s26 = scalar_lea.vmem %s681_s3, %s510_s16 }
  0x11   : > { %v521_v0 = vld [vmem:[%s215_s19] sm:$0xff]   ;;  %v556_v1 = vld [vmem:[%s215_s19 + $0x8] sm:$0xff]   ;;  %v557_v5 = vld [vmem:[%s215_s19 + $0x10] sm:$0xff]  }
  0x12   : > { %v522_v2 = vunpack.c.l.bf16 %v521_v0  ;;  %v523_v3 = vunpack.c.h.bf16 %v521_v0  ;;  %v526_v4 = vunpack.c.l.bf16 %v556_v1  ;;  %v527_v6 = vunpack.c.h.bf16 %v556_v1  ;;  %v558_v10 = vld [vmem:[%s215_s19 + $0x18] sm:$0xff]  }
  0x13   : > { %v530_v8 = vunpack.c.l.bf16 %v557_v5  ;;  %v531_v11 = vunpack.c.h.bf16 %v557_v5  ;;  %v534_v13 = vunpack.c.l.bf16 %v558_v10  ;;  %v535_v15 = vunpack.c.h.bf16 %v558_v10 }
  0x14   : > { %v246_v7 = vadd.f32 %v523_v3, %v522_v2 }
  0x16   : > { %v247_v9 = vadd.f32 %v526_v4, %v246_v7 }
  0x18   : > { %v248_v12 = vadd.f32 %v527_v6, %v247_v9 }
  0x1a   : > { %v249_v14 = vadd.f32 %v530_v8, %v248_v12 }
  0x1c   : > { %v250_v16 = vadd.f32 %v531_v11, %v249_v14 }
  0x1e   : > { %v251_v17 = vadd.f32 %v534_v13, %v250_v16 }
  0x20   : > { %v252_v18 = vadd.f32 %v535_v15, %v251_v17 }
  0x22   : > { %v253_v19 = vrot.slane %v252_v18, 4 }
  0x24   : > { %v254_v20 = vadd.f32 %v253_v19, %v252_v18 }
  0x26   : > { %v255_v21 = vrot.slane %v254_v20, 2 }
  0x28   : > { %v256_v22 = vadd.f32 %v255_v21, %v254_v20 }
  0x2a   : > { %v257_v23 = vrot.slane %v256_v22, 1 }
  0x2c   : > { %v258_v24 = vadd.f32 %v257_v23, %v256_v22 }
  0x2e   : > { %v260_v25 = vmul.f32 0.015625, %v258_v24 }
  0x30   : > { %v261_v26 = vsub.f32 %v522_v2, %v260_v25  ;;  %v262_v27 = vsub.f32 %v523_v3, %v260_v25  ;;  %v263_v28 = vsub.f32 %v526_v4, %v260_v25  ;;  %v264_v29 = vsub.f32 %v527_v6, %v260_v25 }
  0x31   : > { %v265_v30 = vsub.f32 %v530_v8, %v260_v25  ;;  %v266_v34 = vsub.f32 %v531_v11, %v260_v25  ;;  %v267_v37 = vsub.f32 %v534_v13, %v260_v25  ;;  %v268_v40 = vsub.f32 %v535_v15, %v260_v25 }
  0x32   : > { %v269_v31 = vmul.f32 %v261_v26, %v261_v26  ;;  %v270_v32 = vmul.f32 %v262_v27, %v262_v27  ;;  %v271_v33 = vmul.f32 %v263_v28, %v263_v28  ;;  %v272_v35 = vmul.f32 %v264_v29, %v264_v29 }
  0x33   : > { %v273_v38 = vmul.f32 %v265_v30, %v265_v30  ;;  %v274_v41 = vmul.f32 %v266_v34, %v266_v34  ;;  %v275_v43 = vmul.f32 %v267_v37, %v267_v37  ;;  %v276_v45 = vmul.f32 %v268_v40, %v268_v40 }
  0x34   : > { %v277_v36 = vadd.f32 %v270_v32, %v269_v31 }
  0x36   : > { %v278_v39 = vadd.f32 %v277_v36, %v271_v33 }
  0x38   : > { %v279_v42 = vadd.f32 %v278_v39, %v272_v35 }
  0x3a   : > { %v280_v44 = vadd.f32 %v279_v42, %v273_v38 }
  0x3c   : > { %v281_v46 = vadd.f32 %v280_v44, %v274_v41 }
  0x3e   : > { %v282_v47 = vadd.f32 %v281_v46, %v275_v43 }
  0x40   : > { %v283_v48 = vadd.f32 %v282_v47, %v276_v45 }
  0x42   : > { %v284_v49 = vrot.slane %v283_v48, 4 }
  0x44   : > { %v285_v50 = vadd.f32 %v284_v49, %v283_v48 }
  0x46   : > { %v286_v51 = vrot.slane %v285_v50, 2 }
  0x48   : > { %v287_v52 = vadd.f32 %v286_v51, %v285_v50 }
  0x4a   : > { %v288_v53 = vrot.slane %v287_v52, 1 }
  0x4c   : > { %v289_v54 = vadd.f32 %v288_v53, %v287_v52 }
  0x4e   : > { %v290_v55 = vmul.f32 0.015625, %v289_v54 }
  0x50   : > { %v291_v56 = vadd.f32 1e-05, %v290_v55 }
  0x52   : > { %586 = vrsqrt.f32 %v291_v56 }
  0x5c   : > { %v587_v57 = vpop.eup %586 }
  0x5d   : > { %v293_v59 = vmul.f32 %v587_v57, %v261_v26  ;;  %v294_v60 = vmul.f32 %v587_v57, %v262_v27  ;;  %v295_v61 = vmul.f32 %v587_v57, %v263_v28  ;;  %v296_v62 = vmul.f32 %v587_v57, %v264_v29 }
  0x5e   : > { %v297_v0 = vmul.f32 %v587_v57, %v265_v30  ;;  %v298_v1 = vmul.f32 %v587_v57, %v266_v34  ;;  %v299_v2 = vmul.f32 %v587_v57, %v267_v37  ;;  %v300_v3 = vmul.f32 %v587_v57, %v268_v40 }
  0x5f   : > { %v308_v4 = vmul.f32 %v498_v58, %v293_v59  ;;  %v309_v5 = vmul.f32 %v498_v58, %v294_v60  ;;  %v310_v6 = vmul.f32 %v498_v58, %v295_v61  ;;  %v311_v7 = vmul.f32 %v498_v58, %v296_v62 }
  0x60   : > { %v312_v8 = vmul.f32 %v498_v58, %v297_v0  ;;  %v313_v9 = vmul.f32 %v498_v58, %v298_v1  ;;  %v314_v10 = vmul.f32 %v498_v58, %v299_v2  ;;  %v315_v11 = vmul.f32 %v498_v58, %v300_v3 }
  0x61   : > { %v323_v12 = vadd.f32 %v499_v63, %v308_v4  ;;  %v324_v13 = vadd.f32 %v499_v63, %v309_v5  ;;  %v325_v14 = vadd.f32 %v499_v63, %v310_v6  ;;  %v326_v15 = vadd.f32 %v499_v63, %v311_v7 }
  0x62   : > { %v327_v16 = vadd.f32 %v499_v63, %v312_v8  ;;  %v328_v17 = vadd.f32 %v499_v63, %v313_v9  ;;  %v329_v18 = vadd.f32 %v499_v63, %v314_v10  ;;  %v330_v19 = vadd.f32 %v499_v63, %v315_v11 }
  0x63   : > { %v331_v20 = vmax.f32 %v323_v12, 0.0  ;;  %v332_v21 = vmax.f32 %v324_v13, 0.0  ;;  %v333_v22 = vmax.f32 %v325_v14, 0.0  ;;  %v334_v23 = vmax.f32 %v326_v15, 0.0 }
  0x64   : > { %v335_v24 = vmax.f32 %v327_v16, 0.0  ;;  %v336_v25 = vmax.f32 %v328_v17, 0.0  ;;  %v337_v26 = vmax.f32 %v329_v18, 0.0  ;;  %v338_v27 = vmax.f32 %v330_v19, 0.0 }
  0x65   : > { %v539_v28 = vpack.c.bf16 %v332_v21, %v331_v20  ;;  %v544_v29 = vpack.c.bf16 %v334_v23, %v333_v22 }
  0x66   : > { %v549_v30 = vpack.c.bf16 %v336_v25, %v335_v24  ;;  %v554_v31 = vpack.c.bf16 %v338_v27, %v337_v26 }
  0x67   : > { %540 = vst [vmem:[%s229_s26] sm:$0xff] %v539_v28   ;;  %559 = vst [vmem:[%s229_s26 + $0x8] sm:$0xff] %v544_v29  }
  0x68   : > { %560 = vst [vmem:[%s229_s26 + $0x10] sm:$0xff] %v549_v30   ;;  %561 = vst [vmem:[%s229_s26 + $0x18] sm:$0xff] %v554_v31  }
  0x69 PF: > { %s13_s14 = sadd.s32 1, %s610_s14   ;;  %s682_s12 = smov %s606_s13 }
  0x6a   : > { %p10_p5 = scmp.ge.s32.totalorder %s13_s14, 4   ;;  %s683_s13 = smov %s685_s15 }
  0x6c   :  { %12 = sbr.rel (!%p10_p5) target bundleno = 2 (0x2), region = 68 }

// kernel: _generator_forward.29
= control target key start
LH: loop header
LB: loop body
LE: loop exit
PB: predicated region body
PF: predicated region fallthrough
CT: control target
= control target key end

     0   :  { %s1322_s9 = smov 0   ;;  %s1324_s10 = smov 0   ;;  %s1564_s0 = inlined_call_operand.vmem [shape: bf16[32,1024], index: 0, kind: input, shape index: {}]   ;;  %s1565_s1 = inlined_call_operand.vmem [shape: bf16[1024,128], index: 1, kind: input, shape index: {}]   ;;  %s1566_s2 = inlined_call_operand.vmem [shape: bf16[32,128], index: 2, kind: output, shape index: {}]  }
   0x1   :  { %s1326_s11 = smov 0  }
   0x2 LB: > { %s24_s12 = sadd.s32 1, %s1301_s10  ;;  %p1017_p0 = scmp.ge.s32.totalorder %s1305_s11, 1  ;;  %s1305_s11 = sphi %s1326_s11, %s12_s11   ;;  %s1301_s10 = sphi %s1324_s10, %s1568_s10   ;;  %s1297_s9 = sphi %s1322_s9, %s1567_s9  }
   0x3   : > { %p26_p1 = scmp.ge.s32.totalorder %s24_s12, 2  ;;  %p137_p2 = scmp.lt.s32.totalorder %s1305_s11, 3 }
   0x5   : > { %s1570_s12 = smov (%p26_p1, %s24_s12), 0  ;;  %p138_p3 = pnand %p1017_p0, %p137_p2 }
   0x6   : > { %v1219_v0 = vld [vmem:[%s1565_s1 + $0x40] sm:$0xff] (!%p138_p3)   ;;  %v1223_v4 = vld [vmem:[%s1565_s1 + $0x48] sm:$0xff] (!%p138_p3)   ;;  %v1227_v8 = vld [vmem:[%s1565_s1 + $0x50] sm:$0xff] (!%p138_p3)   ;;  %s1018_s21 = sshll.u32 (!%p138_p3), %s1297_s9, 1 }
   0x7   : > { %141 = sbr.rel (%p138_p3) target bundleno = 296 (0x128), region = 28  ;;  %v1220_v1 = vld [vmem:[%s1565_s1 + $0xc0] sm:$0xff] (!%p138_p3)   ;;  %1107 = vmatprep.subr.bf16.mxu0 (!%p138_p3), %v1219_v0  ;;  %v1224_v5 = vld [vmem:[%s1565_s1 + $0xc8] sm:$0xff] (!%p138_p3)   ;;  %v1228_v9 = vld [vmem:[%s1565_s1 + $0xd0] sm:$0xff] (!%p138_p3)   ;;  %p168_p4 = scmp.lt.s32.totalorder (!%p138_p3), %s1018_s21, 3 }
   0x8   : > { %v1221_v2 = vld [vmem:[%s1565_s1] sm:$0xff] (!%p138_p3)   ;;  %1129 = vmatprep.subr.bf16.mxu1 (!%p138_p3), %v1220_v1  ;;  %v1225_v6 = vld [vmem:[%s1565_s1 + $0x8] sm:$0xff] (!%p138_p3)   ;;  %v1229_v10 = vld [vmem:[%s1565_s1 + $0x10] sm:$0xff] (!%p138_p3)  }
   0x9   : > { %v1222_v3 = vld [vmem:[%s1565_s1 + $0x80] sm:$0xff] (!%p138_p3)   ;;  %1108 = vmatpush3.bf16.msra.mxu0 (!%p138_p3), %v1221_v2  ;;  %v1226_v7 = vld [vmem:[%s1565_s1 + $0x88] sm:$0xff] (!%p138_p3)   ;;  %v1230_v11 = vld [vmem:[%s1565_s1 + $0x90] sm:$0xff] (!%p138_p3)  }
   0xa   : > { %1130 = vmatpush3.bf16.msra.mxu1 (!%p138_p3), %v1222_v3  ;;  %1109 = vmatprep.subr.bf16.mxu0 (!%p138_p3), %v1223_v4  ;;  %v1231_v12 = vld [vmem:[%s1565_s1 + $0x58] sm:$0xff] (!%p138_p3)   ;;  %v1235_v16 = vld [vmem:[%s1565_s1 + $0x60] sm:$0xff] (!%p138_p3)   ;;  %v1239_v20 = vld [vmem:[%s1565_s1 + $0x68] sm:$0xff] (!%p138_p3)  }
   0xb   : > { %1131 = vmatprep.subr.bf16.mxu1 (!%p138_p3), %v1224_v5  ;;  %v1232_v13 = vld [vmem:[%s1565_s1 + $0xd8] sm:$0xff] (!%p138_p3)   ;;  %v1236_v17 = vld [vmem:[%s1565_s1 + $0xe0] sm:$0xff] (!%p138_p3)   ;;  %v1240_v21 = vld [vmem:[%s1565_s1 + $0xe8] sm:$0xff] (!%p138_p3)  }
   0xc   : > { %v1233_v14 = vld [vmem:[%s1565_s1 + $0x18] sm:$0xff] (!%p138_p3)   ;;  %v1237_v18 = vld [vmem:[%s1565_s1 + $0x20] sm:$0xff] (!%p138_p3)   ;;  %v1241_v22 = vld [vmem:[%s1565_s1 + $0x28] sm:$0xff] (!%p138_p3)  }
   0xd   : > { %1110 = vmatpush3.bf16.msra.mxu0 (!%p138_p3), %v1225_v6  ;;  %v1234_v15 = vld [vmem:[%s1565_s1 + $0x98] sm:$0xff] (!%p138_p3)   ;;  %v1238_v19 = vld [vmem:[%s1565_s1 + $0xa0] sm:$0xff] (!%p138_p3)   ;;  %v1242_v23 = vld [vmem:[%s1565_s1 + $0xa8] sm:$0xff] (!%p138_p3)  }
   0xe   : > { %1132 = vmatpush3.bf16.msra.mxu1 %v1226_v7  ;;  %1111 = vmatprep.subr.bf16.mxu0 %v1227_v8  ;;  %s1572_s21 = smov (!%p168_p4, %s1018_s21), 3  ;;  %v1243_v24 = vld [vmem:[%s1565_s1 + $0x70] sm:$0xff]   ;;  %v1247_v28 = vld [vmem:[%s1565_s1 + $0x78] sm:$0xff]   ;;  %v1251_v40 = vld [vmem:[%s1565_s1 + $0x140] sm:$0xff]  }
   0xf   : > { %1133 = vmatprep.subr.bf16.mxu1 %v1228_v9  ;;  %v1244_v25 = vld [vmem:[%s1565_s1 + $0xf0] sm:$0xff]   ;;  %s1099_s19 = sshll.u32 %s1572_s21, 5  ;;  %v1248_v29 = vld [vmem:[%s1565_s1 + $0xf8] sm:$0xff]   ;;  %v1252_v41 = vld [vmem:[%s1565_s1 + $0x1c0] sm:$0xff]  }
  0x10   : > { %v1245_v26 = vld [vmem:[%s1565_s1 + $0x30] sm:$0xff]   ;;  %s1439_s29 = scalar_lea.vmem %s1564_s0, %s1099_s19  ;;  %v1249_v30 = vld [vmem:[%s1565_s1 + $0x38] sm:$0xff]   ;;  %v1253_v42 = vld [vmem:[%s1565_s1 + $0x100] sm:$0xff]  }
  0x11   : > { %1112 = vmatpush3.bf16.msra.mxu0 %v1229_v10  ;;  %v1246_v27 = vld [vmem:[%s1565_s1 + $0xb0] sm:$0xff]   ;;  %v1250_v31 = vld [vmem:[%s1565_s1 + $0xb8] sm:$0xff]   ;;  %v188_v32 = vld [vmem:[%s1439_s29] sm:$0xff] }
  0x12   : > { %1134 = vmatpush3.bf16.msra.mxu1 %v1230_v11  ;;  %1113 = vmatprep.subr.bf16.mxu0 %v1231_v12  ;;  %v192_v33 = vld [vmem:[%s1439_s29 + $0x20] sm:$0xff]  ;;  %v189_v34 = vld [vmem:[%s1439_s29 + $0x8] sm:$0xff]  ;;  %v1259_v48 = vld [vmem:[%s1565_s1 + $0x150] sm:$0xff]  }
  0x13   : > { %1135 = vmatprep.subr.bf16.mxu1 %v1232_v13  ;;  %v1023_v35 = vcombine.low %v188_v32, %v192_v33  ;;  %v1024_v36 = vcombine.high %v188_v32, %v192_v33  ;;  %v193_v37 = vld [vmem:[%s1439_s29 + $0x28] sm:$0xff]  ;;  %v1254_v43 = vld [vmem:[%s1565_s1 + $0x180] sm:$0xff]   ;;  %v1260_v49 = vld [vmem:[%s1565_s1 + $0x1d0] sm:$0xff]  }
  0x14   : > { %v1025_v38 = vcombine.low %v189_v34, %v193_v37  ;;  %v1026_v39 = vcombine.high %v189_v34, %v193_v37  ;;  %v1255_v44 = vld [vmem:[%s1565_s1 + $0x148] sm:$0xff]   ;;  %v1261_v50 = vld [vmem:[%s1565_s1 + $0x110] sm:$0xff]   ;;  %v1263_v52 = vld [vmem:[%s1565_s1 + $0x158] sm:$0xff]  }
  0x15   : > { %1114 = vmatpush3.bf16.msra.mxu0 %v1233_v14  ;;  %780 = vmatprep.mubr.bf16.mxu0 %v1024_v36  ;;  %v1256_v45 = vld [vmem:[%s1565_s1 + $0x1c8] sm:$0xff]   ;;  %v1262_v51 = vld [vmem:[%s1565_s1 + $0x190] sm:$0xff]   ;;  %v1264_v53 = vld [vmem:[%s1565_s1 + $0x1d8] sm:$0xff]  }
  0x16   : > { %1136 = vmatpush3.bf16.msra.mxu1 %v1234_v15  ;;  %1115 = vmatprep.subr.bf16.mxu0 %v1235_v16  ;;  %v1257_v46 = vld [vmem:[%s1565_s1 + $0x108] sm:$0xff]   ;;  %v1265_v54 = vld [vmem:[%s1565_s1 + $0x118] sm:$0xff]   ;;  %v1267_v56 = vld [vmem:[%s1565_s1 + $0x160] sm:$0xff]  }
  0x17   : > { %1137 = vmatprep.subr.bf16.mxu1 %v1236_v17  ;;  %821 = vmatprep.mubr.bf16.mxu1 %v1026_v39  ;;  %v1258_v47 = vld [vmem:[%s1565_s1 + $0x188] sm:$0xff]   ;;  %v1266_v55 = vld [vmem:[%s1565_s1 + $0x198] sm:$0xff]   ;;  %v1268_v57 = vld [vmem:[%s1565_s1 + $0x1e0] sm:$0xff]  }
  0x18   : > { %v1269_v58 = vld [vmem:[%s1565_s1 + $0x120] sm:$0xff]   ;;  %v1271_v60 = vld [vmem:[%s1565_s1 + $0x168] sm:$0xff]   ;;  %v1275_v0 = vld [vmem:[%s1565_s1 + $0x170] sm:$0xff]  }
  0x19   : > { %1116 = vmatpush3.bf16.msra.mxu0 %v1237_v18  ;;  %v1270_v59 = vld [vmem:[%s1565_s1 + $0x1a0] sm:$0xff]   ;;  %v1272_v61 = vld [vmem:[%s1565_s1 + $0x1e8] sm:$0xff]   ;;  %v1276_v1 = vld [vmem:[%s1565_s1 + $0x1f0] sm:$0xff]  }
  0x1a   : > { %1138 = vmatpush3.bf16.msra.mxu1 %v1238_v19  ;;  %1117 = vmatprep.subr.bf16.mxu0 %v1239_v20  ;;  %v1273_v62 = vld [vmem:[%s1565_s1 + $0x128] sm:$0xff]   ;;  %v1277_v2 = vld [vmem:[%s1565_s1 + $0x130] sm:$0xff]   ;;  %v1279_v4 = vld [vmem:[%s1565_s1 + $0x178] sm:$0xff]  }
  0x1b   : > { %1139 = vmatprep.subr.bf16.mxu1 %v1240_v21  ;;  %v1274_v63 = vld [vmem:[%s1565_s1 + $0x1a8] sm:$0xff]   ;;  %v1278_v3 = vld [vmem:[%s1565_s1 + $0x1b0] sm:$0xff]   ;;  %v1280_v5 = vld [vmem:[%s1565_s1 + $0x1f8] sm:$0xff]  }
  0x1c   : > { %v1281_v6 = vld [vmem:[%s1565_s1 + $0x138] sm:$0xff]   ;;  %v190_v8 = vld [vmem:[%s1439_s29 + $0x10] sm:$0xff] }
  0x1d   : > { %1118 = vmatpush3.bf16.msra.mxu0 %v1241_v22  ;;  %v1282_v7 = vld [vmem:[%s1565_s1 + $0x1b8] sm:$0xff]   ;;  %v194_v9 = vld [vmem:[%s1439_s29 + $0x30] sm:$0xff] }
  0x1e   : > { %1140 = vmatpush3.bf16.msra.mxu1 %v1242_v23  ;;  %1119 = vmatprep.subr.bf16.mxu0 %v1243_v24  ;;  %v1027_v10 = vcombine.low %v190_v8, %v194_v9  ;;  %v1028_v11 = vcombine.high %v190_v8, %v194_v9  ;;  %v191_v12 = vld [vmem:[%s1439_s29 + $0x18] sm:$0xff] }
  0x1f   : > { %1141 = vmatprep.subr.bf16.mxu1 %v1244_v25  ;;  %v195_v13 = vld [vmem:[%s1439_s29 + $0x38] sm:$0xff]  ;;  %s1022_s29 = sshll.u32 %s1572_s21, 2 }
  0x20   : > { %v1029_v14 = vcombine.low %v191_v12, %v195_v13  ;;  %v1030_v15 = vcombine.high %v191_v12, %v195_v13  ;;  %s185_s30 = scalar_lea.vmem %s1566_s2, %s1022_s29 }
  0x21   : > { %1120 = vmatpush3.bf16.msra.mxu0 %v1245_v26 }
  0x22   : > { %1142 = vmatpush3.bf16.msra.mxu1 %v1246_v27  ;;  %1121 = vmatprep.subr.bf16.mxu0 %v1247_v28 }
  0x23   : > { %1143 = vmatprep.subr.bf16.mxu1 %v1248_v29 }
  0x25   : > { %1122 = vmatpush3.bf16.msra.mxu0 %v1249_v30 }
  0x26   : > { %1144 = vmatpush3.bf16.msra.mxu1 %v1250_v31  ;;  %1151 = vmatprep.subr.bf16.mxu0 %v1251_v40 }
  0x27   : > { %1173 = vmatprep.subr.bf16.mxu1 %v1252_v41 }
  0x28   : > { %781 = vmatmul.mubr.bf16.vlgmr.msra.gmra.mrb[0].mxu0 %v1023_v35 }
  0x29   : > { %822 = vmatmul.mubr.bf16.vlgmr.msra.gmra.mrb[0].mxu1 %v1025_v38  ;;  %1152 = vmatpush3.bf16.msra.mxu0 %v1253_v42 }
  0x2a   : > { %1174 = vmatpush3.bf16.msra.mxu1 %v1254_v43  ;;  %1153 = vmatprep.subr.bf16.mxu0 %v1255_v44 }
  0x2b   : > { %1175 = vmatprep.subr.bf16.mxu1 %v1256_v45  ;;  %862 = vmatprep.mubr.bf16.mxu0 %v1028_v11 }
  0x2c   : > { %903 = vmatprep.mubr.bf16.mxu1 %v1030_v15 }
  0x2d   : > { %1154 = vmatpush3.bf16.msra.mxu0 %v1257_v46 }
  0x2e   : > { %1176 = vmatpush3.bf16.msra.mxu1 %v1258_v47  ;;  %1155 = vmatprep.subr.bf16.mxu0 %v1259_v48 }
  0x2f   : > { %1177 = vmatprep.subr.bf16.mxu1 %v1260_v49 }
  0x31   : > { %1156 = vmatpush3.bf16.msra.mxu0 %v1261_v50 }
  0x32   : > { %1178 = vmatpush3.bf16.msra.mxu1 %v1262_v51  ;;  %1157 = vmatprep.subr.bf16.mxu0 %v1263_v52 }
  0x33   : > { %1179 = vmatprep.subr.bf16.mxu1 %v1264_v53 }
  0x35   : > { %1158 = vmatpush3.bf16.msra.mxu0 %v1265_v54 }
  0x36   : > { %1180 = vmatpush3.bf16.msra.mxu1 %v1266_v55  ;;  %1159 = vmatprep.subr.bf16.mxu0 %v1267_v56 }
  0x37   : > { %1181 = vmatprep.subr.bf16.mxu1 %v1268_v57 }
  0x39   : > { %1160 = vmatpush3.bf16.msra.mxu0 %v1269_v58 }
  0x3a   : > { %1182 = vmatpush3.bf16.msra.mxu1 %v1270_v59  ;;  %1161 = vmatprep.subr.bf16.mxu0 %v1271_v60 }
  0x3b   : > { %1183 = vmatprep.subr.bf16.mxu1 %v1272_v61 }
  0x3d   : > { %1162 = vmatpush3.bf16.msra.mxu0 %v1273_v62 }
  0x3e   : > { %1184 = vmatpush3.bf16.msra.mxu1 %v1274_v63  ;;  %1163 = vmatprep.subr.bf16.mxu0 %v1275_v0 }
  0x3f   : > { %1185 = vmatprep.subr.bf16.mxu1 %v1276_v1 }
  0x41   : > { %1164 = vmatpush3.bf16.msra.mxu0 %v1277_v2 }
  0x42   : > { %1186 = vmatpush3.bf16.msra.mxu1 %v1278_v3  ;;  %1165 = vmatprep.subr.bf16.mxu0 %v1279_v4 }
  0x43   : > { %1187 = vmatprep.subr.bf16.mxu1 %v1280_v5 }
  0x45   : > { %1166 = vmatpush3.bf16.msra.mxu0 %v1281_v6 }
  0x46   : > { %1188 = vmatpush3.bf16.msra.mxu1 %v1282_v7 }
  0x48   : > { %863 = vmatmul.mubr.bf16.vlgmr.msra.gmra.mrb[4].mxu0 %v1027_v10 }
  0x49   : > { %904 = vmatmul.mubr.bf16.vlgmr.msra.gmra.mrb[4].mxu1 %v1029_v14 }
  0xfb   : > { %v1123_v16 = vpop.f32.mrb[0].mxu0 }
  0xfc   : > { %v1145_v17 = vpop.f32.mrb[0].mxu1  ;;  %v1124_v18 = vpop.f32.mrb[1].mxu0 }
  0xfd   : > { %v1125_v19 = vadd.f32 %v1124_v18, %v1123_v16  ;;  %v1146_v20 = vpop.f32.mrb[1].mxu1  ;;  %v1126_v21 = vpop.f32.mrb[2].mxu0 }
  0xfe   : > { %v1147_v22 = vadd.f32 %v1146_v20, %v1145_v17  ;;  %v1148_v23 = vpop.f32.mrb[2].mxu1  ;;  %v1127_v24 = vpop.f32.mrb[3].mxu0 }
  0xff   : > { %v1128_v25 = vadd.f32 %v1127_v24, %v1126_v21  ;;  %v1149_v26 = vpop.f32.mrb[3].mxu1 }
 0x100   : > { %v824_v27 = vadd.f32 %v1147_v22, %v1125_v19  ;;  %v1150_v28 = vadd.f32 %v1149_v26, %v1148_v23 }
 0x102   : > { %v827_v29 = vadd.f32 %v1150_v28, %v1128_v25 }
 0x11b   : > { %v1167_v30 = vpop.f32.mrb[4].mxu0 }
 0x11c   : > { %v1189_v31 = vpop.f32.mrb[4].mxu1  ;;  %v1168_v32 = vpop.f32.mrb[5].mxu0 }
 0x11d   : > { %v1169_v33 = vadd.f32 %v1168_v32, %v1167_v30  ;;  %v1190_v34 = vpop.f32.mrb[5].mxu1  ;;  %v1170_v35 = vpop.f32.mrb[6].mxu0 }
 0x11e   : > { %v1191_v36 = vadd.f32 %v1190_v34, %v1189_v31  ;;  %v1192_v37 = vpop.f32.mrb[6].mxu1  ;;  %v1171_v38 = vpop.f32.mrb[7].mxu0 }
 0x11f   : > { %v865_v39 = vadd.f32 %v1169_v33, %v824_v27  ;;  %v1172_v40 = vadd.f32 %v1171_v38, %v1170_v35  ;;  %v1193_v41 = vpop.f32.mrb[7].mxu1 }
 0x120   : > { %v1194_v42 = vadd.f32 %v1193_v41, %v1192_v37 }
 0x121   : > { %v906_v43 = vadd.f32 %v1191_v36, %v865_v39  ;;  %v868_v44 = vadd.f32 %v1172_v40, %v827_v29 }
 0x123   : > { %v909_v45 = vadd.f32 %v1194_v42, %v868_v44 }
 0x125   : > { %v1105_v46 = vpack.c.bf16 %v909_v45, %v906_v43 }
 0x127   : > { %1106 = vst [vmem:[%s185_s30] sm:$0xff] %v1105_v46  }
 0x128 PF: > { %s12_s11 = sadd.s32 1, %s1305_s11   ;;  %s1567_s9 = smov %s1301_s10 }
 0x129   : > { %p9_p5 = scmp.ge.s32.totalorder %s12_s11, 4   ;;  %s1568_s10 = smov %s1570_s12 }
 0x12b   :  { %11 = sbr.rel (!%p9_p5) target bundleno = 2 (0x2), region = 61 }

// kernel: _generator_forward.30
= control target key start
LH: loop header
LB: loop body
LE: loop exit
PB: predicated region body
PF: predicated region fallthrough
CT: control target
= control target key end

     0   :  { %s497_s12 = smov 0   ;;  %s499_s13 = smov 0   ;;  %s543_s0 = inlined_call_operand.vmem [shape: bf16[2,16,128], index: 0, kind: input, shape index: {}]   ;;  %s544_s1 = inlined_call_operand.vmem [shape: f32[1,1,128], index: 1, kind: input, shape index: {}]   ;;  %s545_s2 = inlined_call_operand.vmem [shape: f32[1,1,128], index: 2, kind: input, shape index: {}]   ;;  %s546_s3 = inlined_call_operand.vmem [shape: bf16[2,16,128], index: 3, kind: output, shape index: {}]  }
   0x1   :  { %s501_s14 = smov 0  }
   0x2 LB: > { %s25_s15 = sadd.s32 1, %s471_s13  ;;  %p403_p0 = scmp.ge.s32.totalorder %s475_s14, 1  ;;  %s475_s14 = sphi %s501_s14, %s13_s14   ;;  %s471_s13 = sphi %s499_s13, %s548_s13   ;;  %s467_s12 = sphi %s497_s12, %s547_s12  }
   0x3   : > { %p27_p1 = scmp.ge.s32.totalorder %s25_s15, 2  ;;  %p172_p2 = scmp.lt.s32.totalorder %s475_s14, 3 }
   0x5   : > { %s550_s15 = smov (%p27_p1, %s25_s15), 0  ;;  %p173_p3 = pnand %p403_p0, %p172_p2 }
   0x6   : > { %p208_p4 = scmp.lt.s32.totalorder (!%p173_p3), %s467_s12, 1  ;;  %v408_v25 = vld [vmem:[%s544_s1] ss:$0 sm:$0xff] (!%p173_p3) }
   0x7   : > { %176 = sbr.rel (%p173_p3) target bundleno = 80 (0x50), region = 32  ;;  %v409_v28 = vld [vmem:[%s545_s2] ss:$0 sm:$0xff] (!%p173_p3) }
   0xe   : > { %s552_s12 = smov (!%p208_p4, %s467_s12), 1 }
   0xf   : > { %s414_s16 = sshll.u32 %s552_s12, 3 }
  0x10   : > { %s215_s19 = scalar_lea.vmem %s543_s0, %s414_s16  ;;  %s229_s26 = scalar_lea.vmem %s546_s3, %s414_s16 }
  0x11   : > { %v419_v0 = vld [vmem:[%s215_s19] sm:$0xff]  }
  0x12   : > { %v420_v1 = vunpack.c.l.bf16 %v419_v0  ;;  %v421_v2 = vunpack.c.h.bf16 %v419_v0 }
  0x14   : > { %v234_v3 = vadd.f32 %v421_v2, %v420_v1 }
  0x16   : > { %v235_v4 = vrot.slane %v234_v3, 4 }
  0x18   : > { %v236_v5 = vadd.f32 %v235_v4, %v234_v3 }
  0x1a   : > { %v237_v6 = vrot.slane %v236_v5, 2 }
  0x1c   : > { %v238_v7 = vadd.f32 %v237_v6, %v236_v5 }
  0x1e   : > { %v239_v8 = vrot.slane %v238_v7, 1 }
  0x20   : > { %v240_v9 = vadd.f32 %v239_v8, %v238_v7 }
  0x22   : > { %v242_v10 = vmul.f32 0.0625, %v240_v9 }
  0x24   : > { %v243_v11 = vsub.f32 %v420_v1, %v242_v10  ;;  %v244_v12 = vsub.f32 %v421_v2, %v242_v10 }
  0x26   : > { %v245_v13 = vmul.f32 %v243_v11, %v243_v11  ;;  %v246_v14 = vmul.f32 %v244_v12, %v244_v12 }
  0x28   : > { %v247_v15 = vadd.f32 %v246_v14, %v245_v13 }
  0x2a   : > { %v248_v16 = vrot.slane %v247_v15, 4 }
  0x2c   : > { %v249_v17 = vadd.f32 %v248_v16, %v247_v15 }
  0x2e   : > { %v250_v18 = vrot.slane %v249_v17, 2 }
  0x30   : > { %v251_v19 = vadd.f32 %v250_v18, %v249_v17 }
  0x32   : > { %v252_v20 = vrot.slane %v251_v19, 1 }
  0x34   : > { %v253_v21 = vadd.f32 %v252_v20, %v251_v19 }
  0x36   : > { %v254_v22 = vmul.f32 0.0625, %v253_v21 }
  0x38   : > { %v255_v23 = vadd.f32 1e-05, %v254_v22 }
  0x3a   : > { %451 = vrsqrt.f32 %v255_v23 }
  0x44   : > { %v452_v24 = vpop.eup %451 }
  0x45   : > { %v257_v26 = vmul.f32 %v452_v24, %v243_v11  ;;  %v258_v27 = vmul.f32 %v452_v24, %v244_v12 }
  0x47   : > { %v266_v29 = vmul.f32 %v408_v25, %v257_v26  ;;  %v267_v30 = vmul.f32 %v408_v25, %v258_v27 }
  0x49   : > { %v275_v31 = vadd.f32 %v409_v28, %v266_v29  ;;  %v276_v32 = vadd.f32 %v409_v28, %v267_v30 }
  0x4b   : > { %v277_v33 = vmax.f32 %v275_v31, 0.0  ;;  %v278_v34 = vmax.f32 %v276_v32, 0.0 }
  0x4d   : > { %v425_v35 = vpack.c.bf16 %v278_v34, %v277_v33 }
  0x4f   : > { %426 = vst [vmem:[%s229_s26] sm:$0xff] %v425_v35  }
  0x50 PF: > { %s13_s14 = sadd.s32 1, %s475_s14   ;;  %s547_s12 = smov %s471_s13 }
  0x51   : > { %p10_p5 = scmp.ge.s32.totalorder %s13_s14, 4   ;;  %s548_s13 = smov %s550_s15 }
  0x53   :  { %12 = sbr.rel (!%p10_p5) target bundleno = 2 (0x2), region = 68 }

// kernel: _generator_forward.31
= control target key start
LH: loop header
LB: loop body
LE: loop exit
PB: predicated region body
PF: predicated region fallthrough
CT: control target
= control target key end

     0   :  { %s1017_s9 = smov 0   ;;  %s1019_s10 = smov 0   ;;  %s1184_s0 = inlined_call_operand.vmem [shape: bf16[32,640], index: 0, kind: input, shape index: {}]   ;;  %s1185_s1 = inlined_call_operand.vmem [shape: bf16[640,128], index: 1, kind: input, shape index: {}]   ;;  %s1186_s2 = inlined_call_operand.vmem [shape: bf16[32,128], index: 2, kind: output, shape index: {}]  }
   0x1   :  { %s1021_s11 = smov 0  }
   0x2 LB: > { %s24_s12 = sadd.s32 1, %s994_s10  ;;  %p768_p0 = scmp.ge.s32.totalorder %s998_s11, 1  ;;  %s998_s11 = sphi %s1021_s11, %s12_s11   ;;  %s994_s10 = sphi %s1019_s10, %s1188_s10   ;;  %s990_s9 = sphi %s1017_s9, %s1187_s9  }
   0x3   : > { %p26_p1 = scmp.ge.s32.totalorder %s24_s12, 2  ;;  %p137_p2 = scmp.lt.s32.totalorder %s998_s11, 3 }
   0x5   : > { %s1190_s12 = smov (%p26_p1, %s24_s12), 0  ;;  %p138_p3 = pnand %p768_p0, %p137_p2 }
   0x6   : > { %v929_v0 = vld [vmem:[%s1185_s1 + $0x40] sm:$0xff] (!%p138_p3)   ;;  %v933_v4 = vld [vmem:[%s1185_s1 + $0x48] sm:$0xff] (!%p138_p3)   ;;  %v937_v8 = vld [vmem:[%s1185_s1 + $0x50] sm:$0xff] (!%p138_p3)   ;;  %s769_s19 = sshll.u32 (!%p138_p3), %s990_s9, 1  ;;  %v1000_v34 = vmov (!%p138_p3), 0.0   ;;  %vm1001_vm0 = vmmov (!%p138_p3), 0  }
   0x7   : > { %141 = sbr.rel (%p138_p3) target bundleno = 291 (0x123), region = 28  ;;  %v930_v1 = vld [vmem:[%s1185_s1 + $0xc0] sm:$0xff] (!%p138_p3)   ;;  %829 = vmatprep.subr.bf16.mxu0 (!%p138_p3), %v929_v0  ;;  %v934_v5 = vld [vmem:[%s1185_s1 + $0xc8] sm:$0xff] (!%p138_p3)   ;;  %v938_v9 = vld [vmem:[%s1185_s1 + $0xd0] sm:$0xff] (!%p138_p3)   ;;  %p168_p4 = scmp.lt.s32.totalorder (!%p138_p3), %s769_s19, 3 }
   0x8   : > { %v931_v2 = vld [vmem:[%s1185_s1] sm:$0xff] (!%p138_p3)   ;;  %851 = vmatprep.subr.bf16.mxu1 (!%p138_p3), %v930_v1  ;;  %v935_v6 = vld [vmem:[%s1185_s1 + $0x8] sm:$0xff] (!%p138_p3)   ;;  %v939_v10 = vld [vmem:[%s1185_s1 + $0x10] sm:$0xff] (!%p138_p3)  }
   0x9   : > { %v932_v3 = vld [vmem:[%s1185_s1 + $0x80] sm:$0xff] (!%p138_p3)   ;;  %830 = vmatpush3.bf16.msra.mxu0 (!%p138_p3), %v931_v2  ;;  %v936_v7 = vld [vmem:[%s1185_s1 + $0x88] sm:$0xff] (!%p138_p3)   ;;  %v940_v11 = vld [vmem:[%s1185_s1 + $0x90] sm:$0xff] (!%p138_p3)  }
   0xa   : > { %852 = vmatpush3.bf16.msra.mxu1 (!%p138_p3), %v932_v3  ;;  %831 = vmatprep.subr.bf16.mxu0 (!%p138_p3), %v933_v4  ;;  %v941_v12 = vld [vmem:[%s1185_s1 + $0x58] sm:$0xff] (!%p138_p3)   ;;  %v945_v16 = vld [vmem:[%s1185_s1 + $0x60] sm:$0xff] (!%p138_p3)   ;;  %v949_v20 = vld [vmem:[%s1185_s1 + $0x68] sm:$0xff] (!%p138_p3)  }
   0xb   : > { %853 = vmatprep.subr.bf16.mxu1 (!%p138_p3), %v934_v5  ;;  %v942_v13 = vld [vmem:[%s1185_s1 + $0xd8] sm:$0xff] (!%p138_p3)   ;;  %v946_v17 = vld [vmem:[%s1185_s1 + $0xe0] sm:$0xff] (!%p138_p3)   ;;  %v950_v21 = vld [vmem:[%s1185_s1 + $0xe8] sm:$0xff] (!%p138_p3)  }
   0xc   : > { %v943_v14 = vld [vmem:[%s1185_s1 + $0x18] sm:$0xff] (!%p138_p3)   ;;  %v947_v18 = vld [vmem:[%s1185_s1 + $0x20] sm:$0xff] (!%p138_p3)   ;;  %v951_v22 = vld [vmem:[%s1185_s1 + $0x28] sm:$0xff] (!%p138_p3)  }
   0xd   : > { %832 = vmatpush3.bf16.msra.mxu0 (!%p138_p3), %v935_v6  ;;  %v944_v15 = vld [vmem:[%s1185_s1 + $0x98] sm:$0xff] (!%p138_p3)   ;;  %v948_v19 = vld [vmem:[%s1185_s1 + $0xa0] sm:$0xff] (!%p138_p3)   ;;  %v952_v23 = vld [vmem:[%s1185_s1 + $0xa8] sm:$0xff] (!%p138_p3)  }
   0xe   : > { %854 = vmatpush3.bf16.msra.mxu1 %v936_v7  ;;  %833 = vmatprep.subr.bf16.mxu0 %v937_v8  ;;  %s1192_s19 = smov (!%p168_p4, %s769_s19), 3  ;;  %v953_v24 = vld [vmem:[%s1185_s1 + $0x70] sm:$0xff]   ;;  %v957_v28 = vld [vmem:[%s1185_s1 + $0x78] sm:$0xff]   ;;  %v967_v37 = vld [vmem:[%s1185_s1 + $0x100] sm:$0xff]  }
   0xf   : > { %855 = vmatprep.subr.bf16.mxu1 %v938_v9  ;;  %v954_v25 = vld [vmem:[%s1185_s1 + $0xf0] sm:$0xff]   ;;  %s902_s17 = smul.u32 20, %s1192_s19  ;;  %v958_v29 = vld [vmem:[%s1185_s1 + $0xf8] sm:$0xff]   ;;  %v968_v38 = vld [vmem:[%s1185_s1 + $0x108] sm:$0xff]   ;;  %s772_s26 = sshll.u32 %s1192_s19, 2 }
  0x10   : > { %v955_v26 = vld [vmem:[%s1185_s1 + $0x30] sm:$0xff]   ;;  %v959_v30 = vld [vmem:[%s1185_s1 + $0x38] sm:$0xff]   ;;  %v971_v41 = vld [vmem:[%s1185_s1 + $0x120] sm:$0xff]  }
  0x11   : > { %834 = vmatpush3.bf16.msra.mxu0 %v939_v10  ;;  %v956_v27 = vld [vmem:[%s1185_s1 + $0xb0] sm:$0xff]   ;;  %s1134_s28 = scalar_lea.vmem %s1184_s0, %s902_s17  ;;  %v960_v31 = vld [vmem:[%s1185_s1 + $0xb8] sm:$0xff]   ;;  %v972_v42 = vld [vmem:[%s1185_s1 + $0x128] sm:$0xff]  }
  0x12   : > { %856 = vmatpush3.bf16.msra.mxu1 %v940_v11  ;;  %835 = vmatprep.subr.bf16.mxu0 %v941_v12  ;;  %v961_v32 = vld [vmem:[%s1134_s28] ss:$20 sps:$4 sm:$0xff]   ;;  %v963_v33 = vld [vmem:[%s1134_s28 + $0x4] ss:$20 sps:$4 sm:$0xff]   ;;  %v964_v35 = vld [vmem:[%s1134_s28 + $0x8] ss:$20 sps:$4 sm:$0xff]  }
  0x13   : > { %857 = vmatprep.subr.bf16.mxu1 %v942_v13  ;;  %v966_v36 = vld [vmem:[%s1134_s28 + $0xc] ss:$20 sps:$4 sm:$0xff]   ;;  %572 = vmatprep.mubr.bf16.mxu0 %v963_v33  ;;  %v969_v39 = vld [vmem:[%s1185_s1 + $0x110] sm:$0xff]   ;;  %v970_v40 = vld [vmem:[%s1185_s1 + $0x118] sm:$0xff]  }
  0x14   : > { %613 = vmatprep.mubr.bf16.mxu1 %v966_v36  ;;  %v973_v43 = vld [vmem:[%s1185_s1 + $0x130] sm:$0xff]   ;;  %v974_v44 = vld [vmem:[%s1185_s1 + $0x138] sm:$0xff]  }
  0x15   : > { %836 = vmatpush3.bf16.msra.mxu0 %v943_v14  ;;  %v975_v45 = vld [vmem:[%s1134_s28 + $0x10] ss:$20 sps:$4 sm:$0xff]   ;;  %s185_s28 = scalar_lea.vmem %s1186_s2, %s772_s26 }
  0x16   : > { %858 = vmatpush3.bf16.msra.mxu1 %v944_v15  ;;  %837 = vmatprep.subr.bf16.mxu0 %v945_v16 }
  0x17   : > { %859 = vmatprep.subr.bf16.mxu1 %v946_v17 }
  0x19   : > { %838 = vmatpush3.bf16.msra.mxu0 %v947_v18 }
  0x1a   : > { %860 = vmatpush3.bf16.msra.mxu1 %v948_v19  ;;  %839 = vmatprep.subr.bf16.mxu0 %v949_v20 }
  0x1b   : > { %861 = vmatprep.subr.bf16.mxu1 %v950_v21 }
  0x1d   : > { %840 = vmatpush3.bf16.msra.mxu0 %v951_v22 }
  0x1e   : > { %862 = vmatpush3.bf16.msra.mxu1 %v952_v23  ;;  %841 = vmatprep.subr.bf16.mxu0 %v953_v24 }
  0x1f   : > { %863 = vmatprep.subr.bf16.mxu1 %v954_v25 }
  0x21   : > { %842 = vmatpush3.bf16.msra.mxu0 %v955_v26 }
  0x22   : > { %864 = vmatpush3.bf16.msra.mxu1 %v956_v27  ;;  %843 = vmatprep.subr.bf16.mxu0 %v957_v28 }
  0x23   : > { %865 = vmatprep.subr.bf16.mxu1 %v958_v29 }
  0x25   : > { %844 = vmatpush3.bf16.msra.mxu0 %v959_v30 }
  0x26   : > { %866 = vmatpush3.bf16.msra.mxu1 %v960_v31  ;;  %882 = vmatprep.subr.bf16.mxu0 %v1000_v34 }
  0x28   : > { %573 = vmatmul.mubr.bf16.vlgmr.msra.gmra.mrb[0].mxu0 %v961_v32 }
  0x29   : > { %614 = vmatmul.mubr.bf16.vlgmr.msra.gmra.mrb[0].mxu1 %v964_v35  ;;  %883 = vmatpush3.bf16.msra.mxu0 %v967_v37 }
  0x2a   : > { %884 = vmatprep.subr.bf16.mxu0 %v1000_v34  ;;  %898 = vmatprep.mubr.msk.bf16.mxu0 %vm1001_vm0, %v1000_v34 }
  0x2d   : > { %885 = vmatpush3.bf16.msra.mxu0 %v968_v38 }
  0x2e   : > { %886 = vmatprep.subr.bf16.mxu0 %v1000_v34 }
  0x31   : > { %887 = vmatpush3.bf16.msra.mxu0 %v969_v39 }
  0x32   : > { %888 = vmatprep.subr.bf16.mxu0 %v1000_v34 }
  0x35   : > { %889 = vmatpush3.bf16.msra.mxu0 %v970_v40 }
  0x36   : > { %890 = vmatprep.subr.bf16.mxu0 %v1000_v34 }
  0x39   : > { %891 = vmatpush3.bf16.msra.mxu0 %v971_v41 }
  0x3a   : > { %892 = vmatprep.subr.bf16.mxu0 %v1000_v34 }
  0x3d   : > { %893 = vmatpush3.bf16.msra.mxu0 %v972_v42 }
  0x3e   : > { %894 = vmatprep.subr.bf16.mxu0 %v1000_v34 }
  0x41   : > { %895 = vmatpush3.bf16.msra.mxu0 %v973_v43 }
  0x42   : > { %896 = vmatprep.subr.bf16.mxu0 %v1000_v34 }
  0x45   : > { %897 = vmatpush3.bf16.msra.mxu0 %v974_v44 }
  0x48   : > { %899 = vmatmul.mubr.bf16.vlgmr.msra.gmra.mrb[4].mxu0 %v975_v45 }
  0xfb   : > { %v845_v46 = vpop.f32.mrb[0].mxu0 }
  0xfc   : > { %v867_v47 = vpop.f32.mrb[0].mxu1  ;;  %v846_v48 = vpop.f32.mrb[1].mxu0 }
  0xfd   : > { %v847_v49 = vadd.f32 %v846_v48, %v845_v46  ;;  %v868_v50 = vpop.f32.mrb[1].mxu1  ;;  %v848_v51 = vpop.f32.mrb[2].mxu0 }
  0xfe   : > { %v869_v52 = vadd.f32 %v868_v50, %v867_v47  ;;  %v870_v53 = vpop.f32.mrb[2].mxu1  ;;  %v849_v54 = vpop.f32.mrb[3].mxu0 }
  0xff   : > { %v850_v55 = vadd.f32 %v849_v54, %v848_v51  ;;  %v871_v56 = vpop.f32.mrb[3].mxu1 }
 0x100   : > { %v872_v57 = vadd.f32 %v871_v56, %v870_v53  ;;  %v616_v58 = vadd.f32 %v869_v52, %v847_v49 }
 0x102   : > { %v619_v59 = vadd.f32 %v872_v57, %v850_v55 }
 0x11b   : > { %v656_v60 = vpop.f32.mrb[4].mxu0 }
 0x11c   : > { %v657_v61 = vadd.f32 %v656_v60, %v616_v58  ;;  %v900_v62 = vpop.f32.mrb[5].mxu0 }
 0x11d   : > { %v659_v63 = vpop.f32.mrb[6].mxu0 }
 0x11e   : > { %v660_v0 = vadd.f32 %v659_v63, %v619_v59  ;;  %v901_v1 = vpop.f32.mrb[7].mxu0 }
 0x120   : > { %v827_v2 = vpack.c.bf16 %v660_v0, %v657_v61 }
 0x122   : > { %828 = vst [vmem:[%s185_s28] sm:$0xff] %v827_v2  }
 0x123 PF: > { %s12_s11 = sadd.s32 1, %s998_s11   ;;  %s1187_s9 = smov %s994_s10 }
 0x124   : > { %p9_p5 = scmp.ge.s32.totalorder %s12_s11, 4   ;;  %s1188_s10 = smov %s1190_s12 }
 0x126   :  { %11 = sbr.rel (!%p9_p5) target bundleno = 2 (0x2), region = 61 }

// kernel: _generator_forward.34
= control target key start
LH: loop header
LB: loop body
LE: loop exit
PB: predicated region body
PF: predicated region fallthrough
CT: control target
= control target key end

     0   :  { %s589_s15 = smov 0   ;;  %s591_s16 = smov 0   ;;  %s636_s0 = inlined_call_operand.vmem [shape: bf16[2,16,128], index: 0, kind: input, shape index: {}]   ;;  %s637_s1 = inlined_call_operand.vmem [shape: f32[1,1,128], index: 1, kind: input, shape index: {}]   ;;  %s638_s2 = inlined_call_operand.vmem [shape: f32[1,1,128], index: 2, kind: input, shape index: {}]   ;;  %s639_s3 = inlined_call_operand.vmem [shape: bf16[2,16,128], index: 3, kind: input, shape index: {}]   ;;  %s640_s4 = inlined_call_operand.vmem [shape: bf16[2,16,128], index: 4, kind: output, shape index: {}]  }
   0x1   :  { %s593_s17 = smov 0  }
   0x2 LB: > { %s26_s18 = sadd.s32 1, %s558_s16  ;;  %p483_p0 = scmp.ge.s32.totalorder %s562_s17, 1  ;;  %s562_s17 = sphi %s593_s17, %s14_s17   ;;  %s558_s16 = sphi %s591_s16, %s642_s16   ;;  %s554_s15 = sphi %s589_s15, %s641_s15  }
   0x3   : > { %p28_p1 = scmp.ge.s32.totalorder %s26_s18, 2  ;;  %p212_p2 = scmp.lt.s32.totalorder %s562_s17, 3 }
   0x5   : > { %s644_s18 = smov (%p28_p1, %s26_s18), 0  ;;  %p213_p3 = pnand %p483_p0, %p212_p2 }
   0x6   : > { %p258_p4 = scmp.lt.s32.totalorder (!%p213_p3), %s554_s15, 1  ;;  %v490_v25 = vld [vmem:[%s637_s1] ss:$0 sm:$0xff] (!%p213_p3) }
   0x7   : > { %216 = sbr.rel (%p213_p3) target bundleno = 80 (0x50), region = 36  ;;  %v491_v29 = vld [vmem:[%s638_s2] ss:$0 sm:$0xff] (!%p213_p3) }
   0xe   : > { %s646_s15 = smov (!%p258_p4, %s554_s15), 1 }
   0xf   : > { %s607_s19 = sshll.u32 %s646_s15, 3 }
  0x10   : > { %s265_s22 = scalar_lea.vmem %s636_s0, %s607_s19  ;;  %s279_s25 = scalar_lea.vmem %s639_s3, %s607_s19 }
  0x11   : > { %v502_v0 = vld [vmem:[%s265_s22] sm:$0xff]   ;;  %s287_s6 = scalar_lea.vmem %s640_s4, %s607_s19 }
  0x12   : > { %v503_v1 = vunpack.c.l.bf16 %v502_v0  ;;  %v504_v2 = vunpack.c.h.bf16 %v502_v0  ;;  %v506_v26 = vld [vmem:[%s279_s25] sm:$0xff]  }
  0x13   : > { %v507_v32 = vunpack.c.l.bf16 %v506_v26  ;;  %v508_v33 = vunpack.c.h.bf16 %v506_v26 }
  0x14   : > { %v292_v3 = vadd.f32 %v504_v2, %v503_v1 }
  0x16   : > { %v293_v4 = vrot.slane %v292_v3, 4 }
  0x18   : > { %v294_v5 = vadd.f32 %v293_v4, %v292_v3 }
  0x1a   : > { %v295_v6 = vrot.slane %v294_v5, 2 }
  0x1c   : > { %v296_v7 = vadd.f32 %v295_v6, %v294_v5 }
  0x1e   : > { %v297_v8 = vrot.slane %v296_v7, 1 }
  0x20   : > { %v298_v9 = vadd.f32 %v297_v8, %v296_v7 }
  0x22   : > { %v300_v10 = vmul.f32 0.0625, %v298_v9 }
  0x24   : > { %v301_v11 = vsub.f32 %v503_v1, %v300_v10  ;;  %v302_v12 = vsub.f32 %v504_v2, %v300_v10 }
  0x26   : > { %v303_v13 = vmul.f32 %v301_v11, %v301_v11  ;;  %v304_v14 = vmul.f32 %v302_v12, %v302_v12 }
  0x28   : > { %v305_v15 = vadd.f32 %v304_v14, %v303_v13 }
  0x2a   : > { %v306_v16 = vrot.slane %v305_v15, 4 }
  0x2c   : > { %v307_v17 = vadd.f32 %v306_v16, %v305_v15 }
  0x2e   : > { %v308_v18 = vrot.slane %v307_v17, 2 }
  0x30   : > { %v309_v19 = vadd.f32 %v308_v18, %v307_v17 }
  0x32   : > { %v310_v20 = vrot.slane %v309_v19, 1 }
  0x34   : > { %v311_v21 = vadd.f32 %v310_v20, %v309_v19 }
  0x36   : > { %v312_v22 = vmul.f32 0.0625, %v311_v21 }
  0x38   : > { %v313_v23 = vadd.f32 1e-05, %v312_v22 }
  0x3a   : > { %538 = vrsqrt.f32 %v313_v23 }
  0x44   : > { %v539_v24 = vpop.eup %538 }
  0x45   : > { %v315_v27 = vmul.f32 %v539_v24, %v301_v11  ;;  %v316_v28 = vmul.f32 %v539_v24, %v302_v12 }
  0x47   : > { %v324_v30 = vmul.f32 %v490_v25, %v315_v27  ;;  %v325_v31 = vmul.f32 %v490_v25, %v316_v28 }
  0x49   : > { %v333_v34 = vadd.f32 %v491_v29, %v324_v30  ;;  %v334_v35 = vadd.f32 %v491_v29, %v325_v31 }
  0x4b   : > { %v339_v36 = vadd.f32 %v507_v32, %v333_v34  ;;  %v340_v37 = vadd.f32 %v508_v33, %v334_v35 }
  0x4d   : > { %v512_v38 = vpack.c.bf16 %v340_v37, %v339_v36 }
  0x4f   : > { %513 = vst [vmem:[%s287_s6] sm:$0xff] %v512_v38  }
  0x50 PF: > { %s14_s17 = sadd.s32 1, %s562_s17   ;;  %s641_s15 = smov %s558_s16 }
  0x51   : > { %p11_p5 = scmp.ge.s32.totalorder %s14_s17, 4   ;;  %s642_s16 = smov %s644_s18 }
  0x53   :  { %13 = sbr.rel (!%p11_p5) target bundleno = 2 (0x2), region = 75 }

// kernel: _generator_forward.39
= control target key start
LH: loop header
LB: loop body
LE: loop exit
PB: predicated region body
PF: predicated region fallthrough
CT: control target
= control target key end

     0   :  { %s614_s9 = smov 0   ;;  %s616_s10 = smov 0   ;;  %s699_s0 = inlined_call_operand.vmem [shape: bf16[32,256], index: 0, kind: input, shape index: {}]   ;;  %s700_s1 = inlined_call_operand.vmem [shape: bf16[256,128], index: 1, kind: input, shape index: {}]   ;;  %s701_s2 = inlined_call_operand.vmem [shape: bf16[32,128], index: 2, kind: output, shape index: {}]  }
   0x1   :  { %s618_s11 = smov 0  }
   0x2 LB: > { %s24_s12 = sadd.s32 1, %s593_s10  ;;  %p474_p0 = scmp.ge.s32.totalorder %s597_s11, 1  ;;  %s597_s11 = sphi %s618_s11, %s12_s11   ;;  %s593_s10 = sphi %s616_s10, %s703_s10   ;;  %s589_s9 = sphi %s614_s9, %s702_s9  }
   0x3   : > { %p26_p1 = scmp.ge.s32.totalorder %s24_s12, 2  ;;  %p137_p2 = scmp.lt.s32.totalorder %s597_s11, 3 }
   0x5   : > { %s705_s12 = smov (%p26_p1, %s24_s12), 0  ;;  %p138_p3 = pnand %p474_p0, %p137_p2 }
   0x6   : > { %v556_v0 = vld [vmem:[%s700_s1 + $0x40] sm:$0xff] (!%p138_p3)   ;;  %s475_s15 = sshll.u32 (!%p138_p3), %s589_s9, 1  ;;  %v558_v2 = vld [vmem:[%s700_s1 + $0x48] sm:$0xff] (!%p138_p3)   ;;  %v560_v4 = vld [vmem:[%s700_s1 + $0x50] sm:$0xff] (!%p138_p3)  }
   0x7   : > { %141 = sbr.rel (%p138_p3) target bundleno = 259 (0x103), region = 28  ;;  %v557_v1 = vld [vmem:[%s700_s1] sm:$0xff] (!%p138_p3)   ;;  %510 = vmatprep.subr.bf16.mxu0 (!%p138_p3), %v556_v0  ;;  %v559_v3 = vld [vmem:[%s700_s1 + $0x8] sm:$0xff] (!%p138_p3)   ;;  %p168_p4 = scmp.lt.s32.totalorder (!%p138_p3), %s475_s15, 3  ;;  %v561_v5 = vld [vmem:[%s700_s1 + $0x10] sm:$0xff] (!%p138_p3)  }
   0x8   : > { %511 = vmatpush3.bf16.msra.mxu0 (!%p138_p3), %v557_v1  ;;  %v562_v6 = vld [vmem:[%s700_s1 + $0x58] sm:$0xff] (!%p138_p3)   ;;  %v564_v8 = vld [vmem:[%s700_s1 + $0x60] sm:$0xff] (!%p138_p3)   ;;  %v566_v10 = vld [vmem:[%s700_s1 + $0x68] sm:$0xff] (!%p138_p3)  }
   0x9   : > { %512 = vmatprep.subr.bf16.mxu0 (!%p138_p3), %v558_v2  ;;  %v563_v7 = vld [vmem:[%s700_s1 + $0x18] sm:$0xff] (!%p138_p3)   ;;  %v565_v9 = vld [vmem:[%s700_s1 + $0x20] sm:$0xff] (!%p138_p3)   ;;  %v567_v12 = vld [vmem:[%s700_s1 + $0x28] sm:$0xff] (!%p138_p3)  }
   0xa   : > { %v568_v13 = vld [vmem:[%s700_s1 + $0x70] sm:$0xff] (!%p138_p3)   ;;  %v570_v15 = vld [vmem:[%s700_s1 + $0x78] sm:$0xff] (!%p138_p3)  }
   0xb   : > { %v569_v14 = vld [vmem:[%s700_s1 + $0x30] sm:$0xff] (!%p138_p3)   ;;  %v571_v16 = vld [vmem:[%s700_s1 + $0x38] sm:$0xff] (!%p138_p3)  }
   0xc   : > { %513 = vmatpush3.bf16.msra.mxu0 (!%p138_p3), %v559_v3 }
   0xd   : > { %514 = vmatprep.subr.bf16.mxu0 (!%p138_p3), %v560_v4 }
   0xe   : > { %s707_s15 = smov (!%p168_p4, %s475_s15), 3 }
   0xf   : > { %s502_s30 = sshll.u32 %s707_s15, 3  ;;  %s479_s26 = sshll.u32 %s707_s15, 2 }
  0x10   : > { %515 = vmatpush3.bf16.msra.mxu0 %v561_v5  ;;  %s172_s7 = scalar_lea.vmem %s699_s0, %s502_s30  ;;  %s185_s29 = scalar_lea.vmem %s701_s2, %s479_s26 }
  0x11   : > { %516 = vmatprep.subr.bf16.mxu0 %v562_v6  ;;  %v574_v11 = vld [vmem:[%s172_s7 + $0x4] ss:$8 sps:$4 sm:$0xff]   ;;  %v572_v17 = vld [vmem:[%s172_s7] ss:$8 sps:$4 sm:$0xff]  }
  0x12   : > { %360 = vmatprep.mubr.bf16.mxu0 %v574_v11 }
  0x14   : > { %517 = vmatpush3.bf16.msra.mxu0 %v563_v7 }
  0x15   : > { %518 = vmatprep.subr.bf16.mxu0 %v564_v8 }
  0x18   : > { %519 = vmatpush3.bf16.msra.mxu0 %v565_v9 }
  0x19   : > { %520 = vmatprep.subr.bf16.mxu0 %v566_v10 }
  0x1c   : > { %521 = vmatpush3.bf16.msra.mxu0 %v567_v12 }
  0x1d   : > { %522 = vmatprep.subr.bf16.mxu0 %v568_v13 }
  0x20   : > { %523 = vmatpush3.bf16.msra.mxu0 %v569_v14 }
  0x21   : > { %524 = vmatprep.subr.bf16.mxu0 %v570_v15 }
  0x24   : > { %525 = vmatpush3.bf16.msra.mxu0 %v571_v16 }
  0x27   : > { %361 = vmatmul.mubr.bf16.vlgmr.msra.gmra.mrb[0].mxu0 %v572_v17 }
  0xfa   : > { %v526_v18 = vpop.f32.mrb[0].mxu0 }
  0xfb   : > { %v527_v19 = vpop.f32.mrb[1].mxu0 }
  0xfc   : > { %v528_v20 = vadd.f32 %v527_v19, %v526_v18  ;;  %v529_v21 = vpop.f32.mrb[2].mxu0 }
  0xfd   : > { %v530_v22 = vpop.f32.mrb[3].mxu0 }
  0xfe   : > { %v531_v23 = vadd.f32 %v530_v22, %v529_v21 }
 0x100   : > { %v508_v24 = vpack.c.bf16 %v531_v23, %v528_v20 }
 0x102   : > { %509 = vst [vmem:[%s185_s29] sm:$0xff] %v508_v24  }
 0x103 PF: > { %s12_s11 = sadd.s32 1, %s597_s11   ;;  %s702_s9 = smov %s593_s10 }
 0x104   : > { %p9_p5 = scmp.ge.s32.totalorder %s12_s11, 4   ;;  %s703_s10 = smov %s705_s12 }
 0x106   :  { %11 = sbr.rel (!%p9_p5) target bundleno = 2 (0x2), region = 61 }

// kernel: _generator_forward.44
= control target key start
LH: loop header
LB: loop body
LE: loop exit
PB: predicated region body
PF: predicated region fallthrough
CT: control target
= control target key end

     0   :  { %s666_s9 = smov 0   ;;  %s668_s10 = smov 0   ;;  %s736_s0 = inlined_call_operand.vmem [shape: bf16[128,128], index: 0, kind: input, shape index: {}]   ;;  %s737_s1 = inlined_call_operand.vmem [shape: bf16[128,128], index: 1, kind: input, shape index: {}]   ;;  %s738_s2 = inlined_call_operand.vmem [shape: bf16[128,128], index: 2, kind: output, shape index: {}]  }
   0x1   :  { %s670_s11 = smov 0  }
   0x2 LB: > { %s24_s12 = sadd.s32 1, %s645_s10  ;;  %p481_p0 = scmp.ge.s32.totalorder %s649_s11, 1  ;;  %s649_s11 = sphi %s670_s11, %s12_s11   ;;  %s645_s10 = sphi %s668_s10, %s740_s10   ;;  %s641_s9 = sphi %s666_s9, %s739_s9  }
   0x3   : > { %p26_p1 = scmp.ge.s32.totalorder %s24_s12, 2  ;;  %p136_p2 = scmp.lt.s32.totalorder %s649_s11, 3 }
   0x5   : > { %s742_s12 = smov (%p26_p1, %s24_s12), 0  ;;  %p137_p3 = pnand %p481_p0, %p136_p2 }
   0x6   : > { %v615_v0 = vld [vmem:[%s737_s1] sm:$0xff] (!%p137_p3)   ;;  %s482_s15 = sshll.u32 (!%p137_p3), %s641_s9, 3  ;;  %v616_v1 = vld [vmem:[%s737_s1 + $0x8] sm:$0xff] (!%p137_p3)   ;;  %v617_v2 = vld [vmem:[%s737_s1 + $0x10] sm:$0xff] (!%p137_p3)  }
   0x7   : > { %140 = sbr.rel (%p137_p3) target bundleno = 257 (0x101), region = 28  ;;  %p166_p4 = scmp.lt.s32.totalorder (!%p137_p3), %s482_s15, 15  ;;  %551 = vmatprep.subr.bf16.mxu0 (!%p137_p3), %v615_v0  ;;  %575 = vmatprep.subr.bf16.mxu1 (!%p137_p3), %v615_v0  ;;  %v618_v3 = vld [vmem:[%s737_s1 + $0x18] sm:$0xff] (!%p137_p3)   ;;  %v619_v6 = vld [vmem:[%s737_s1 + $0x20] sm:$0xff] (!%p137_p3)   ;;  %v620_v7 = vld [vmem:[%s737_s1 + $0x28] sm:$0xff] (!%p137_p3)  }
   0x8   : > { %552 = vmatpush3.bf16.msra.mxu0 (!%p137_p3), %v615_v0  ;;  %583 = vmatpush3.bf16.msra.mxu1 (!%p137_p3), %v615_v0  ;;  %v621_v8 = vld [vmem:[%s737_s1 + $0x30] sm:$0xff] (!%p137_p3)   ;;  %v622_v9 = vld [vmem:[%s737_s1 + $0x38] sm:$0xff] (!%p137_p3)  }
   0x9   : > { %553 = vmatprep.subr.bf16.mxu0 (!%p137_p3), %v616_v1  ;;  %576 = vmatprep.subr.bf16.mxu1 (!%p137_p3), %v616_v1 }
   0xc   : > { %554 = vmatpush3.bf16.msra.mxu0 (!%p137_p3), %v616_v1  ;;  %584 = vmatpush3.bf16.msra.mxu1 (!%p137_p3), %v616_v1 }
   0xd   : > { %555 = vmatprep.subr.bf16.mxu0 (!%p137_p3), %v617_v2  ;;  %577 = vmatprep.subr.bf16.mxu1 (!%p137_p3), %v617_v2 }
   0xe   : > { %s744_s15 = smov (!%p166_p4, %s482_s15), 15 }
   0xf   : > { %s483_s20 = sshll.u32 %s744_s15, 2 }
  0x10   : > { %s701_s23 = scalar_lea.vmem %s736_s0, %s483_s20  ;;  %556 = vmatpush3.bf16.msra.mxu0 %v617_v2  ;;  %585 = vmatpush3.bf16.msra.mxu1 %v617_v2  ;;  %s182_s8 = scalar_lea.vmem %s738_s2, %s483_s20 }
  0x11   : > { %v623_v4 = vld [vmem:[%s701_s23] sm:$0xff]   ;;  %v624_v5 = vld [vmem:[%s701_s23 + $0x10] sm:$0xff]   ;;  %557 = vmatprep.subr.bf16.mxu0 %v618_v3  ;;  %578 = vmatprep.subr.bf16.mxu1 %v618_v3  ;;  %v625_v10 = vld [vmem:[%s701_s23 + $0x8] sm:$0xff]  }
  0x12   : > { %567 = vmatprep.mubr.bf16.mxu0 %v623_v4  ;;  %571 = vmatprep.mubr.bf16.mxu1 %v624_v5  ;;  %v626_v11 = vld [vmem:[%s701_s23 + $0x18] sm:$0xff]  }
  0x14   : > { %558 = vmatpush3.bf16.msra.mxu0 %v618_v3  ;;  %586 = vmatpush3.bf16.msra.mxu1 %v618_v3 }
  0x15   : > { %559 = vmatprep.subr.bf16.mxu0 %v619_v6  ;;  %579 = vmatprep.subr.bf16.mxu1 %v619_v6 }
  0x18   : > { %560 = vmatpush3.bf16.msra.mxu0 %v619_v6  ;;  %587 = vmatpush3.bf16.msra.mxu1 %v619_v6 }
  0x19   : > { %561 = vmatprep.subr.bf16.mxu0 %v620_v7  ;;  %580 = vmatprep.subr.bf16.mxu1 %v620_v7 }
  0x1c   : > { %562 = vmatpush3.bf16.msra.mxu0 %v620_v7  ;;  %588 = vmatpush3.bf16.msra.mxu1 %v620_v7 }
  0x1d   : > { %563 = vmatprep.subr.bf16.mxu0 %v621_v8  ;;  %581 = vmatprep.subr.bf16.mxu1 %v621_v8 }
  0x20   : > { %564 = vmatpush3.bf16.msra.mxu0 %v621_v8  ;;  %589 = vmatpush3.bf16.msra.mxu1 %v621_v8 }
  0x21   : > { %565 = vmatprep.subr.bf16.mxu0 %v622_v9  ;;  %582 = vmatprep.subr.bf16.mxu1 %v622_v9 }
  0x24   : > { %566 = vmatpush3.bf16.msra.mxu0 %v622_v9  ;;  %590 = vmatpush3.bf16.msra.mxu1 %v622_v9 }
  0x27   : > { %568 = vmatmul.mubr.bf16.vlgmr.msra.gmra.mrb[0].mxu0 %v625_v10  ;;  %572 = vmatmul.mubr.bf16.vlgmr.msra.gmra.mrb[0].mxu1 %v626_v11 }
  0xfa   : > { %v569_v12 = vpop.f32.mrb[0].mxu0  ;;  %v573_v13 = vpop.f32.mrb[0].mxu1 }
  0xfb   : > { %v315_v14 = vpop.f32.mrb[1].mxu0  ;;  %v331_v15 = vpop.f32.mrb[1].mxu1 }
  0xfc   : > { %v570_v16 = vpop.f32.mrb[2].mxu0  ;;  %v574_v17 = vpop.f32.mrb[2].mxu1 }
  0xfd   : > { %v524_v18 = vpack.c.bf16 %v570_v16, %v569_v12  ;;  %v534_v19 = vpack.c.bf16 %v574_v17, %v573_v13  ;;  %v318_v20 = vpop.f32.mrb[3].mxu0  ;;  %v334_v21 = vpop.f32.mrb[3].mxu1 }
  0xfe   : > { %v519_v22 = vpack.c.bf16 %v318_v20, %v315_v14  ;;  %v529_v23 = vpack.c.bf16 %v334_v21, %v331_v15 }
  0xff   : > { %536 = vst [vmem:[%s182_s8 + $0x8] sm:$0xff] %v524_v18   ;;  %538 = vst [vmem:[%s182_s8 + $0x18] sm:$0xff] %v534_v19  }
 0x100   : > { %520 = vst [vmem:[%s182_s8] sm:$0xff] %v519_v22   ;;  %537 = vst [vmem:[%s182_s8 + $0x10] sm:$0xff] %v529_v23  }
 0x101 PF: > { %s12_s11 = sadd.s32 1, %s649_s11   ;;  %s739_s9 = smov %s645_s10 }
 0x102   : > { %p9_p5 = scmp.ge.s32.totalorder %s12_s11, 4   ;;  %s740_s10 = smov %s742_s12 }
 0x104   :  { %11 = sbr.rel (!%p9_p5) target bundleno = 2 (0x2), region = 61 }

// kernel: _generator_forward.49
= control target key start
LH: loop header
LB: loop body
LE: loop exit
PB: predicated region body
PF: predicated region fallthrough
CT: control target
= control target key end

     0   :  { %s2990_s9 = smov 0   ;;  %s2992_s10 = smov 0   ;;  %s3532_s0 = inlined_call_operand.vmem [shape: bf16[512,896], index: 0, kind: input, shape index: {}]   ;;  %s3533_s1 = inlined_call_operand.vmem [shape: bf16[896,128], index: 1, kind: input, shape index: {}]   ;;  %s3534_s2 = inlined_call_operand.vmem [shape: f32[512,128], index: 2, kind: output, shape index: {}]  }
   0x1   :  { %s2994_s11 = smov 0  }
   0x2 LB: > { %s24_s12 = sadd.s32 1, %s2969_s10  ;;  %p2111_p0 = scmp.ge.s32.totalorder %s2973_s11, 1  ;;  %s2973_s11 = sphi %s2994_s11, %s12_s11   ;;  %s2969_s10 = sphi %s2992_s10, %s3536_s10   ;;  %s2965_s9 = sphi %s2990_s9, %s3535_s9  }
   0x3   : > { %p26_p1 = scmp.ge.s32.totalorder %s24_s12, 2  ;;  %p137_p2 = scmp.lt.s32.totalorder %s2973_s11, 3 }
   0x5   : > { %s3538_s12 = smov (%p26_p1, %s24_s12), 0  ;;  %p138_p3 = pnand %p2111_p0, %p137_p2 }
   0x6   : > { %v2735_v0 = vld [vmem:[%s3533_s1 + $0x40] sm:$0xff] (!%p138_p3)   ;;  %s2112_s15 = sshll.u32 (!%p138_p3), %s2965_s9, 5  ;;  %v2737_v2 = vld [vmem:[%s3533_s1 + $0x48] sm:$0xff] (!%p138_p3)   ;;  %v2739_v4 = vld [vmem:[%s3533_s1 + $0x50] sm:$0xff] (!%p138_p3)  }
   0x7   : > { %141 = sbr.rel (%p138_p3) target bundleno = 477 (0x1dd), region = 28  ;;  %v2736_v1 = vld [vmem:[%s3533_s1] sm:$0xff] (!%p138_p3)   ;;  %2286 = vmatprep.subr.bf16.mxu0 (!%p138_p3), %v2735_v0  ;;  %2694 = vmatprep.subr.bf16.mxu1 (!%p138_p3), %v2735_v0  ;;  %p168_p4 = scmp.lt.s32.totalorder (!%p138_p3), %s2112_s15, 63  ;;  %v2738_v3 = vld [vmem:[%s3533_s1 + $0x8] sm:$0xff] (!%p138_p3)   ;;  %v2740_v5 = vld [vmem:[%s3533_s1 + $0x10] sm:$0xff] (!%p138_p3)  }
   0x8   : > { %2287 = vmatpush3.bf16.msra.mxu0 (!%p138_p3), %v2736_v1  ;;  %2702 = vmatpush3.bf16.msra.mxu1 (!%p138_p3), %v2736_v1  ;;  %v2741_v6 = vld [vmem:[%s3533_s1 + $0x58] sm:$0xff] (!%p138_p3)   ;;  %v2743_v8 = vld [vmem:[%s3533_s1 + $0x60] sm:$0xff] (!%p138_p3)   ;;  %v2745_v10 = vld [vmem:[%s3533_s1 + $0x68] sm:$0xff] (!%p138_p3)  }
   0x9   : > { %2288 = vmatprep.subr.bf16.mxu0 (!%p138_p3), %v2737_v2  ;;  %2695 = vmatprep.subr.bf16.mxu1 (!%p138_p3), %v2737_v2  ;;  %v2742_v7 = vld [vmem:[%s3533_s1 + $0x18] sm:$0xff] (!%p138_p3)   ;;  %v2744_v9 = vld [vmem:[%s3533_s1 + $0x20] sm:$0xff] (!%p138_p3)   ;;  %v2746_v13 = vld [vmem:[%s3533_s1 + $0x28] sm:$0xff] (!%p138_p3)  }
   0xa   : > { %v2747_v14 = vld [vmem:[%s3533_s1 + $0x70] sm:$0xff] (!%p138_p3)   ;;  %v2749_v16 = vld [vmem:[%s3533_s1 + $0x78] sm:$0xff] (!%p138_p3)   ;;  %v2757_v18 = vld [vmem:[%s3533_s1 + $0xc0] sm:$0xff] (!%p138_p3)  }
   0xb   : > { %v2748_v15 = vld [vmem:[%s3533_s1 + $0x30] sm:$0xff] (!%p138_p3)   ;;  %v2750_v17 = vld [vmem:[%s3533_s1 + $0x38] sm:$0xff] (!%p138_p3)   ;;  %v2758_v21 = vld [vmem:[%s3533_s1 + $0x140] sm:$0xff] (!%p138_p3)  }
   0xc   : > { %2289 = vmatpush3.bf16.msra.mxu0 (!%p138_p3), %v2738_v3  ;;  %2703 = vmatpush3.bf16.msra.mxu1 (!%p138_p3), %v2738_v3  ;;  %v2759_v22 = vld [vmem:[%s3533_s1 + $0x80] sm:$0xff] (!%p138_p3)   ;;  %v2761_v24 = vld [vmem:[%s3533_s1 + $0xc8] sm:$0xff] (!%p138_p3)   ;;  %v2769_v32 = vld [vmem:[%s3533_s1 + $0xd0] sm:$0xff] (!%p138_p3)  }
   0xd   : > { %2290 = vmatprep.subr.bf16.mxu0 (!%p138_p3), %v2739_v4  ;;  %2696 = vmatprep.subr.bf16.mxu1 (!%p138_p3), %v2739_v4  ;;  %v2760_v23 = vld [vmem:[%s3533_s1 + $0x100] sm:$0xff] (!%p138_p3)   ;;  %v2772_v27 = vld [vmem:[%s3533_s1 + $0x148] sm:$0xff] (!%p138_p3)   ;;  %v2770_v33 = vld [vmem:[%s3533_s1 + $0x90] sm:$0xff] (!%p138_p3)  }
   0xe   : > { %s3540_s15 = smov (!%p168_p4, %s2112_s15), 63  ;;  %v2762_v28 = vld [vmem:[%s3533_s1 + $0x88] sm:$0xff]   ;;  %v2771_v34 = vld [vmem:[%s3533_s1 + $0xd8] sm:$0xff]   ;;  %v2781_v38 = vld [vmem:[%s3533_s1 + $0xe0] sm:$0xff]  }
   0xf   : > { %s2710_s28 = smul.u32 28, %s3540_s15  ;;  %v2774_v29 = vld [vmem:[%s3533_s1 + $0x108] sm:$0xff]   ;;  %v2773_v37 = vld [vmem:[%s3533_s1 + $0x98] sm:$0xff]   ;;  %v2792_v41 = vld [vmem:[%s3533_s1 + $0x150] sm:$0xff]  }
  0x10   : > { %2291 = vmatpush3.bf16.msra.mxu0 %v2740_v5  ;;  %2704 = vmatpush3.bf16.msra.mxu1 %v2740_v5  ;;  %v2782_v42 = vld [vmem:[%s3533_s1 + $0xa0] sm:$0xff]   ;;  %v2783_v43 = vld [vmem:[%s3533_s1 + $0xe8] sm:$0xff]   ;;  %v2794_v44 = vld [vmem:[%s3533_s1 + $0x110] sm:$0xff]  }
  0x11   : > { %2292 = vmatprep.subr.bf16.mxu0 %v2741_v6  ;;  %2697 = vmatprep.subr.bf16.mxu1 %v2741_v6  ;;  %s3041_s7 = scalar_lea.vmem %s3532_s0, %s2710_s28  ;;  %v2784_v47 = vld [vmem:[%s3533_s1 + $0xa8] sm:$0xff]   ;;  %v2791_v48 = vld [vmem:[%s3533_s1 + $0xf0] sm:$0xff]   ;;  %v2803_v51 = vld [vmem:[%s3533_s1 + $0x158] sm:$0xff]  }
  0x12   : > { %v2753_v11 = vld [vmem:[%s3041_s7 + $0x4] ss:$28 sps:$4 sm:$0xff]   ;;  %v2763_v25 = vld [vmem:[%s3041_s7 + $0x3c] ss:$28 sps:$4 sm:$0xff]   ;;  %v2775_v35 = vld [vmem:[%s3041_s7 + $0x74] ss:$28 sps:$4 sm:$0xff]  }
  0x13   : > { %v2756_v12 = vld [vmem:[%s3041_s7 + $0x2a4] ss:$28 sps:$4 sm:$0xff]   ;;  %1372 = vmatprep.mubr.bf16.mxu0 %v2753_v11  ;;  %v2765_v26 = vld [vmem:[%s3041_s7 + $0x2dc] ss:$28 sps:$4 sm:$0xff]   ;;  %v2777_v36 = vld [vmem:[%s3041_s7 + $0x314] ss:$28 sps:$4 sm:$0xff]  }
  0x14   : > { %2293 = vmatpush3.bf16.msra.mxu0 %v2742_v7  ;;  %2705 = vmatpush3.bf16.msra.mxu1 %v2742_v7  ;;  %v2751_v19 = vld [vmem:[%s3041_s7] ss:$28 sps:$4 sm:$0xff]   ;;  %v2767_v30 = vld [vmem:[%s3041_s7 + $0x38] ss:$28 sps:$4 sm:$0xff]   ;;  %v2779_v39 = vld [vmem:[%s3041_s7 + $0x70] ss:$28 sps:$4 sm:$0xff]  }
  0x15   : > { %2294 = vmatprep.subr.bf16.mxu0 %v2743_v8  ;;  %2698 = vmatprep.subr.bf16.mxu1 %v2743_v8  ;;  %v2754_v20 = vld [vmem:[%s3041_s7 + $0x2a0] ss:$28 sps:$4 sm:$0xff]   ;;  %v2768_v31 = vld [vmem:[%s3041_s7 + $0x2d8] ss:$28 sps:$4 sm:$0xff]   ;;  %v2780_v40 = vld [vmem:[%s3041_s7 + $0x310] ss:$28 sps:$4 sm:$0xff]  }
  0x16   : > { %1468 = vmatprep.mubr.bf16.mxu1 %v2756_v12  ;;  %v2785_v45 = vld [vmem:[%s3041_s7 + $0xac] ss:$28 sps:$4 sm:$0xff]   ;;  %v2793_v52 = vld [vmem:[%s3533_s1 + $0xb0] sm:$0xff]   ;;  %v2805_v53 = vld [vmem:[%s3533_s1 + $0x118] sm:$0xff]  }
  0x17   : > { %v2787_v46 = vld [vmem:[%s3041_s7 + $0x34c] ss:$28 sps:$4 sm:$0xff]   ;;  %v2797_v54 = vld [vmem:[%s3041_s7 + $0xe4] ss:$28 sps:$4 sm:$0xff]   ;;  %v2795_v55 = vld [vmem:[%s3533_s1 + $0xf8] sm:$0xff]  }
  0x18   : > { %2295 = vmatpush3.bf16.msra.mxu0 %v2744_v9  ;;  %2706 = vmatpush3.bf16.msra.mxu1 %v2744_v9  ;;  %v2789_v49 = vld [vmem:[%s3041_s7 + $0xa8] ss:$28 sps:$4 sm:$0xff]   ;;  %v2796_v57 = vld [vmem:[%s3533_s1 + $0xb8] sm:$0xff]   ;;  %v2812_v6 = vld [vmem:[%s3041_s7 + $0x154] ss:$28 sps:$4 sm:$0xff]  }
  0x19   : > { %2296 = vmatprep.subr.bf16.mxu0 %v2745_v10  ;;  %2699 = vmatprep.subr.bf16.mxu1 %v2745_v10  ;;  %v2790_v50 = vld [vmem:[%s3041_s7 + $0x348] ss:$28 sps:$4 sm:$0xff]   ;;  %v2802_v62 = vld [vmem:[%s3041_s7 + $0xe0] ss:$28 sps:$4 sm:$0xff]   ;;  %v2810_v4 = vld [vmem:[%s3041_s7 + $0x118] ss:$28 sps:$4 sm:$0xff]  }
  0x1a   : > { %v2801_v56 = vld [vmem:[%s3041_s7 + $0xc] ss:$28 sps:$4 sm:$0xff]   ;;  %v2804_v58 = vld [vmem:[%s3533_s1 + $0x180] sm:$0xff]   ;;  %v2806_v63 = vld [vmem:[%s3041_s7 + $0x11c] ss:$28 sps:$4 sm:$0xff]  }
  0x1b   : > { %v2799_v59 = vld [vmem:[%s3041_s7 + $0x8] ss:$28 sps:$4 sm:$0xff]   ;;  %v2811_v5 = vld [vmem:[%s3041_s7 + $0x40] ss:$28 sps:$4 sm:$0xff]   ;;  %v2835_v7 = vld [vmem:[%s3533_s1 + $0x190] sm:$0xff]  }
  0x1c   : > { %2297 = vmatpush3.bf16.msra.mxu0 %v2746_v13  ;;  %2707 = vmatpush3.bf16.msra.mxu1 %v2746_v13  ;;  %v2818_v60 = vld [vmem:[%s3533_s1 + $0x160] sm:$0xff]   ;;  %v2820_v1 = vld [vmem:[%s3533_s1 + $0x188] sm:$0xff]   ;;  %v2814_v8 = vld [vmem:[%s3041_s7 + $0x7c] ss:$28 sps:$4 sm:$0xff]  }
  0x1d   : > { %2298 = vmatprep.subr.bf16.mxu0 %v2747_v14  ;;  %2700 = vmatprep.subr.bf16.mxu1 %v2747_v14  ;;  %v2819_v61 = vld [vmem:[%s3533_s1 + $0x120] sm:$0xff]   ;;  %v2827_v2 = vld [vmem:[%s3533_s1 + $0x168] sm:$0xff]   ;;  %v2842_v9 = vld [vmem:[%s3533_s1 + $0x170] sm:$0xff]  }
  0x1e   : > { %v2808_v0 = vld [vmem:[%s3041_s7 + $0x44] ss:$28 sps:$4 sm:$0xff]   ;;  %v2828_v3 = vld [vmem:[%s3533_s1 + $0x128] sm:$0xff]   ;;  %v2843_v10 = vld [vmem:[%s3533_s1 + $0x130] sm:$0xff]  }
  0x1f   : > { %v2816_v11 = vld [vmem:[%s3041_s7 + $0x150] ss:$28 sps:$4 sm:$0xff]   ;;  %v2817_v12 = vld [vmem:[%s3041_s7 + $0x78] ss:$28 sps:$4 sm:$0xff]  }
  0x20   : > { %2299 = vmatpush3.bf16.msra.mxu0 %v2748_v15  ;;  %2708 = vmatpush3.bf16.msra.mxu1 %v2748_v15  ;;  %v2821_v13 = vld [vmem:[%s3041_s7 + $0x18c] ss:$28 sps:$4 sm:$0xff]   ;;  %v2823_v14 = vld [vmem:[%s3041_s7 + $0xb4] ss:$28 sps:$4 sm:$0xff]   ;;  %v2850_v15 = vld [vmem:[%s3533_s1 + $0x178] sm:$0xff]  }
  0x21   : > { %2300 = vmatprep.subr.bf16.mxu0 %v2749_v16  ;;  %2701 = vmatprep.subr.bf16.mxu1 %v2749_v16  ;;  %v2851_v16 = vld [vmem:[%s3533_s1 + $0x198] sm:$0xff]  }
  0x24   : > { %2301 = vmatpush3.bf16.msra.mxu0 %v2750_v17  ;;  %2709 = vmatpush3.bf16.msra.mxu1 %v2750_v17  ;;  %v2852_v17 = vld [vmem:[%s3533_s1 + $0x138] sm:$0xff]  }
  0x25   : > { %2398 = vmatprep.subr.bf16.mxu1 %v2757_v18  ;;  %2510 = vmatprep.subr.bf16.mxu0 %v2758_v21  ;;  %v2825_v18 = vld [vmem:[%s3041_s7 + $0x188] ss:$28 sps:$4 sm:$0xff]  }
  0x26   : > { %v2831_v21 = vld [vmem:[%s3041_s7 + $0xec] ss:$28 sps:$4 sm:$0xff]  }
  0x27   : > { %1373 = vmatmul.mubr.bf16.vlgmr.msra.gmra.mrb[0].mxu0 %v2751_v19  ;;  %1469 = vmatmul.mubr.bf16.vlgmr.msra.gmra.mrb[0].mxu1 %v2754_v20  ;;  %v2826_v19 = vld [vmem:[%s3041_s7 + $0xb0] ss:$28 sps:$4 sm:$0xff]   ;;  %v2829_v20 = vld [vmem:[%s3041_s7 + $0x1c4] ss:$28 sps:$4 sm:$0xff]  }
  0x28   : > { %2399 = vmatpush3.bf16.msra.mxu1 %v2759_v22  ;;  %2511 = vmatpush3.bf16.msra.mxu0 %v2760_v23  ;;  %v2865_v22 = vld [vmem:[%s3533_s1 + $0x1a0] sm:$0xff]  }
  0x29   : > { %2400 = vmatprep.subr.bf16.mxu1 %v2761_v24  ;;  %1380 = vmatprep.mubr.bf16.mxu0 %v2763_v25  ;;  %v2833_v23 = vld [vmem:[%s3041_s7 + $0x1c0] ss:$28 sps:$4 sm:$0xff]   ;;  %v2834_v24 = vld [vmem:[%s3041_s7 + $0xe8] ss:$28 sps:$4 sm:$0xff]  }
  0x2a   : > { %1476 = vmatprep.mubr.bf16.mxu1 %v2765_v26  ;;  %2512 = vmatprep.subr.bf16.mxu0 %v2772_v27  ;;  %v2878_v25 = vld [vmem:[%s3533_s1 + $0x1a8] sm:$0xff]   ;;  %v2836_v26 = vld [vmem:[%s3041_s7 + $0x1fc] ss:$28 sps:$4 sm:$0xff]   ;;  %v2838_v27 = vld [vmem:[%s3041_s7 + $0x124] ss:$28 sps:$4 sm:$0xff]  }
  0x2c   : > { %2401 = vmatpush3.bf16.msra.mxu1 %v2762_v28  ;;  %2513 = vmatpush3.bf16.msra.mxu0 %v2774_v29  ;;  %v2891_v28 = vld [vmem:[%s3533_s1 + $0x1b0] sm:$0xff]  }
  0x2d   : > { %2402 = vmatprep.subr.bf16.mxu1 %v2769_v32  ;;  %2514 = vmatprep.subr.bf16.mxu0 %v2792_v41  ;;  %v2840_v29 = vld [vmem:[%s3041_s7 + $0x1f8] ss:$28 sps:$4 sm:$0xff]  }
  0x2e   : > { %v2846_v32 = vld [vmem:[%s3041_s7 + $0x15c] ss:$28 sps:$4 sm:$0xff]   ;;  %v2863_v41 = vld [vmem:[%s3041_s7 + $0x14] ss:$28 sps:$4 sm:$0xff]  }
  0x2f   : > { %1381 = vmatmul.mubr.bf16.gmra.mrb[4].mxu0 %v2767_v30  ;;  %1477 = vmatmul.mubr.bf16.gmra.mrb[4].mxu1 %v2768_v31  ;;  %v2841_v30 = vld [vmem:[%s3041_s7 + $0x120] ss:$28 sps:$4 sm:$0xff]   ;;  %v2844_v31 = vld [vmem:[%s3041_s7 + $0x234] ss:$28 sps:$4 sm:$0xff]  }
  0x30   : > { %2403 = vmatpush3.bf16.msra.mxu1 %v2770_v33  ;;  %1388 = vmatprep.mubr.bf16.mxu0 %v2775_v35  ;;  %v2904_v33 = vld [vmem:[%s3533_s1 + $0x1b8] sm:$0xff]  }
  0x31   : > { %2404 = vmatprep.subr.bf16.mxu1 %v2771_v34  ;;  %1484 = vmatprep.mubr.bf16.mxu1 %v2777_v36  ;;  %v2848_v34 = vld [vmem:[%s3041_s7 + $0x230] ss:$28 sps:$4 sm:$0xff]   ;;  %v2849_v35 = vld [vmem:[%s3041_s7 + $0x158] ss:$28 sps:$4 sm:$0xff]  }
  0x32   : > { %2515 = vmatpush3.bf16.msra.mxu0 %v2794_v44  ;;  %v2853_v36 = vld [vmem:[%s3041_s7 + $0x26c] ss:$28 sps:$4 sm:$0xff]   ;;  %v2866_v44 = vld [vmem:[%s3041_s7 + $0x204] ss:$28 sps:$4 sm:$0xff]  }
  0x33   : > { %2516 = vmatprep.subr.bf16.mxu0 %v2803_v51  ;;  %v2877_v51 = vld [vmem:[%s3041_s7 + $0x80] ss:$28 sps:$4 sm:$0xff]  }
  0x34   : > { %2405 = vmatpush3.bf16.msra.mxu1 %v2773_v37  ;;  %v2855_v37 = vld [vmem:[%s3041_s7 + $0x194] ss:$28 sps:$4 sm:$0xff]  }
  0x35   : > { %2406 = vmatprep.subr.bf16.mxu1 %v2781_v38  ;;  %v2857_v38 = vld [vmem:[%s3041_s7 + $0x268] ss:$28 sps:$4 sm:$0xff]  }
  0x36   : > { %2517 = vmatpush3.bf16.msra.mxu0 %v2805_v53  ;;  %v2881_v53 = vld [vmem:[%s3041_s7 + $0xbc] ss:$28 sps:$4 sm:$0xff]  }
  0x37   : > { %1389 = vmatmul.mubr.bf16.gmra.mrb[8].mxu0 %v2779_v39  ;;  %1485 = vmatmul.mubr.bf16.gmra.mrb[8].mxu1 %v2780_v40  ;;  %v2858_v39 = vld [vmem:[%s3041_s7 + $0x190] ss:$28 sps:$4 sm:$0xff]  }
  0x38   : > { %2407 = vmatpush3.bf16.msra.mxu1 %v2782_v42  ;;  %1396 = vmatprep.mubr.bf16.mxu0 %v2785_v45  ;;  %v2859_v40 = vld [vmem:[%s3041_s7 + $0x1cc] ss:$28 sps:$4 sm:$0xff]  }
  0x39   : > { %2408 = vmatprep.subr.bf16.mxu1 %v2783_v43  ;;  %1492 = vmatprep.mubr.bf16.mxu1 %v2787_v46  ;;  %v2861_v42 = vld [vmem:[%s3041_s7 + $0x10] ss:$28 sps:$4 sm:$0xff]   ;;  %v2864_v43 = vld [vmem:[%s3041_s7 + $0x1c8] ss:$28 sps:$4 sm:$0xff]   ;;  %v2870_v46 = vld [vmem:[%s3041_s7 + $0x200] ss:$28 sps:$4 sm:$0xff]  }
  0x3a   : > { %2518 = vmatprep.subr.bf16.mxu0 %v2818_v60  ;;  %v2868_v45 = vld [vmem:[%s3041_s7 + $0x4c] ss:$28 sps:$4 sm:$0xff]   ;;  %v2892_v60 = vld [vmem:[%s3041_s7 + $0x2e4] ss:$28 sps:$4 sm:$0xff]  }
  0x3b   : > { %2519 = vmatpush3.bf16.msra.mxu0 %v2819_v61  ;;  %v2894_v61 = vld [vmem:[%s3041_s7 + $0x12c] ss:$28 sps:$4 sm:$0xff]  }
  0x3c   : > { %2409 = vmatpush3.bf16.msra.mxu1 %v2784_v47  ;;  %2520 = vmatprep.subr.bf16.mxu0 %v2827_v2  ;;  %v2871_v47 = vld [vmem:[%s3041_s7 + $0x48] ss:$28 sps:$4 sm:$0xff]   ;;  %v2902_v2 = vld [vmem:[%s3041_s7 + $0x318] ss:$28 sps:$4 sm:$0xff]  }
  0x3d   : > { %2410 = vmatprep.subr.bf16.mxu1 %v2791_v48  ;;  %v2872_v48 = vld [vmem:[%s3041_s7 + $0x23c] ss:$28 sps:$4 sm:$0xff]  }
  0x3f   : > { %1397 = vmatmul.mubr.bf16.gmra.mrb[12].mxu0 %v2789_v49  ;;  %1493 = vmatmul.mubr.bf16.gmra.mrb[12].mxu1 %v2790_v50  ;;  %v2874_v49 = vld [vmem:[%s3041_s7 + $0x84] ss:$28 sps:$4 sm:$0xff]   ;;  %v2876_v50 = vld [vmem:[%s3041_s7 + $0x238] ss:$28 sps:$4 sm:$0xff]  }
  0x40   : > { %2411 = vmatpush3.bf16.msra.mxu1 %v2793_v52  ;;  %1404 = vmatprep.mubr.bf16.mxu0 %v2797_v54  ;;  %v2879_v52 = vld [vmem:[%s3041_s7 + $0x274] ss:$28 sps:$4 sm:$0xff]  }
  0x41   : > { %2412 = vmatprep.subr.bf16.mxu1 %v2795_v55  ;;  %1533 = vmatprep.mubr.bf16.mxu1 %v2801_v56  ;;  %v2883_v54 = vld [vmem:[%s3041_s7 + $0x270] ss:$28 sps:$4 sm:$0xff]   ;;  %v2884_v55 = vld [vmem:[%s3041_s7 + $0xb8] ss:$28 sps:$4 sm:$0xff]  }
  0x42   : > { %2521 = vmatpush3.bf16.msra.mxu0 %v2828_v3  ;;  %v2885_v56 = vld [vmem:[%s3041_s7 + $0x2ac] ss:$28 sps:$4 sm:$0xff]   ;;  %v2903_v3 = vld [vmem:[%s3041_s7 + $0x160] ss:$28 sps:$4 sm:$0xff]  }
  0x43   : > { %2522 = vmatprep.subr.bf16.mxu0 %v2842_v9  ;;  %v2913_v9 = vld [vmem:[%s3041_s7 + $0x18] ss:$28 sps:$4 sm:$0xff]  }
  0x44   : > { %2413 = vmatpush3.bf16.msra.mxu1 %v2796_v57  ;;  %v2887_v57 = vld [vmem:[%s3041_s7 + $0xf4] ss:$28 sps:$4 sm:$0xff]  }
  0x45   : > { %2646 = vmatprep.subr.bf16.mxu1 %v2804_v58 }
  0x46   : > { %2523 = vmatpush3.bf16.msra.mxu0 %v2843_v10  ;;  %v2914_v10 = vld [vmem:[%s3041_s7 + $0x1d0] ss:$28 sps:$4 sm:$0xff]  }
  0x47   : > { %1405 = vmatmul.mubr.bf16.gmra.mrb[16].mxu0 %v2802_v62  ;;  %1534 = vmatmul.mubr.bf16.vlgmr.msra.gmra.mrb[16].mxu1 %v2799_v59  ;;  %v2890_v59 = vld [vmem:[%s3041_s7 + $0xf0] ss:$28 sps:$4 sm:$0xff]   ;;  %v2896_v62 = vld [vmem:[%s3041_s7 + $0x2e0] ss:$28 sps:$4 sm:$0xff]  }
  0x48   : > { %2647 = vmatpush3.bf16.msra.mxu1 %v2804_v58  ;;  %1412 = vmatprep.mubr.bf16.mxu0 %v2806_v63  ;;  %v2889_v58 = vld [vmem:[%s3041_s7 + $0x2a8] ss:$28 sps:$4 sm:$0xff]  }
  0x49   : > { %1541 = vmatprep.mubr.bf16.mxu1 %v2808_v0  ;;  %2648 = vmatprep.subr.bf16.mxu1 %v2820_v1  ;;  %v2897_v63 = vld [vmem:[%s3041_s7 + $0x128] ss:$28 sps:$4 sm:$0xff]   ;;  %v2898_v0 = vld [vmem:[%s3041_s7 + $0x31c] ss:$28 sps:$4 sm:$0xff]  }
  0x4a   : > { %2524 = vmatprep.subr.bf16.mxu0 %v2850_v15  ;;  %v2920_v15 = vld [vmem:[%s3041_s7 + $0xc0] ss:$28 sps:$4 sm:$0xff]  }
  0x4b   : > { %2525 = vmatpush3.bf16.msra.mxu0 %v2852_v17  ;;  %v2923_v17 = vld [vmem:[%s3041_s7 + $0xf8] ss:$28 sps:$4 sm:$0xff]  }
  0x4c   : > { %2649 = vmatpush3.bf16.msra.mxu1 %v2820_v1  ;;  %v2900_v1 = vld [vmem:[%s3041_s7 + $0x164] ss:$28 sps:$4 sm:$0xff]  }
  0x4d   : > { %2650 = vmatprep.subr.bf16.mxu1 %v2835_v7 }
  0x4f   : > { %1413 = vmatmul.mubr.bf16.gmra.mrb[20].mxu0 %v2810_v4  ;;  %1542 = vmatmul.mubr.bf16.gmra.mrb[20].mxu1 %v2811_v5  ;;  %v2905_v4 = vld [vmem:[%s3041_s7 + $0x354] ss:$28 sps:$4 sm:$0xff]   ;;  %v2907_v5 = vld [vmem:[%s3041_s7 + $0x19c] ss:$28 sps:$4 sm:$0xff]  }
  0x50   : > { %1420 = vmatprep.mubr.bf16.mxu0 %v2812_v6  ;;  %1549 = vmatprep.mubr.bf16.mxu1 %v2814_v8  ;;  %v2909_v6 = vld [vmem:[%s3041_s7 + $0x350] ss:$28 sps:$4 sm:$0xff]  }
  0x51   : > { %2651 = vmatpush3.bf16.msra.mxu1 %v2835_v7  ;;  %v2910_v7 = vld [vmem:[%s3041_s7 + $0x198] ss:$28 sps:$4 sm:$0xff]  }
  0x52   : > { %2652 = vmatprep.subr.bf16.mxu1 %v2851_v16  ;;  %v2911_v8 = vld [vmem:[%s3041_s7 + $0x1d4] ss:$28 sps:$4 sm:$0xff]  }
  0x55   : > { %2653 = vmatpush3.bf16.msra.mxu1 %v2851_v16  ;;  %v2921_v16 = vld [vmem:[%s3041_s7 + $0x244] ss:$28 sps:$4 sm:$0xff]  }
  0x56   : > { %2654 = vmatprep.subr.bf16.mxu1 %v2865_v22 }
  0x57   : > { %1421 = vmatmul.mubr.bf16.gmra.mrb[24].mxu0 %v2816_v11  ;;  %1550 = vmatmul.mubr.bf16.gmra.mrb[24].mxu1 %v2817_v12  ;;  %v2915_v11 = vld [vmem:[%s3041_s7 + $0x50] ss:$28 sps:$4 sm:$0xff]  }
  0x58   : > { %1428 = vmatprep.mubr.bf16.mxu0 %v2821_v13  ;;  %1557 = vmatprep.mubr.bf16.mxu1 %v2823_v14  ;;  %v2916_v12 = vld [vmem:[%s3041_s7 + $0x20c] ss:$28 sps:$4 sm:$0xff]  }
  0x59   : > { %2655 = vmatpush3.bf16.msra.mxu1 %v2865_v22  ;;  %v2918_v13 = vld [vmem:[%s3041_s7 + $0x88] ss:$28 sps:$4 sm:$0xff]   ;;  %v2929_v22 = vld [vmem:[%s3041_s7 + $0x278] ss:$28 sps:$4 sm:$0xff]  }
  0x5a   : > { %2656 = vmatprep.subr.bf16.mxu1 %v2878_v25  ;;  %v2919_v14 = vld [vmem:[%s3041_s7 + $0x208] ss:$28 sps:$4 sm:$0xff]  }
  0x5d   : > { %2657 = vmatpush3.bf16.msra.mxu1 %v2878_v25  ;;  %v2933_v25 = vld [vmem:[%s3041_s7 + $0x1d8] ss:$28 sps:$4 sm:$0xff]  }
  0x5e   : > { %2658 = vmatprep.subr.bf16.mxu1 %v2891_v28 }
  0x5f   : > { %1429 = vmatmul.mubr.bf16.gmra.mrb[28].mxu0 %v2825_v18  ;;  %1558 = vmatmul.mubr.bf16.gmra.mrb[28].mxu1 %v2826_v19  ;;  %v2924_v18 = vld [vmem:[%s3041_s7 + $0x240] ss:$28 sps:$4 sm:$0xff]   ;;  %v2925_v19 = vld [vmem:[%s3041_s7 + $0x130] ss:$28 sps:$4 sm:$0xff]  }
  0x60   : > { %1436 = vmatprep.mubr.bf16.mxu0 %v2829_v20  ;;  %1565 = vmatprep.mubr.bf16.mxu1 %v2831_v21  ;;  %v2926_v20 = vld [vmem:[%s3041_s7 + $0x27c] ss:$28 sps:$4 sm:$0xff]   ;;  %v2928_v21 = vld [vmem:[%s3041_s7 + $0x168] ss:$28 sps:$4 sm:$0xff]  }
  0x61   : > { %2659 = vmatpush3.bf16.msra.mxu1 %v2891_v28  ;;  %v2936_v28 = vld [vmem:[%s3041_s7 + $0x2ec] ss:$28 sps:$4 sm:$0xff]  }
  0x62   : > { %2660 = vmatprep.subr.bf16.mxu1 %v2904_v33 }
  0x65   : > { %2661 = vmatpush3.bf16.msra.mxu1 %v2904_v33  ;;  %v2943_v33 = vld [vmem:[%s3041_s7 + $0x2b8] ss:$28 sps:$4 sm:$0xff]  }
  0x67   : > { %1437 = vmatmul.mubr.bf16.gmra.mrb[32].mxu0 %v2833_v23  ;;  %1566 = vmatmul.mubr.bf16.gmra.mrb[32].mxu1 %v2834_v24  ;;  %v2930_v23 = vld [vmem:[%s3041_s7 + $0x1a0] ss:$28 sps:$4 sm:$0xff]   ;;  %v2931_v24 = vld [vmem:[%s3041_s7 + $0x2b4] ss:$28 sps:$4 sm:$0xff]  }
  0x68   : > { %1444 = vmatprep.mubr.bf16.mxu0 %v2836_v26  ;;  %1573 = vmatprep.mubr.bf16.mxu1 %v2838_v27  ;;  %v2934_v26 = vld [vmem:[%s3041_s7 + $0x2b0] ss:$28 sps:$4 sm:$0xff]  }
  0x69   : > { %v2935_v27 = vld [vmem:[%s3041_s7 + $0x210] ss:$28 sps:$4 sm:$0xff]  }
  0x6f   : > { %1445 = vmatmul.mubr.bf16.gmra.mrb[36].mxu0 %v2840_v29  ;;  %1574 = vmatmul.mubr.bf16.gmra.mrb[36].mxu1 %v2841_v30  ;;  %v2938_v29 = vld [vmem:[%s3041_s7 + $0x248] ss:$28 sps:$4 sm:$0xff]  }
  0x70   : > { %1452 = vmatprep.mubr.bf16.mxu0 %v2844_v31  ;;  %1581 = vmatprep.mubr.bf16.mxu1 %v2846_v32  ;;  %v2939_v30 = vld [vmem:[%s3041_s7 + $0x2e8] ss:$28 sps:$4 sm:$0xff]   ;;  %v2940_v31 = vld [vmem:[%s3041_s7 + $0x280] ss:$28 sps:$4 sm:$0xff]  }
  0x71   : > { %v2941_v32 = vld [vmem:[%s3041_s7 + $0x324] ss:$28 sps:$4 sm:$0xff]  }
  0x77   : > { %1453 = vmatmul.mubr.bf16.gmra.mrb[40].mxu0 %v2848_v34  ;;  %1582 = vmatmul.mubr.bf16.gmra.mrb[40].mxu1 %v2849_v35  ;;  %v2944_v34 = vld [vmem:[%s3041_s7 + $0x320] ss:$28 sps:$4 sm:$0xff]   ;;  %v2945_v35 = vld [vmem:[%s3041_s7 + $0x2f0] ss:$28 sps:$4 sm:$0xff]  }
  0x78   : > { %1460 = vmatprep.mubr.bf16.mxu0 %v2853_v36  ;;  %1589 = vmatprep.mubr.bf16.mxu1 %v2855_v37  ;;  %v2946_v36 = vld [vmem:[%s3041_s7 + $0x35c] ss:$28 sps:$4 sm:$0xff]   ;;  %v2948_v37 = vld [vmem:[%s3041_s7 + $0x328] ss:$28 sps:$4 sm:$0xff]  }
  0x7f   : > { %1461 = vmatmul.mubr.bf16.gmra.mrb[44].mxu0 %v2857_v38  ;;  %1590 = vmatmul.mubr.bf16.gmra.mrb[44].mxu1 %v2858_v39 }
  0x80   : > { %1597 = vmatprep.mubr.bf16.mxu1 %v2859_v40  ;;  %1694 = vmatprep.mubr.bf16.mxu0 %v2863_v41 }
  0x87   : > { %1598 = vmatmul.mubr.bf16.gmra.mrb[48].mxu1 %v2864_v43  ;;  %1695 = vmatmul.mubr.bf16.vlgmr.msra.gmra.mrb[48].mxu0 %v2861_v42  ;;  %v2949_v42 = vld [vmem:[%s3041_s7 + $0x358] ss:$28 sps:$4 sm:$0xff]   ;;  %v2950_v43 = vld [vmem:[%s3041_s7 + $0x360] ss:$28 sps:$4 sm:$0xff]   ;;  %s2115_s7 = sshll.u32 %s3540_s15, 3 }
  0x88   : > { %1605 = vmatprep.mubr.bf16.mxu1 %v2866_v44  ;;  %1702 = vmatprep.mubr.bf16.mxu0 %v2868_v45  ;;  %s3451_s16 = scalar_lea.vmem %s3534_s2, %s2115_s7 }
  0x8f   : > { %1606 = vmatmul.mubr.bf16.gmra.mrb[52].mxu1 %v2870_v46  ;;  %1703 = vmatmul.mubr.bf16.gmra.mrb[52].mxu0 %v2871_v47 }
  0x90   : > { %1613 = vmatprep.mubr.bf16.mxu1 %v2872_v48  ;;  %1710 = vmatprep.mubr.bf16.mxu0 %v2874_v49 }
  0x97   : > { %1614 = vmatmul.mubr.bf16.gmra.mrb[56].mxu1 %v2876_v50  ;;  %1711 = vmatmul.mubr.bf16.gmra.mrb[56].mxu0 %v2877_v51 }
  0x98   : > { %1621 = vmatprep.mubr.bf16.mxu1 %v2879_v52  ;;  %1718 = vmatprep.mubr.bf16.mxu0 %v2881_v53 }
  0x9f   : > { %1622 = vmatmul.mubr.bf16.gmra.mrb[60].mxu1 %v2883_v54  ;;  %1719 = vmatmul.mubr.bf16.gmra.mrb[60].mxu0 %v2884_v55 }
  0xa0   : > { %1629 = vmatprep.mubr.bf16.mxu1 %v2885_v56  ;;  %1726 = vmatprep.mubr.bf16.mxu0 %v2887_v57 }
  0xa7   : > { %1630 = vmatmul.mubr.bf16.gmra.mrb[64].mxu1 %v2889_v58  ;;  %1727 = vmatmul.mubr.bf16.gmra.mrb[64].mxu0 %v2890_v59 }
  0xa8   : > { %1637 = vmatprep.mubr.bf16.mxu1 %v2892_v60  ;;  %1734 = vmatprep.mubr.bf16.mxu0 %v2894_v61 }
  0xaf   : > { %1638 = vmatmul.mubr.bf16.gmra.mrb[68].mxu1 %v2896_v62  ;;  %1735 = vmatmul.mubr.bf16.gmra.mrb[68].mxu0 %v2897_v63 }
  0xb0   : > { %1645 = vmatprep.mubr.bf16.mxu1 %v2898_v0  ;;  %1742 = vmatprep.mubr.bf16.mxu0 %v2900_v1 }
  0xb7   : > { %1646 = vmatmul.mubr.bf16.gmra.mrb[72].mxu1 %v2902_v2  ;;  %1743 = vmatmul.mubr.bf16.gmra.mrb[72].mxu0 %v2903_v3 }
  0xb8   : > { %1653 = vmatprep.mubr.bf16.mxu1 %v2905_v4  ;;  %1750 = vmatprep.mubr.bf16.mxu0 %v2907_v5 }
  0xbf   : > { %1654 = vmatmul.mubr.bf16.gmra.mrb[76].mxu1 %v2909_v6  ;;  %1751 = vmatmul.mubr.bf16.gmra.mrb[76].mxu0 %v2910_v7 }
  0xc0   : > { %1758 = vmatprep.mubr.bf16.mxu0 %v2911_v8  ;;  %2662 = vmatprep.mubr.bf16.mxu1 %v2913_v9 }
  0xc7   : > { %1759 = vmatmul.mubr.bf16.gmra.mrb[80].mxu0 %v2914_v10  ;;  %2663 = vmatmul.mubr.bf16.vlgmr.msra.gmra.mrb[80].mxu1 %v2915_v11 }
  0xc8   : > { %1766 = vmatprep.mubr.bf16.mxu0 %v2916_v12  ;;  %2666 = vmatprep.mubr.bf16.mxu1 %v2918_v13 }
  0xcf   : > { %1767 = vmatmul.mubr.bf16.gmra.mrb[84].mxu0 %v2919_v14  ;;  %2667 = vmatmul.mubr.bf16.gmra.mrb[84].mxu1 %v2920_v15 }
  0xd0   : > { %1774 = vmatprep.mubr.bf16.mxu0 %v2921_v16  ;;  %2670 = vmatprep.mubr.bf16.mxu1 %v2923_v17 }
  0xd7   : > { %1775 = vmatmul.mubr.bf16.gmra.mrb[88].mxu0 %v2924_v18  ;;  %2671 = vmatmul.mubr.bf16.gmra.mrb[88].mxu1 %v2925_v19 }
  0xd8   : > { %1782 = vmatprep.mubr.bf16.mxu0 %v2926_v20  ;;  %2674 = vmatprep.mubr.bf16.mxu1 %v2928_v21 }
  0xdf   : > { %1783 = vmatmul.mubr.bf16.gmra.mrb[92].mxu0 %v2929_v22  ;;  %2675 = vmatmul.mubr.bf16.gmra.mrb[92].mxu1 %v2930_v23 }
  0xe0   : > { %1790 = vmatprep.mubr.bf16.mxu0 %v2931_v24  ;;  %2678 = vmatprep.mubr.bf16.mxu1 %v2933_v25 }
  0xe7   : > { %1791 = vmatmul.mubr.bf16.gmra.mrb[96].mxu0 %v2934_v26  ;;  %2679 = vmatmul.mubr.bf16.gmra.mrb[96].mxu1 %v2935_v27 }
  0xe8   : > { %1798 = vmatprep.mubr.bf16.mxu0 %v2936_v28  ;;  %2682 = vmatprep.mubr.bf16.mxu1 %v2938_v29 }
  0xef   : > { %1799 = vmatmul.mubr.bf16.gmra.mrb[100].mxu0 %v2939_v30  ;;  %2683 = vmatmul.mubr.bf16.gmra.mrb[100].mxu1 %v2940_v31 }
  0xf0   : > { %1806 = vmatprep.mubr.bf16.mxu0 %v2941_v32  ;;  %2686 = vmatprep.mubr.bf16.mxu1 %v2943_v33 }
  0xf7   : > { %1807 = vmatmul.mubr.bf16.gmra.mrb[104].mxu0 %v2944_v34  ;;  %2687 = vmatmul.mubr.bf16.gmra.mrb[104].mxu1 %v2945_v35 }
  0xf8   : > { %1814 = vmatprep.mubr.bf16.mxu0 %v2946_v36  ;;  %2690 = vmatprep.mubr.bf16.mxu1 %v2948_v37 }
  0xfa   : > { %v2302_v38 = vpop.f32.mrb[0].mxu0  ;;  %v2374_v39 = vpop.f32.mrb[0].mxu1 }
  0xfb   : > { %v2303_v40 = vpop.f32.mrb[1].mxu0  ;;  %v2375_v41 = vpop.f32.mrb[1].mxu1 }
  0xfc   : > { %v2304_v44 = vadd.f32 %v2303_v40, %v2302_v38  ;;  %v2305_v45 = vpop.f32.mrb[2].mxu0  ;;  %v3296_v46 = vadd.f32 %v2375_v41, %v2374_v39  ;;  %v2377_v47 = vpop.f32.mrb[2].mxu1 }
  0xfd   : > { %v2306_v48 = vpop.f32.mrb[3].mxu0  ;;  %v2378_v49 = vpop.f32.mrb[3].mxu1 }
  0xfe   : > { %v2307_v50 = vadd.f32 %v2306_v48, %v2305_v45  ;;  %v3298_v51 = vadd.f32 %v2378_v49, %v2377_v47 }
  0xff   : > { %1815 = vmatmul.mubr.bf16.gmra.mrb[108].mxu0 %v2949_v42  ;;  %2691 = vmatmul.mubr.bf16.gmra.mrb[108].mxu1 %v2950_v43 }
 0x102   : > { %v2308_v52 = vpop.f32.mrb[4].mxu0  ;;  %v2380_v53 = vpop.f32.mrb[4].mxu1 }
 0x103   : > { %v2309_v54 = vpop.f32.mrb[5].mxu0  ;;  %v2381_v55 = vpop.f32.mrb[5].mxu1 }
 0x104   : > { %v2310_v56 = vadd.f32 %v2309_v54, %v2308_v52  ;;  %v2311_v57 = vpop.f32.mrb[6].mxu0  ;;  %v3300_v58 = vadd.f32 %v2381_v55, %v2380_v53  ;;  %v2383_v59 = vpop.f32.mrb[6].mxu1 }
 0x105   : > { %v2312_v60 = vpop.f32.mrb[7].mxu0  ;;  %v2384_v61 = vpop.f32.mrb[7].mxu1 }
 0x106   : > { %v2313_v62 = vadd.f32 %v2312_v60, %v2311_v57  ;;  %v3302_v63 = vadd.f32 %v2384_v61, %v2383_v59 }
 0x10a   : > { %v2314_v0 = vpop.f32.mrb[8].mxu0  ;;  %v2386_v1 = vpop.f32.mrb[8].mxu1 }
 0x10b   : > { %v2315_v2 = vpop.f32.mrb[9].mxu0  ;;  %v2387_v3 = vpop.f32.mrb[9].mxu1 }
 0x10c   : > { %v2316_v4 = vadd.f32 %v2315_v2, %v2314_v0  ;;  %v2317_v5 = vpop.f32.mrb[10].mxu0  ;;  %v3304_v6 = vadd.f32 %v2387_v3, %v2386_v1  ;;  %v2389_v7 = vpop.f32.mrb[10].mxu1 }
 0x10d   : > { %v2318_v8 = vpop.f32.mrb[11].mxu0  ;;  %v2390_v9 = vpop.f32.mrb[11].mxu1 }
 0x10e   : > { %v2319_v10 = vadd.f32 %v2318_v8, %v2317_v5  ;;  %v3306_v11 = vadd.f32 %v2390_v9, %v2389_v7 }
 0x112   : > { %v2320_v12 = vpop.f32.mrb[12].mxu0  ;;  %v2392_v13 = vpop.f32.mrb[12].mxu1 }
 0x113   : > { %v2321_v14 = vpop.f32.mrb[13].mxu0  ;;  %v2393_v15 = vpop.f32.mrb[13].mxu1 }
 0x114   : > { %v2322_v16 = vadd.f32 %v2321_v14, %v2320_v12  ;;  %v2323_v17 = vpop.f32.mrb[14].mxu0  ;;  %v3308_v18 = vadd.f32 %v2393_v15, %v2392_v13  ;;  %v2395_v19 = vpop.f32.mrb[14].mxu1 }
 0x115   : > { %v2324_v20 = vpop.f32.mrb[15].mxu0  ;;  %v2396_v21 = vpop.f32.mrb[15].mxu1 }
 0x116   : > { %v2325_v22 = vadd.f32 %v2324_v20, %v2323_v17  ;;  %v3310_v23 = vadd.f32 %v2396_v21, %v2395_v19 }
 0x11a   : > { %v2326_v24 = vpop.f32.mrb[16].mxu0  ;;  %v2414_v25 = vpop.f32.mrb[16].mxu1 }
 0x11b   : > { %v2327_v26 = vpop.f32.mrb[17].mxu0  ;;  %v2415_v27 = vpop.f32.mrb[17].mxu1 }
 0x11c   : > { %v2328_v28 = vadd.f32 %v2327_v26, %v2326_v24  ;;  %v2416_v29 = vadd.f32 %v2415_v27, %v2414_v25  ;;  %v2329_v30 = vpop.f32.mrb[18].mxu0  ;;  %v2417_v31 = vpop.f32.mrb[18].mxu1 }
 0x11d   : > { %v2330_v32 = vpop.f32.mrb[19].mxu0  ;;  %v2418_v33 = vpop.f32.mrb[19].mxu1 }
 0x11e   : > { %v3312_v34 = vadd.f32 %v2416_v29, %v2304_v44  ;;  %v2331_v35 = vadd.f32 %v2330_v32, %v2329_v30  ;;  %v2419_v36 = vadd.f32 %v2418_v33, %v2417_v31 }
 0x120   : > { %v3314_v37 = vadd.f32 %v2419_v36, %v2307_v50 }
 0x122   : > { %v2332_v38 = vpop.f32.mrb[20].mxu0  ;;  %v2420_v39 = vpop.f32.mrb[20].mxu1 }
 0x123   : > { %v2333_v40 = vpop.f32.mrb[21].mxu0  ;;  %v2421_v41 = vpop.f32.mrb[21].mxu1 }
 0x124   : > { %v2334_v42 = vadd.f32 %v2333_v40, %v2332_v38  ;;  %v2422_v43 = vadd.f32 %v2421_v41, %v2420_v39  ;;  %v2335_v45 = vpop.f32.mrb[22].mxu0  ;;  %v2423_v47 = vpop.f32.mrb[22].mxu1 }
 0x125   : > { %v2336_v48 = vpop.f32.mrb[23].mxu0  ;;  %v2424_v49 = vpop.f32.mrb[23].mxu1 }
 0x126   : > { %v3316_v52 = vadd.f32 %v2422_v43, %v2310_v56  ;;  %v2337_v53 = vadd.f32 %v2336_v48, %v2335_v45  ;;  %v2425_v54 = vadd.f32 %v2424_v49, %v2423_v47 }
 0x128   : > { %v3318_v44 = vadd.f32 %v2425_v54, %v2313_v62 }
 0x12a   : > { %v2338_v55 = vpop.f32.mrb[24].mxu0  ;;  %v2426_v57 = vpop.f32.mrb[24].mxu1 }
 0x12b   : > { %v2339_v50 = vpop.f32.mrb[25].mxu0  ;;  %v2427_v59 = vpop.f32.mrb[25].mxu1 }
 0x12c   : > { %v2340_v60 = vadd.f32 %v2339_v50, %v2338_v55  ;;  %v2428_v61 = vadd.f32 %v2427_v59, %v2426_v57  ;;  %v2341_v0 = vpop.f32.mrb[26].mxu0  ;;  %v2429_v1 = vpop.f32.mrb[26].mxu1 }
 0x12d   : > { %v2342_v2 = vpop.f32.mrb[27].mxu0  ;;  %v2430_v3 = vpop.f32.mrb[27].mxu1 }
 0x12e   : > { %v3320_v5 = vadd.f32 %v2428_v61, %v2316_v4  ;;  %v2343_v7 = vadd.f32 %v2342_v2, %v2341_v0  ;;  %v2431_v8 = vadd.f32 %v2430_v3, %v2429_v1 }
 0x130   : > { %v3322_v56 = vadd.f32 %v2431_v8, %v2319_v10 }
 0x132   : > { %v2344_v9 = vpop.f32.mrb[28].mxu0  ;;  %v2432_v12 = vpop.f32.mrb[28].mxu1 }
 0x133   : > { %v2345_v62 = vpop.f32.mrb[29].mxu0  ;;  %v2433_v13 = vpop.f32.mrb[29].mxu1 }
 0x134   : > { %v2346_v14 = vadd.f32 %v2345_v62, %v2344_v9  ;;  %v2434_v15 = vadd.f32 %v2433_v13, %v2432_v12  ;;  %v2347_v17 = vpop.f32.mrb[30].mxu0  ;;  %v2435_v19 = vpop.f32.mrb[30].mxu1 }
 0x135   : > { %v2348_v20 = vpop.f32.mrb[31].mxu0  ;;  %v2436_v21 = vpop.f32.mrb[31].mxu1 }
 0x136   : > { %v3324_v24 = vadd.f32 %v2434_v15, %v2322_v16  ;;  %v2349_v25 = vadd.f32 %v2348_v20, %v2347_v17  ;;  %v2437_v26 = vadd.f32 %v2436_v21, %v2435_v19 }
 0x138   : > { %v3326_v4 = vadd.f32 %v2437_v26, %v2325_v22 }
 0x13a   : > { %v2350_v27 = vpop.f32.mrb[32].mxu0  ;;  %v2438_v29 = vpop.f32.mrb[32].mxu1 }
 0x13b   : > { %v2351_v10 = vpop.f32.mrb[33].mxu0  ;;  %v2439_v30 = vpop.f32.mrb[33].mxu1 }
 0x13c   : > { %v2352_v31 = vadd.f32 %v2351_v10, %v2350_v27  ;;  %v2440_v32 = vadd.f32 %v2439_v30, %v2438_v29  ;;  %v2353_v33 = vpop.f32.mrb[34].mxu0  ;;  %v2441_v36 = vpop.f32.mrb[34].mxu1 }
 0x13d   : > { %v2354_v38 = vpop.f32.mrb[35].mxu0  ;;  %v2442_v39 = vpop.f32.mrb[35].mxu1 }
 0x13e   : > { %v3328_v40 = vadd.f32 %v2440_v32, %v2328_v28  ;;  %v2355_v41 = vadd.f32 %v2354_v38, %v2353_v33  ;;  %v2443_v43 = vadd.f32 %v2442_v39, %v2441_v36 }
 0x140   : > { %v3330_v16 = vadd.f32 %v2443_v43, %v2331_v35 }
 0x142   : > { %v2356_v45 = vpop.f32.mrb[36].mxu0  ;;  %v2444_v47 = vpop.f32.mrb[36].mxu1 }
 0x143   : > { %v2357_v22 = vpop.f32.mrb[37].mxu0  ;;  %v2445_v48 = vpop.f32.mrb[37].mxu1 }
 0x144   : > { %v3332_v49 = vadd.f32 %v2357_v22, %v2356_v45  ;;  %v2446_v54 = vadd.f32 %v2445_v48, %v2444_v47  ;;  %v2359_v55 = vpop.f32.mrb[38].mxu0  ;;  %v2447_v57 = vpop.f32.mrb[38].mxu1 }
 0x145   : > { %v2360_v50 = vpop.f32.mrb[39].mxu0  ;;  %v2448_v59 = vpop.f32.mrb[39].mxu1 }
 0x146   : > { %v3334_v61 = vadd.f32 %v2446_v54, %v2334_v42  ;;  %v2361_v0 = vadd.f32 %v2360_v50, %v2359_v55  ;;  %v2449_v28 = vadd.f32 %v2448_v59, %v2447_v57 }
 0x148   : > { %v3336_v1 = vadd.f32 %v2449_v28, %v2337_v53 }
 0x14a   : > { %v2362_v2 = vpop.f32.mrb[40].mxu0  ;;  %v2450_v35 = vpop.f32.mrb[40].mxu1 }
 0x14b   : > { %v2363_v3 = vpop.f32.mrb[41].mxu0  ;;  %v2451_v8 = vpop.f32.mrb[41].mxu1 }
 0x14c   : > { %v3338_v9 = vadd.f32 %v2363_v3, %v2362_v2  ;;  %v2452_v12 = vadd.f32 %v2451_v8, %v2450_v35  ;;  %v2365_v62 = vpop.f32.mrb[42].mxu0  ;;  %v2453_v13 = vpop.f32.mrb[42].mxu1 }
 0x14d   : > { %v2366_v15 = vpop.f32.mrb[43].mxu0  ;;  %v2454_v17 = vpop.f32.mrb[43].mxu1 }
 0x14e   : > { %v3340_v19 = vadd.f32 %v2452_v12, %v2340_v60  ;;  %v3342_v20 = vadd.f32 %v2366_v15, %v2365_v62  ;;  %v2455_v42 = vadd.f32 %v2454_v17, %v2453_v13 }
 0x150   : > { %v3344_v21 = vadd.f32 %v2455_v42, %v2343_v7 }
 0x152   : > { %v2368_v53 = vpop.f32.mrb[44].mxu0  ;;  %v2456_v26 = vpop.f32.mrb[44].mxu1 }
 0x153   : > { %v2369_v27 = vpop.f32.mrb[45].mxu0  ;;  %v2457_v29 = vpop.f32.mrb[45].mxu1 }
 0x154   : > { %v3346_v10 = vadd.f32 %v2369_v27, %v2368_v53  ;;  %v2458_v30 = vadd.f32 %v2457_v29, %v2456_v26  ;;  %v2371_v32 = vpop.f32.mrb[46].mxu0  ;;  %v2459_v33 = vpop.f32.mrb[46].mxu1 }
 0x155   : > { %v2372_v36 = vpop.f32.mrb[47].mxu0  ;;  %v2460_v38 = vpop.f32.mrb[47].mxu1 }
 0x156   : > { %v3348_v39 = vadd.f32 %v2458_v30, %v2346_v14  ;;  %v3350_v60 = vadd.f32 %v2372_v36, %v2371_v32  ;;  %v2461_v43 = vadd.f32 %v2460_v38, %v2459_v33 }
 0x158   : > { %v3352_v45 = vadd.f32 %v2461_v43, %v2349_v25 }
 0x15a   : > { %v2462_v7 = vpop.f32.mrb[48].mxu1  ;;  %v2526_v47 = vpop.f32.mrb[48].mxu0 }
 0x15b   : > { %v2463_v22 = vpop.f32.mrb[49].mxu1  ;;  %v2527_v48 = vpop.f32.mrb[49].mxu0 }
 0x15c   : > { %v2464_v54 = vadd.f32 %v2463_v22, %v2462_v7  ;;  %v2528_v55 = vadd.f32 %v2527_v48, %v2526_v47  ;;  %v2465_v57 = vpop.f32.mrb[50].mxu1  ;;  %v2529_v50 = vpop.f32.mrb[50].mxu0 }
 0x15d   : > { %v2466_v59 = vpop.f32.mrb[51].mxu1  ;;  %v2530_v28 = vpop.f32.mrb[51].mxu0 }
 0x15e   : > { %v3354_v2 = vadd.f32 %v2464_v54, %v2352_v31  ;;  %v2467_v35 = vadd.f32 %v2466_v59, %v2465_v57  ;;  %v2531_v14 = vadd.f32 %v2530_v28, %v2529_v50  ;;  %v3357_v3 = vadd.f32 %v2528_v55, %v3312_v34 }
 0x160   : > { %v3359_v8 = vadd.f32 %v2467_v35, %v2355_v41  ;;  %v3362_v25 = vadd.f32 %v2531_v14, %v3314_v37 }
 0x162   : > { %v2468_v12 = vpop.f32.mrb[52].mxu1  ;;  %v2532_v62 = vpop.f32.mrb[52].mxu0 }
 0x163   : > { %v2469_v13 = vpop.f32.mrb[53].mxu1  ;;  %v2533_v15 = vpop.f32.mrb[53].mxu0 }
 0x164   : > { %v2470_v17 = vadd.f32 %v2469_v13, %v2468_v12  ;;  %v2534_v42 = vadd.f32 %v2533_v15, %v2532_v62  ;;  %v2471_v53 = vpop.f32.mrb[54].mxu1  ;;  %v2535_v26 = vpop.f32.mrb[54].mxu0 }
 0x165   : > { %v2472_v31 = vpop.f32.mrb[55].mxu1  ;;  %v2536_v27 = vpop.f32.mrb[55].mxu0 }
 0x166   : > { %v3365_v29 = vadd.f32 %v2470_v17, %v3332_v49  ;;  %v2473_v34 = vadd.f32 %v2472_v31, %v2471_v53  ;;  %v2537_v30 = vadd.f32 %v2536_v27, %v2535_v26  ;;  %v3368_v41 = vadd.f32 %v2534_v42, %v3316_v52 }
 0x168   : > { %v3370_v37 = vadd.f32 %v2473_v34, %v2361_v0  ;;  %v3373_v32 = vadd.f32 %v2537_v30, %v3318_v44 }
 0x16a   : > { %v2474_v33 = vpop.f32.mrb[56].mxu1  ;;  %v2538_v36 = vpop.f32.mrb[56].mxu0 }
 0x16b   : > { %v2475_v38 = vpop.f32.mrb[57].mxu1  ;;  %v2539_v43 = vpop.f32.mrb[57].mxu0 }
 0x16c   : > { %v2476_v7 = vadd.f32 %v2475_v38, %v2474_v33  ;;  %v2540_v47 = vadd.f32 %v2539_v43, %v2538_v36  ;;  %v2477_v22 = vpop.f32.mrb[58].mxu1  ;;  %v2541_v48 = vpop.f32.mrb[58].mxu0 }
 0x16d   : > { %v2478_v49 = vpop.f32.mrb[59].mxu1  ;;  %v2542_v54 = vpop.f32.mrb[59].mxu0 }
 0x16e   : > { %v3376_v55 = vadd.f32 %v2476_v7, %v3338_v9  ;;  %v2479_v52 = vadd.f32 %v2478_v49, %v2477_v22  ;;  %v2543_v57 = vadd.f32 %v2542_v54, %v2541_v48  ;;  %v3379_v0 = vadd.f32 %v2540_v47, %v3320_v5 }
 0x170   : > { %v3382_v44 = vadd.f32 %v2479_v52, %v3342_v20  ;;  %v3385_v50 = vadd.f32 %v2543_v57, %v3322_v56 }
 0x172   : > { %v2480_v59 = vpop.f32.mrb[60].mxu1  ;;  %v2544_v28 = vpop.f32.mrb[60].mxu0 }
 0x173   : > { %v2481_v35 = vpop.f32.mrb[61].mxu1  ;;  %v2545_v14 = vpop.f32.mrb[61].mxu0 }
 0x174   : > { %v2482_v12 = vadd.f32 %v2481_v35, %v2480_v59  ;;  %v2546_v62 = vadd.f32 %v2545_v14, %v2544_v28  ;;  %v2483_v13 = vpop.f32.mrb[62].mxu1  ;;  %v2547_v9 = vpop.f32.mrb[62].mxu0 }
 0x175   : > { %v2484_v15 = vpop.f32.mrb[63].mxu1  ;;  %v2548_v17 = vpop.f32.mrb[63].mxu0 }
 0x176   : > { %v3388_v42 = vadd.f32 %v2482_v12, %v3346_v10  ;;  %v2485_v5 = vadd.f32 %v2484_v15, %v2483_v13  ;;  %v2549_v53 = vadd.f32 %v2548_v17, %v2547_v9  ;;  %v3391_v20 = vadd.f32 %v2546_v62, %v3324_v24 }
 0x178   : > { %v3394_v56 = vadd.f32 %v2485_v5, %v3350_v60  ;;  %v3397_v26 = vadd.f32 %v2549_v53, %v3326_v4 }
 0x17a   : > { %v2486_v31 = vpop.f32.mrb[64].mxu1  ;;  %v2550_v27 = vpop.f32.mrb[64].mxu0 }
 0x17b   : > { %v2487_v34 = vpop.f32.mrb[65].mxu1  ;;  %v2551_v30 = vpop.f32.mrb[65].mxu0 }
 0x17c   : > { %v2488_v33 = vadd.f32 %v2487_v34, %v2486_v31  ;;  %v2552_v36 = vadd.f32 %v2551_v30, %v2550_v27  ;;  %v2489_v38 = vpop.f32.mrb[66].mxu1  ;;  %v2553_v10 = vpop.f32.mrb[66].mxu0 }
 0x17d   : > { %v2490_v43 = vpop.f32.mrb[67].mxu1  ;;  %v2554_v7 = vpop.f32.mrb[67].mxu0 }
 0x17e   : > { %v3400_v47 = vadd.f32 %v2488_v33, %v3296_v46  ;;  %v2491_v24 = vadd.f32 %v2490_v43, %v2489_v38  ;;  %v2555_v22 = vadd.f32 %v2554_v7, %v2553_v10  ;;  %v3403_v60 = vadd.f32 %v2552_v36, %v3328_v40 }
 0x180   : > { %v3406_v4 = vadd.f32 %v2491_v24, %v3298_v51  ;;  %v3409_v48 = vadd.f32 %v2555_v22, %v3330_v16 }
 0x182   : > { %v2492_v49 = vpop.f32.mrb[68].mxu1  ;;  %v2556_v54 = vpop.f32.mrb[68].mxu0 }
 0x183   : > { %v2493_v52 = vpop.f32.mrb[69].mxu1  ;;  %v2557_v57 = vpop.f32.mrb[69].mxu0 }
 0x184   : > { %v2494_v59 = vadd.f32 %v2493_v52, %v2492_v49  ;;  %v2558_v28 = vadd.f32 %v2557_v57, %v2556_v54  ;;  %v2495_v35 = vpop.f32.mrb[70].mxu1  ;;  %v2559_v46 = vpop.f32.mrb[70].mxu0 }
 0x185   : > { %v2496_v14 = vpop.f32.mrb[71].mxu1  ;;  %v2560_v12 = vpop.f32.mrb[71].mxu0 }
 0x186   : > { %v3412_v62 = vadd.f32 %v2494_v59, %v3300_v58  ;;  %v2497_v40 = vadd.f32 %v2496_v14, %v2495_v35  ;;  %v2561_v13 = vadd.f32 %v2560_v12, %v2559_v46  ;;  %v3415_v51 = vadd.f32 %v2558_v28, %v3334_v61 }
 0x188   : > { %v3418_v16 = vadd.f32 %v2497_v40, %v3302_v63  ;;  %v3421_v9 = vadd.f32 %v2561_v13, %v3336_v1 }
 0x18a   : > { %v2498_v15 = vpop.f32.mrb[72].mxu1  ;;  %v2562_v17 = vpop.f32.mrb[72].mxu0 }
 0x18b   : > { %v2499_v5 = vpop.f32.mrb[73].mxu1  ;;  %v2563_v53 = vpop.f32.mrb[73].mxu0 }
 0x18c   : > { %v2500_v31 = vadd.f32 %v2499_v5, %v2498_v15  ;;  %v2564_v27 = vadd.f32 %v2563_v53, %v2562_v17  ;;  %v2501_v34 = vpop.f32.mrb[74].mxu1  ;;  %v2565_v58 = vpop.f32.mrb[74].mxu0 }
 0x18d   : > { %v2502_v30 = vpop.f32.mrb[75].mxu1  ;;  %v2566_v33 = vpop.f32.mrb[75].mxu0 }
 0x18e   : > { %v3424_v36 = vadd.f32 %v2500_v31, %v3304_v6  ;;  %v2503_v61 = vadd.f32 %v2502_v30, %v2501_v34  ;;  %v2567_v38 = vadd.f32 %v2566_v33, %v2565_v58  ;;  %v3427_v63 = vadd.f32 %v2564_v27, %v3340_v19 }
 0x190   : > { %v3430_v1 = vadd.f32 %v2503_v61, %v3306_v11  ;;  %v3433_v10 = vadd.f32 %v2567_v38, %v3344_v21 }
 0x192   : > { %v2504_v43 = vpop.f32.mrb[76].mxu1  ;;  %v2568_v7 = vpop.f32.mrb[76].mxu0 }
 0x193   : > { %v2505_v24 = vpop.f32.mrb[77].mxu1  ;;  %v2569_v22 = vpop.f32.mrb[77].mxu0 }
 0x194   : > { %v2506_v49 = vadd.f32 %v2505_v24, %v2504_v43  ;;  %v2570_v54 = vadd.f32 %v2569_v22, %v2568_v7  ;;  %v2507_v6 = vpop.f32.mrb[78].mxu1  ;;  %v2571_v52 = vpop.f32.mrb[78].mxu0 }
 0x195   : > { %v2508_v57 = vpop.f32.mrb[79].mxu1  ;;  %v2572_v59 = vpop.f32.mrb[79].mxu0 }
 0x196   : > { %v3436_v19 = vadd.f32 %v2506_v49, %v3308_v18  ;;  %v2509_v28 = vadd.f32 %v2508_v57, %v2507_v6  ;;  %v2573_v11 = vadd.f32 %v2572_v59, %v2571_v52  ;;  %v3439_v35 = vadd.f32 %v2570_v54, %v3348_v39 }
 0x198   : > { %v3443_v21 = vadd.f32 %v2509_v28, %v3310_v23  ;;  %v3446_v46 = vadd.f32 %v2573_v11, %v3352_v45 }
 0x19a   : > { %v2574_v14 = vpop.f32.mrb[80].mxu0  ;;  %v2664_v18 = vpop.f32.mrb[80].mxu1 }
 0x19b   : > { %v1866_v39 = vadd.f32 %v2664_v18, %v3368_v41  ;;  %v2575_v12 = vpop.f32.mrb[81].mxu0  ;;  %v1857_v40 = vpop.f32.mrb[81].mxu1 }
 0x19c   : > { %v2576_v23 = vadd.f32 %v2575_v12, %v2574_v14  ;;  %v1858_v13 = vadd.f32 %v1857_v40, %v3357_v3  ;;  %v2577_v45 = vpop.f32.mrb[82].mxu0  ;;  %v2665_v15 = vpop.f32.mrb[82].mxu1 }
 0x19d   : > { %1986 = vst [vmem:[%s3451_s16 + $0x10] sm:$0xff] %v1866_v39  ;;  %v1869_v17 = vadd.f32 %v2665_v15, %v3373_v32  ;;  %v2578_v5 = vpop.f32.mrb[83].mxu0  ;;  %v1860_v53 = vpop.f32.mrb[83].mxu1 }
 0x19e   : > { %1984 = vst [vmem:[%s3451_s16] sm:$0xff] %v1858_v13  ;;  %v2579_v31 = vadd.f32 %v2578_v5, %v2577_v45  ;;  %v1861_v27 = vadd.f32 %v1860_v53, %v3362_v25  ;;  %v3460_v41 = vadd.f32 %v2576_v23, %v3354_v2 }
 0x19f   : > { %1987 = vst [vmem:[%s3451_s16 + $0x18] sm:$0xff] %v1869_v17 }
 0x1a0   : > { %1985 = vst [vmem:[%s3451_s16 + $0x8] sm:$0xff] %v1861_v27  ;;  %v3465_v3 = vadd.f32 %v2579_v31, %v3359_v8 }
 0x1a2   : > { %v2580_v34 = vpop.f32.mrb[84].mxu0  ;;  %v2668_v58 = vpop.f32.mrb[84].mxu1 }
 0x1a3   : > { %v1882_v32 = vadd.f32 %v2668_v58, %v3391_v20  ;;  %v2581_v30 = vpop.f32.mrb[85].mxu0  ;;  %v1873_v33 = vpop.f32.mrb[85].mxu1 }
 0x1a4   : > { %v2582_v61 = vadd.f32 %v2581_v30, %v2580_v34  ;;  %v1874_v25 = vadd.f32 %v1873_v33, %v3379_v0  ;;  %v2583_v38 = vpop.f32.mrb[86].mxu0  ;;  %v2669_v2 = vpop.f32.mrb[86].mxu1 }
 0x1a5   : > { %1990 = vst [vmem:[%s3451_s16 + $0x30] sm:$0xff] %v1882_v32  ;;  %v1885_v43 = vadd.f32 %v2669_v2, %v3397_v26  ;;  %v2584_v7 = vpop.f32.mrb[87].mxu0  ;;  %v1876_v24 = vpop.f32.mrb[87].mxu1 }
 0x1a6   : > { %1988 = vst [vmem:[%s3451_s16 + $0x20] sm:$0xff] %v1874_v25  ;;  %v2585_v8 = vadd.f32 %v2584_v7, %v2583_v38  ;;  %v1877_v22 = vadd.f32 %v1876_v24, %v3385_v50  ;;  %v1769_v20 = vadd.f32 %v2582_v61, %v3365_v29 }
 0x1a7   : > { %1991 = vst [vmem:[%s3451_s16 + $0x38] sm:$0xff] %v1885_v43 }
 0x1a8   : > { %1989 = vst [vmem:[%s3451_s16 + $0x28] sm:$0xff] %v1877_v22  ;;  %v1772_v49 = vadd.f32 %v2585_v8, %v3370_v37 }
 0x1aa   : > { %v2586_v0 = vpop.f32.mrb[88].mxu0  ;;  %v2672_v54 = vpop.f32.mrb[88].mxu1 }
 0x1ab   : > { %v1898_v6 = vadd.f32 %v2672_v54, %v3415_v51  ;;  %v2587_v26 = vpop.f32.mrb[89].mxu0  ;;  %v1889_v52 = vpop.f32.mrb[89].mxu1 }
 0x1ac   : > { %v2588_v57 = vadd.f32 %v2587_v26, %v2586_v0  ;;  %v1890_v59 = vadd.f32 %v1889_v52, %v3403_v60  ;;  %v2589_v28 = vpop.f32.mrb[90].mxu0  ;;  %v2673_v50 = vpop.f32.mrb[90].mxu1 }
 0x1ad   : > { %1994 = vst [vmem:[%s3451_s16 + $0x50] sm:$0xff] %v1898_v6  ;;  %v1901_v29 = vadd.f32 %v2673_v50, %v3421_v9  ;;  %v2590_v11 = vpop.f32.mrb[91].mxu0  ;;  %v1892_v14 = vpop.f32.mrb[91].mxu1 }
 0x1ae   : > { %1992 = vst [vmem:[%s3451_s16 + $0x40] sm:$0xff] %v1890_v59  ;;  %v2591_v37 = vadd.f32 %v2590_v11, %v2589_v28  ;;  %v1893_v18 = vadd.f32 %v1892_v14, %v3409_v48  ;;  %v1777_v51 = vadd.f32 %v2588_v57, %v3376_v55 }
 0x1af   : > { %1995 = vst [vmem:[%s3451_s16 + $0x58] sm:$0xff] %v1901_v29 }
 0x1b0   : > { %1993 = vst [vmem:[%s3451_s16 + $0x48] sm:$0xff] %v1893_v18  ;;  %v1780_v39 = vadd.f32 %v2591_v37, %v3382_v44 }
 0x1b2   : > { %v2592_v60 = vpop.f32.mrb[92].mxu0  ;;  %v2676_v12 = vpop.f32.mrb[92].mxu1 }
 0x1b3   : > { %v1914_v40 = vadd.f32 %v2676_v12, %v3439_v35  ;;  %v2593_v9 = vpop.f32.mrb[93].mxu0  ;;  %v1905_v23 = vpop.f32.mrb[93].mxu1 }
 0x1b4   : > { %v2594_v13 = vadd.f32 %v2593_v9, %v2592_v60  ;;  %v1906_v45 = vadd.f32 %v1905_v23, %v3427_v63  ;;  %v2595_v15 = vpop.f32.mrb[94].mxu0  ;;  %v2677_v48 = vpop.f32.mrb[94].mxu1 }
 0x1b5   : > { %1998 = vst [vmem:[%s3451_s16 + $0x70] sm:$0xff] %v1914_v40  ;;  %v1917_v55 = vadd.f32 %v2677_v48, %v3446_v46  ;;  %v2596_v17 = vpop.f32.mrb[95].mxu0  ;;  %v1908_v5 = vpop.f32.mrb[95].mxu1 }
 0x1b6   : > { %1996 = vst [vmem:[%s3451_s16 + $0x60] sm:$0xff] %v1906_v45  ;;  %v2597_v44 = vadd.f32 %v2596_v17, %v2595_v15  ;;  %v1909_v53 = vadd.f32 %v1908_v5, %v3433_v10  ;;  %v1785_v35 = vadd.f32 %v2594_v13, %v3388_v42 }
 0x1b7   : > { %1999 = vst [vmem:[%s3451_s16 + $0x78] sm:$0xff] %v1917_v55 }
 0x1b8   : > { %1997 = vst [vmem:[%s3451_s16 + $0x68] sm:$0xff] %v1909_v53  ;;  %v1788_v31 = vadd.f32 %v2597_v44, %v3394_v56 }
 0x1ba   : > { %v2598_v63 = vpop.f32.mrb[96].mxu0  ;;  %v2680_v27 = vpop.f32.mrb[96].mxu1 }
 0x1bb   : > { %v1930_v34 = vadd.f32 %v2680_v27, %v1769_v20  ;;  %v2599_v46 = vpop.f32.mrb[97].mxu0  ;;  %v1921_v58 = vpop.f32.mrb[97].mxu1 }
 0x1bc   : > { %v2600_v32 = vadd.f32 %v2599_v46, %v2598_v63  ;;  %v1922_v30 = vadd.f32 %v1921_v58, %v3460_v41  ;;  %v2601_v33 = vpop.f32.mrb[98].mxu0  ;;  %v2681_v61 = vpop.f32.mrb[98].mxu1 }
 0x1bd   : > { %2002 = vst [vmem:[%s3451_s16 + $0x90] sm:$0xff] %v1930_v34  ;;  %v1933_v10 = vadd.f32 %v2681_v61, %v1772_v49  ;;  %v2602_v42 = vpop.f32.mrb[99].mxu0  ;;  %v1924_v25 = vpop.f32.mrb[99].mxu1 }
 0x1be   : > { %2000 = vst [vmem:[%s3451_s16 + $0x80] sm:$0xff] %v1922_v30  ;;  %v2603_v38 = vadd.f32 %v2602_v42, %v2601_v33  ;;  %v1925_v56 = vadd.f32 %v1924_v25, %v3465_v3  ;;  %v1793_v2 = vadd.f32 %v2600_v32, %v3400_v47 }
 0x1bf   : > { %2003 = vst [vmem:[%s3451_s16 + $0x98] sm:$0xff] %v1933_v10 }
 0x1c0   : > { %2001 = vst [vmem:[%s3451_s16 + $0x88] sm:$0xff] %v1925_v56  ;;  %v1796_v43 = vadd.f32 %v2603_v38, %v3406_v4 }
 0x1c2   : > { %v2604_v7 = vpop.f32.mrb[100].mxu0  ;;  %v2684_v41 = vpop.f32.mrb[100].mxu1 }
 0x1c3   : > { %v1946_v24 = vadd.f32 %v2684_v41, %v1785_v35  ;;  %v2605_v8 = vpop.f32.mrb[101].mxu0  ;;  %v1937_v22 = vpop.f32.mrb[101].mxu1 }
 0x1c4   : > { %v2606_v20 = vadd.f32 %v2605_v8, %v2604_v7  ;;  %v1938_v49 = vadd.f32 %v1937_v22, %v1777_v51  ;;  %v2607_v0 = vpop.f32.mrb[102].mxu0  ;;  %v2685_v54 = vpop.f32.mrb[102].mxu1 }
 0x1c5   : > { %2006 = vst [vmem:[%s3451_s16 + $0xb0] sm:$0xff] %v1946_v24  ;;  %v1949_v3 = vadd.f32 %v2685_v54, %v1788_v31  ;;  %v2608_v6 = vpop.f32.mrb[103].mxu0  ;;  %v1940_v47 = vpop.f32.mrb[103].mxu1 }
 0x1c6   : > { %2004 = vst [vmem:[%s3451_s16 + $0xa0] sm:$0xff] %v1938_v49  ;;  %v2609_v26 = vadd.f32 %v2608_v6, %v2607_v0  ;;  %v1941_v52 = vadd.f32 %v1940_v47, %v1780_v39  ;;  %v1801_v4 = vadd.f32 %v2606_v20, %v3412_v62 }
 0x1c7   : > { %2007 = vst [vmem:[%s3451_s16 + $0xb8] sm:$0xff] %v1949_v3 }
 0x1c8   : > { %2005 = vst [vmem:[%s3451_s16 + $0xa8] sm:$0xff] %v1941_v52  ;;  %v1804_v57 = vadd.f32 %v2609_v26, %v3418_v16 }
 0x1ca   : > { %v2610_v59 = vpop.f32.mrb[104].mxu0  ;;  %v2688_v28 = vpop.f32.mrb[104].mxu1 }
 0x1cb   : > { %v1962_v50 = vadd.f32 %v2688_v28, %v1801_v4  ;;  %v2611_v29 = vpop.f32.mrb[105].mxu0  ;;  %v1953_v11 = vpop.f32.mrb[105].mxu1 }
 0x1cc   : > { %v2612_v14 = vadd.f32 %v2611_v29, %v2610_v59  ;;  %v1954_v37 = vadd.f32 %v1953_v11, %v1793_v2  ;;  %v2613_v18 = vpop.f32.mrb[106].mxu0  ;;  %v2689_v51 = vpop.f32.mrb[106].mxu1 }
 0x1cd   : > { %2010 = vst [vmem:[%s3451_s16 + $0xd0] sm:$0xff] %v1962_v50  ;;  %v1965_v39 = vadd.f32 %v2689_v51, %v1804_v57  ;;  %v2614_v60 = vpop.f32.mrb[107].mxu0  ;;  %v1956_v62 = vpop.f32.mrb[107].mxu1 }
 0x1ce   : > { %2008 = vst [vmem:[%s3451_s16 + $0xc0] sm:$0xff] %v1954_v37  ;;  %v2615_v12 = vadd.f32 %v2614_v60, %v2613_v18  ;;  %v1957_v40 = vadd.f32 %v1956_v62, %v1796_v43  ;;  %v1809_v16 = vadd.f32 %v2612_v14, %v3424_v36 }
 0x1cf   : > { %2011 = vst [vmem:[%s3451_s16 + $0xd8] sm:$0xff] %v1965_v39 }
 0x1d0   : > { %2009 = vst [vmem:[%s3451_s16 + $0xc8] sm:$0xff] %v1957_v40  ;;  %v1812_v9 = vadd.f32 %v2615_v12, %v3430_v1 }
 0x1d2   : > { %v2616_v23 = vpop.f32.mrb[108].mxu0  ;;  %v2692_v13 = vpop.f32.mrb[108].mxu1 }
 0x1d3   : > { %v2617_v45 = vpop.f32.mrb[109].mxu0  ;;  %v1969_v15 = vpop.f32.mrb[109].mxu1 }
 0x1d4   : > { %v2618_v48 = vadd.f32 %v2617_v45, %v2616_v23  ;;  %v1970_v55 = vadd.f32 %v1969_v15, %v1809_v16  ;;  %v2619_v17 = vpop.f32.mrb[110].mxu0  ;;  %v2693_v5 = vpop.f32.mrb[110].mxu1 }
 0x1d5   : > { %v2620_v44 = vpop.f32.mrb[111].mxu0  ;;  %v1972_v53 = vpop.f32.mrb[111].mxu1 }
 0x1d6   : > { %v1817_v35 = vadd.f32 %v2618_v48, %v3436_v19  ;;  %2012 = vst [vmem:[%s3451_s16 + $0xe0] sm:$0xff] %v1970_v55  ;;  %v2621_v36 = vadd.f32 %v2620_v44, %v2619_v17  ;;  %v1973_v31 = vadd.f32 %v1972_v53, %v1812_v9 }
 0x1d8   : > { %v1978_v63 = vadd.f32 %v2692_v13, %v1817_v35  ;;  %v1820_v1 = vadd.f32 %v2621_v36, %v3443_v21  ;;  %2013 = vst [vmem:[%s3451_s16 + $0xe8] sm:$0xff] %v1973_v31 }
 0x1da   : > { %2014 = vst [vmem:[%s3451_s16 + $0xf0] sm:$0xff] %v1978_v63  ;;  %v1981_v27 = vadd.f32 %v2693_v5, %v1820_v1 }
 0x1dc   : > { %2015 = vst [vmem:[%s3451_s16 + $0xf8] sm:$0xff] %v1981_v27 }
 0x1dd PF: > { %s12_s11 = sadd.s32 1, %s2973_s11   ;;  %s3535_s9 = smov %s2969_s10 }
 0x1de   : > { %p9_p5 = scmp.ge.s32.totalorder %s12_s11, 4   ;;  %s3536_s10 = smov %s3538_s12 }
 0x1e0   :  { %11 = sbr.rel (!%p9_p5) target bundleno = 2 (0x2), region = 61 }

</bundles_post_ra>
